<compile_context>
chip_gen: v7x
topology: tpu7x:2x2x1
jax: 0.10.0
libtpu: 0.0.40
codegen_flags: <defaults>
</compile_context>

<pallas_src>
import functools

import jax
import jax.numpy as jnp
from jax.experimental import pallas as pl
from jax.experimental.pallas import tpu as pltpu


def _round_up(x, m):
    return ((x + m - 1) // m) * m


def _grid_sample_kernel(pts_ref, grid_ref, tab_ref, r_ref, out_ref, *, n_cells):
    """One tile of TM query points against the (z,y)-flattened grid."""
    N = float(n_cells)
    K = grid_ref.shape[0]        # padded N^2   (rows  : z*N + y)
    CL = grid_ref.shape[1]       # padded N*C   (lanes : x*C + c)

    pts = pts_ref[...].astype(jnp.float32)                # (TM, 3) = (x, y, z)
    # Unnormalize, align_corners=False: u = ((coord + 1) * size - 1) / 2
    u = ((pts + 1.0) * N - 1.0) * 0.5                      # (TM, 3)
    ux, uy, uz = u[:, 0:1], u[:, 1:2], u[:, 2:3]           # (TM, 1) each

    lane_z = tab_ref[0:1, 0:K]                             # (1, K)  f32 z index
    lane_y = tab_ref[1:2, 0:K]                             # (1, K)  f32 y index
    lane_x = tab_ref[2:3, 0:CL]                            # (1, CL) f32 x index

    # Separable tent weights reproduce trilinear interpolation with
    # padding_mode='zeros' exactly (out-of-range taps get weight 0).
    w_zy = (jnp.maximum(1.0 - jnp.abs(lane_z - uz), 0.0) *
            jnp.maximum(1.0 - jnp.abs(lane_y - uy), 0.0))          # (TM, K)

    zy = jnp.dot(w_zy, grid_ref[...],
                 preferred_element_type=jnp.float32,
                 precision=jax.lax.Precision.HIGHEST)              # (TM, CL)

    wx = jnp.maximum(1.0 - jnp.abs(lane_x - ux), 0.0)              # (TM, CL)
    # Fold the x axis back out of the lanes: out[:, c] = sum_x prod[:, x*C+c].
    out_ref[...] = jnp.dot(zy * wx, r_ref[...],
                           preferred_element_type=jnp.float32,
                           precision=jax.lax.Precision.HIGHEST)    # (TM, C_pad)


def grid_embed(points, grid_param, *, tm=1024):
    """Pallas equivalent of Grid.forward.

    points:     (M, 3) float32 in grid_sample normalized coords (x->W, y->H, z->D).
    grid_param: (C, N, N, N) float32  (the nn.Parameter without the batch dim).
    returns:    (M, C) float32
    """
    C, N, _, _ = grid_param.shape
    K = N * N
    NC = N * C
    K_pad = _round_up(K, 128)          # lane-aligned; also satisfies sublane x8
    # NOTE: when N*C grows past 128, prefer padding straight to a multiple of
    # 256 so a single MXU pass is full on v6e/v7x; at N*C <= 128 this is 128.
    C_LANE = _round_up(NC, 128)
    C_pad = _round_up(C, 8)            # slim (masked-store) output lane width
    L = max(K_pad, C_LANE)

    # TODO(synk): for large grids (n_cells >~ 48) the resident (N^2, N*C) f32
    # slab (and the (tm, N^2) tent matrix) no longer fits VMEM; that regime
    # needs a K-tiled grid axis with an f32 accumulator (or an HBM gather of
    # the 2-slab z neighborhood) plus single-buffered constant operands
    # (pl.Buffered(1)) — re-derive the budget against v7x's 64 MiB VMEM.

    # Flatten grid channel-last with x folded into lanes: row = z*N + y,
    # col = x*C + c.  Kept in f32 (bf16 would not meet the 1e-4 check).
    grid_zy = jnp.transpose(grid_param, (1, 2, 3, 0)).reshape(K, NC)
    grid_zy = jnp.pad(grid_zy.astype(jnp.float32),
                      ((0, K_pad - K), (0, C_LANE - NC)))

    # Per-axis lane-index tables, precomputed outside the kernel (avoids any
    # (TM, K) iota or int div/mod inside the kernel).
    idx = jnp.arange(L, dtype=jnp.int32)
    sentinel = -2 * N                      # tent weight is exactly 0 there
    lane_z = jnp.where(idx < K, idx // N, sentinel).astype(jnp.float32)
    lane_y = jnp.where(idx < K, idx % N, sentinel).astype(jnp.float32)
    lane_x = jnp.where(idx < NC, idx // C, sentinel).astype(jnp.float32)
    lane_tab = jnp.zeros((8, L), jnp.float32)
    lane_tab = lane_tab.at[0].set(lane_z).at[1].set(lane_y).at[2].set(lane_x)

    # Constant fold matrix: out[:, c] = sum_x prod[:, x*C + c].  Only C_pad
    # output lanes (vs 128 previously) -> ~16x fewer HBM bytes written/point.
    l_idx = jnp.arange(C_LANE, dtype=jnp.int32)[:, None]
    c_idx = jnp.arange(C_pad, dtype=jnp.int32)[None, :]
    r_mat = (((l_idx % C) == c_idx) & (l_idx < NC)).astype(jnp.float32)

    M = points.shape[0]
    # Keep >= 2 grid tiles (v7x has 2 TensorCores) but never drop the tile
    # below 128 points; large M saturates at tm (default 1024) to amortize the
    # ~0.35 us per-grid-step pipeline overhead.
    tm_eff = max(128, min(tm, _round_up(-(-M // 2), 128)))
    Mp = _round_up(M, tm_eff)
    # Padded tail rows are (0,0,0): valid in-grid coords, wasted but harmless.
    pts = jnp.pad(points.astype(jnp.float32), ((0, Mp - M), (0, 0)))

    cost = pl.CostEstimate(
        flops=2 * Mp * (K_pad * C_LANE + C_LANE * C_pad),
        transcendentals=0,
        bytes_accessed=4 * (Mp * 3 + K_pad * C_LANE + 8 * L
                            + C_LANE * C_pad + Mp * C_pad),
    )

    out = pl.pallas_call(
        functools.partial(_grid_sample_kernel, n_cells=N),
        out_shape=jax.ShapeDtypeStruct((Mp, C_pad), jnp.float32),
        grid_spec=pltpu.PrefetchScalarGridSpec(
            num_scalar_prefetch=0,
            grid=(Mp // tm_eff,),
            in_specs=[
                pl.BlockSpec((tm_eff, 3), lambda i: (i, 0)),          # point tile
                pl.BlockSpec((K_pad, C_LANE), lambda i: (0, 0)),      # grid (resident)
                pl.BlockSpec((8, L), lambda i: (0, 0)),               # lane tables
                pl.BlockSpec((C_LANE, C_pad), lambda i: (0, 0)),      # x-fold matrix
            ],
            out_specs=pl.BlockSpec((tm_eff, C_pad), lambda i: (i, 0)),
        ),
        compiler_params=pltpu.CompilerParams(
            # Point-tile axis is independent -> sharded across TensorCores.
            dimension_semantics=("parallel",),
            # Default scoped VMEM limit is ample at N=16 (resident < 0.5 MB).
        ),
        cost_estimate=cost,
    )(pts, grid_zy, lane_tab, r_mat)

    return out[:M, :C]


def _ref_grid_sample(grid_param, points):
    """Pure-JAX reference of F.grid_sample (bilinear, zeros, align_corners=False)."""
    C, D, H, W = grid_param.shape
    x, y, z = points[:, 0], points[:, 1], points[:, 2]
    ix = ((x + 1.0) * W - 1.0) * 0.5
    iy = ((y + 1.0) * H - 1.0) * 0.5
    iz = ((z + 1.0) * D - 1.0) * 0.5
    ix0, iy0, iz0 = jnp.floor(ix), jnp.floor(iy), jnp.floor(iz)
    tx, ty, tz = ix - ix0, iy - iy0, iz - iz0
    ix0, iy0, iz0 = ix0.astype(jnp.int32), iy0.astype(jnp.int32), iz0.astype(jnp.int32)

    out = jnp.zeros((points.shape[0], C), jnp.float32)
    for dz in (0, 1):
        zi = iz0 + dz
        wz = tz if dz == 1 else (1.0 - tz)
        for dy in (0, 1):
            yi = iy0 + dy
            wy = ty if dy == 1 else (1.0 - ty)
            for dx in (0, 1):
                xi = ix0 + dx
                wx = tx if dx == 1 else (1.0 - tx)
                valid = ((xi >= 0) & (xi < W) & (yi >= 0) & (yi < H)
                         & (zi >= 0) & (zi < D))
                xc = jnp.clip(xi, 0, W - 1)
                yc = jnp.clip(yi, 0, H - 1)
                zc = jnp.clip(zi, 0, D - 1)
                vals = grid_param[:, zc, yc, xc]            # (C, M)
                w = jnp.where(valid, wz * wy * wx, 0.0)     # (M,)
                out = out + (vals * w).T
    return out


if __name__ == "__main__":
    key = jax.random.PRNGKey(0)
    k_grid, k_pts = jax.random.split(key)

    # Deterministic synthetic parameters (module default out_dim=3; small N).
    n_cells, out_dim = 16, 3
    grid_param = jax.random.normal(
        k_grid, (out_dim, n_cells, n_cells, n_cells), jnp.float32)

    # Query points; range slightly beyond [-1, 1] to exercise zero-padding.
    M = 200
    points = jax.random.uniform(
        k_pts, (M, 3), jnp.float32, minval=-1.1, maxval=1.1)

    out = grid_embed(points, grid_param)
    out = jax.block_until_ready(out)

    ref = _ref_grid_sample(grid_param, points)
    assert out.shape == (M, out_dim)
    assert bool(jnp.allclose(out, ref, atol=1e-4, rtol=1e-4)), "mismatch vs reference"

    print("KERNEL_OK")
</pallas_src>

<mosaic_0001>
module attributes {stable_mosaic.version = 11 : i64} {
  func.func @_grid_sample_kernel(%arg0: i32, %arg1: memref<128x3xf32, #tpu.memory_space<vmem>>, %arg2: memref<256x128xf32, #tpu.memory_space<vmem>>, %arg3: memref<8x256xf32, #tpu.memory_space<vmem>>, %arg4: memref<128x8xf32, #tpu.memory_space<vmem>>, %arg5: memref<128x8xf32, #tpu.memory_space<vmem>>) attributes {dimension_semantics = [#tpu.dimension_semantics<parallel>], iteration_bounds = array<i64: 2>, scalar_prefetch = 0 : i64, scratch_operands = 0 : i64, tpu.core_type = #tpu.core_type<tc>, window_params = [{transform_indices = @transform_0, window_bounds = array<i64: 128, 3>}, {pipeline_mode = #tpu.pipeline_mode<synchronous>, transform_indices = @transform_1, window_bounds = array<i64: 256, 128>}, {pipeline_mode = #tpu.pipeline_mode<synchronous>, transform_indices = @transform_2, window_bounds = array<i64: 8, 256>}, {pipeline_mode = #tpu.pipeline_mode<synchronous>, transform_indices = @transform_3, window_bounds = array<i64: 128, 8>}, {transform_indices = @transform_4, window_bounds = array<i64: 128, 8>}]} {
    %c0 = arith.constant 0 : index
    %c0_0 = arith.constant 0 : index
    %0 = vector.load %arg1[%c0, %c0_0] : memref<128x3xf32, #tpu.memory_space<vmem>>, vector<128x3xf32>
    %cst = arith.constant 1.000000e+00 : f32
    %1 = vector.broadcast %cst : f32 to vector<128x3xf32>
    %2 = arith.addf %0, %1 : vector<128x3xf32>
    %cst_1 = arith.constant 1.600000e+01 : f32
    %3 = vector.broadcast %cst_1 : f32 to vector<128x3xf32>
    %4 = arith.mulf %2, %3 : vector<128x3xf32>
    %cst_2 = arith.constant 1.000000e+00 : f32
    %5 = vector.broadcast %cst_2 : f32 to vector<128x3xf32>
    %6 = arith.subf %4, %5 : vector<128x3xf32>
    %cst_3 = arith.constant 5.000000e-01 : f32
    %7 = vector.broadcast %cst_3 : f32 to vector<128x3xf32>
    %8 = arith.mulf %6, %7 : vector<128x3xf32>
    %9 = vector.extract_strided_slice %8 {offsets = [0, 0], sizes = [128, 1], strides = [1, 1]} : vector<128x3xf32> to vector<128x1xf32>
    %10 = vector.extract_strided_slice %8 {offsets = [0, 1], sizes = [128, 1], strides = [1, 1]} : vector<128x3xf32> to vector<128x1xf32>
    %11 = vector.extract_strided_slice %8 {offsets = [0, 2], sizes = [128, 1], strides = [1, 1]} : vector<128x3xf32> to vector<128x1xf32>
    %c0_4 = arith.constant 0 : index
    %c0_5 = arith.constant 0 : index
    %12 = vector.load %arg3[%c0_4, %c0_5] : memref<8x256xf32, #tpu.memory_space<vmem>>, vector<1x256xf32>
    %c1 = arith.constant 1 : index
    %c0_6 = arith.constant 0 : index
    %13 = vector.load %arg3[%c1, %c0_6] : memref<8x256xf32, #tpu.memory_space<vmem>>, vector<1x256xf32>
    %c2 = arith.constant 2 : index
    %c0_7 = arith.constant 0 : index
    %14 = vector.load %arg3[%c2, %c0_7] : memref<8x256xf32, #tpu.memory_space<vmem>>, vector<1x128xf32>
    %15 = vector.broadcast %12 : vector<1x256xf32> to vector<128x256xf32>
    %16 = vector.broadcast %11 : vector<128x1xf32> to vector<128x256xf32>
    %17 = arith.subf %15, %16 : vector<128x256xf32>
    %18 = math.absf %17 : vector<128x256xf32>
    %cst_8 = arith.constant 1.000000e+00 : f32
    %19 = vector.broadcast %cst_8 : f32 to vector<128x256xf32>
    %20 = arith.subf %19, %18 : vector<128x256xf32>
    %cst_9 = arith.constant 0.000000e+00 : f32
    %21 = vector.broadcast %cst_9 : f32 to vector<128x256xf32>
    %22 = arith.maximumf %20, %21 : vector<128x256xf32>
    %23 = vector.broadcast %13 : vector<1x256xf32> to vector<128x256xf32>
    %24 = vector.broadcast %10 : vector<128x1xf32> to vector<128x256xf32>
    %25 = arith.subf %23, %24 : vector<128x256xf32>
    %26 = math.absf %25 : vector<128x256xf32>
    %cst_10 = arith.constant 1.000000e+00 : f32
    %27 = vector.broadcast %cst_10 : f32 to vector<128x256xf32>
    %28 = arith.subf %27, %26 : vector<128x256xf32>
    %cst_11 = arith.constant 0.000000e+00 : f32
    %29 = vector.broadcast %cst_11 : f32 to vector<128x256xf32>
    %30 = arith.maximumf %28, %29 : vector<128x256xf32>
    %31 = arith.mulf %22, %30 : vector<128x256xf32>
    %c0_12 = arith.constant 0 : index
    %c0_13 = arith.constant 0 : index
    %32 = vector.load %arg2[%c0_12, %c0_13] : memref<256x128xf32, #tpu.memory_space<vmem>>, vector<256x128xf32>
    %cst_14 = arith.constant dense<0.000000e+00> : vector<128x128xf32>
    %33 = tpu.matmul %31, %32, %cst_14 {dimension_numbers = #tpu.dot_dimension_numbers<[1], [0], [0], [1], [0, 0, 1, 1], [], []>, precision = #tpu.contract_precision<fp32>} : vector<128x256xf32>, vector<256x128xf32>, vector<128x128xf32> -> vector<128x128xf32>
    %34 = vector.broadcast %14 : vector<1x128xf32> to vector<128x128xf32>
    %35 = vector.broadcast %9 : vector<128x1xf32> to vector<128x128xf32>
    %36 = arith.subf %34, %35 : vector<128x128xf32>
    %37 = math.absf %36 : vector<128x128xf32>
    %cst_15 = arith.constant 1.000000e+00 : f32
    %38 = vector.broadcast %cst_15 : f32 to vector<128x128xf32>
    %39 = arith.subf %38, %37 : vector<128x128xf32>
    %cst_16 = arith.constant 0.000000e+00 : f32
    %40 = vector.broadcast %cst_16 : f32 to vector<128x128xf32>
    %41 = arith.maximumf %39, %40 : vector<128x128xf32>
    %42 = arith.mulf %33, %41 : vector<128x128xf32>
    %c0_17 = arith.constant 0 : index
    %c0_18 = arith.constant 0 : index
    %43 = vector.load %arg4[%c0_17, %c0_18] : memref<128x8xf32, #tpu.memory_space<vmem>>, vector<128x8xf32>
    %cst_19 = arith.constant dense<0.000000e+00> : vector<128x8xf32>
    %44 = tpu.matmul %42, %43, %cst_19 {dimension_numbers = #tpu.dot_dimension_numbers<[1], [0], [0], [1], [0, 0, 1, 1], [], []>, precision = #tpu.contract_precision<fp32>} : vector<128x128xf32>, vector<128x8xf32>, vector<128x8xf32> -> vector<128x8xf32>
    %c0_20 = arith.constant 0 : index
    %c0_21 = arith.constant 0 : index
    %45 = vector.load %arg5[%c0_20, %c0_21] : memref<128x8xf32, #tpu.memory_space<vmem>>, vector<128x8xf32>
    tpu.vector_store %arg5[%c0_20, %c0_21], %44 {strides = array<i32>} : memref<128x8xf32, #tpu.memory_space<vmem>>, vector<128x8xf32>,
    return
  }
  func.func @transform_0(%arg0: i32) -> (i32, i32) {
    %c0_i32 = arith.constant 0 : i32
    %c0_i32_0 = arith.constant 0 : i32
    return %arg0, %c0_i32 : i32, i32
  }
  func.func @transform_1(%arg0: i32) -> (i32, i32) {
    %c0_i32 = arith.constant 0 : i32
    %c0_i32_0 = arith.constant 0 : i32
    %c0_i32_1 = arith.constant 0 : i32
    return %c0_i32, %c0_i32_0 : i32, i32
  }
  func.func @transform_2(%arg0: i32) -> (i32, i32) {
    %c0_i32 = arith.constant 0 : i32
    %c0_i32_0 = arith.constant 0 : i32
    %c0_i32_1 = arith.constant 0 : i32
    return %c0_i32, %c0_i32_0 : i32, i32
  }
  func.func @transform_3(%arg0: i32) -> (i32, i32) {
    %c0_i32 = arith.constant 0 : i32
    %c0_i32_0 = arith.constant 0 : i32
    %c0_i32_1 = arith.constant 0 : i32
    return %c0_i32, %c0_i32_0 : i32, i32
  }
  func.func @transform_4(%arg0: i32) -> (i32, i32) {
    %c0_i32 = arith.constant 0 : i32
    %c0_i32_0 = arith.constant 0 : i32
    return %arg0, %c0_i32 : i32, i32
  }
}

</mosaic_0001>

<bundles_post_ra>
// kernel: tpu_custom_call.1
= control target key start
LH: loop header
LB: loop body
LE: loop exit
PB: predicated region body
PF: predicated region fallthrough
CT: control target
= control target key end

     0   :  { %s5562_s15 = smov 0   ;;  %s7802_s0 = inlined_call_operand.vmem [shape: f32[256,3], index: 0, kind: input, shape index: {}]   ;;  %s7803_s1 = inlined_call_operand.vmem [shape: f32[256,128], index: 1, kind: input, shape index: {}]   ;;  %s7804_s2 = inlined_call_operand.vmem [shape: f32[8,256], index: 2, kind: input, shape index: {}]   ;;  %s7805_s3 = inlined_call_operand.vmem [shape: f32[128,8], index: 3, kind: input, shape index: {}]   ;;  %s7806_s4 = inlined_call_operand.vmem [shape: f32[256,8], index: 4, kind: output, shape index: {}]  }
   0x1 LB: > { %s3992_s16 = sadd.s32 4294967295, %s5532_s15   ;;  %p3996_p0 = scmp.ge.s32.totalorder %s5532_s15, 1  ;;  %s5532_s15 = sphi %s5562_s15, %s14_s15  }
   0x2   : > { %p163_p1 = scmp.lt.s32.totalorder %s5532_s15, 3 }
   0x4   : > { %p164_p2 = pnand %p3996_p0, %p163_p1 }
   0x6   : > { %167 = sbr.rel (%p164_p2) target bundleno = 1113 (0x459), region = 36 }
   0xd   : > { %s3997_s17 = sshll.u32 %s3992_s16, 4  ;;  %v755_v0 = vld [vmem:[%s7803_s1 + $0x80] sm:$0xff]  ;;  %v756_v1 = vld [vmem:[%s7803_s1 + $0x88] sm:$0xff]  ;;  %v5534_v3 = vmov 2   ;;  %v757_v8 = vld [vmem:[%s7803_s1 + $0x90] sm:$0xff]  ;;  %vm3919_vm0 = vcmask 64512  }
   0xe   : > { %v739_v2 = vld [vmem:[%s7803_s1] sm:$0xff]  ;;  %5521 = vset.pattern.permute.xlu1 %v5534_v3  ;;  %5519 = vset.pattern.permute.xlu0 %v5534_v3  ;;  %p190_p3 = scmp.lt.s32.totalorder %s3997_s17, 31  ;;  %v820_v4 = vand.u32 4294901760, %v755_v0  ;;  %v823_v5 = vand.u32 4294901760, %v756_v1  ;;  %v740_v6 = vld [vmem:[%s7803_s1 + $0x8] sm:$0xff]  ;;  %v758_v10 = vld [vmem:[%s7803_s1 + $0x98] sm:$0xff] }
   0xf   : > { %v772_v7 = vand.u32 4294901760, %v739_v2  ;;  %v775_v9 = vand.u32 4294901760, %v740_v6  ;;  %v826_v11 = vand.u32 4294901760, %v757_v8  ;;  %v5593_v12 = vld [vmem:[%s7803_s1 + $0x10] sm:$0xff]  ;;  %v5598_v13 = vld [vmem:[%s7803_s1 + $0x18] sm:$0xff]  ;;  %v829_v17 = vand.u32 4294901760, %v758_v10 }
  0x10   : > { %s8283_s17 = smov (!%p190_p3, %s3997_s17), 31  ;;  %v5602_v14 = vsub.f32 %v755_v0, %v820_v4  ;;  %v5604_v15 = vsub.f32 %v756_v1, %v823_v5  ;;  %v5612_v20 = vpack.c.bf16 %v823_v5, %v820_v4  ;;  %v778_v21 = vand.u32 4294901760, %v5593_v12  ;;  %v759_v55 = vld [vmem:[%s7803_s1 + $0xa0] sm:$0xff]  ;;  %v760_v61 = vld [vmem:[%s7803_s1 + $0xa8] sm:$0xff] }
  0x11   : > { %v5606_v16 = vsub.f32 %v739_v2, %v772_v7  ;;  %v5608_v18 = vsub.f32 %v740_v6, %v775_v9  ;;  %v5610_v19 = vsub.f32 %v757_v8, %v826_v11  ;;  %s3998_s8 = sshll.u32 %s8283_s17, 3  ;;  %v5620_v23 = vsub.f32 %v758_v10, %v829_v17  ;;  %v743_v62 = vld [vmem:[%s7803_s1 + $0x20] sm:$0xff]  ;;  %v744_v10 = vld [vmem:[%s7803_s1 + $0x28] sm:$0xff] }
  0x12   : > { %8000 = vst [vmem:[#allocation2_spill] sm:$0xff] %v5612_v20  ;;  %v5618_v22 = vpack.c.bf16 %v5604_v15, %v5602_v14  ;;  %v781_v24 = vand.u32 4294901760, %v5598_v13  ;;  %v5623_v25 = vpack.c.bf16 %v775_v9, %v772_v7  ;;  %s5630_s11 = scalar_lea.vmem %s7802_s0, %s3998_s8  ;;  %5029 = vmatprep.subr.bf16.mxu1 %v5612_v20  ;;  %v5640_v27 = vsub.f32 %v5593_v12, %v778_v21  ;;  %v763_v12 = vld [vmem:[%s7803_s1 + $0xc0] sm:$0xff]  ;;  %s7765_s9 = scalar_lea.vmem %s7806_s4, %s3998_s8 }
  0x13   : > { %v5634_v26 = vpack.c.bf16 %v5608_v18, %v5606_v16  ;;  %v202_v28 = vld [vmem:[%s5630_s11 + $0x8] sm:$0xff]  ;;  %v201_v29 = vld [vmem:[%s5630_s11] sm:$0xff]  ;;  %v203_v30 = vld [vmem:[%s5630_s11 + $0x10] sm:$0xff]  ;;  %v5648_v31 = vpack.c.bf16 %v5620_v23, %v5610_v19  ;;  %v5656_v33 = vpack.c.bf16 %v829_v17, %v826_v11  ;;  %v832_v63 = vand.u32 4294901760, %v759_v55 }
  0x14   : > { %8001 = vst [vmem:[#allocation3_spill] sm:$0xff] %v5618_v22  ;;  %8002 = vst [vmem:[#allocation4_spill] sm:$0xff] %v5623_v25  ;;  %5093 = vmatprep.subr.bf16.mxu0 %v5618_v22  ;;  %v5653_v32 = vsub.f32 %v5598_v13, %v781_v24  ;;  %5031 = vmatpush3.bf16.msra.mxu1 %v5623_v25  ;;  %v218_v34 = vadd.f32 1.0, %v202_v28  ;;  %v217_v35 = vadd.f32 1.0, %v201_v29  ;;  %v204_v36 = vld [vmem:[%s5630_s11 + $0x18] sm:$0xff]  ;;  %v219_v37 = vadd.f32 1.0, %v203_v30 }
  0x15   : > { %8003 = vst [vmem:[#allocation5_spill] sm:$0xff] %v5634_v26  ;;  %8004 = vst [vmem:[#allocation6_spill] sm:$0xff] %v5648_v31  ;;  %5095 = vmatpush3.bf16.msra.mxu0 %v5634_v26  ;;  %v205_v38 = vld [vmem:[%s5630_s11 + $0x20] sm:$0xff]  ;;  %5033 = vmatprep.subr.bf16.mxu1 %v5656_v33  ;;  %v206_v42 = vld [vmem:[%s5630_s11 + $0x28] sm:$0xff]  ;;  %v220_v44 = vadd.f32 1.0, %v204_v36  ;;  %v5535_v1 = vmov 1   ;;  %v5693_v11 = vsub.f32 %v759_v55, %v832_v63 }
  0x16   : > { %8005 = vst [vmem:[#allocation7_spill] sm:$0xff] %v5656_v33  ;;  %5097 = vmatprep.subr.bf16.mxu0 %v5648_v31  ;;  %v5664_v39 = vpack.c.bf16 %v5653_v32, %v5640_v27  ;;  %v234_v40 = vmul.f32 16.0, %v218_v34  ;;  %v233_v41 = vmul.f32 16.0, %v217_v35  ;;  %v207_v43 = vld [vmem:[%s5630_s11 + $0x30] sm:$0xff]  ;;  %v221_v47 = vadd.f32 1.0, %v205_v38  ;;  %v208_v53 = vld [vmem:[%s5630_s11 + $0x38] sm:$0xff] }
  0x17   : > { %v235_v48 = vmul.f32 16.0, %v219_v37  ;;  %v222_v49 = vadd.f32 1.0, %v206_v42  ;;  %v223_v50 = vadd.f32 1.0, %v207_v43  ;;  %v236_v54 = vmul.f32 16.0, %v220_v44  ;;  %v761_v28 = vld [vmem:[%s7803_s1 + $0xb0] sm:$0xff]  ;;  %v762_v29 = vld [vmem:[%s7803_s1 + $0xb8] sm:$0xff] }
  0x18   : > { %8006 = vst [vmem:[#allocation8_spill] sm:$0xff] %v5664_v39  ;;  %v4002_v45 = vadd.f32 -1.0, %v234_v40  ;;  %v4001_v46 = vadd.f32 -1.0, %v233_v41  ;;  %v237_v56 = vmul.f32 16.0, %v221_v47  ;;  %v224_v60 = vadd.f32 1.0, %v208_v53  ;;  %v209_v34 = vld [vmem:[%s5630_s11 + $0x40] sm:$0xff] }
  0x19   : > { %5099 = vmatpush3.bf16.msra.mxu0 %v5664_v39  ;;  %v4003_v57 = vadd.f32 -1.0, %v235_v48  ;;  %v238_v58 = vmul.f32 16.0, %v222_v49  ;;  %v239_v59 = vmul.f32 16.0, %v223_v50  ;;  %v4004_v0 = vadd.f32 -1.0, %v236_v54  ;;  %v210_v35 = vld [vmem:[%s5630_s11 + $0x48] sm:$0xff]  ;;  %v745_v40 = vld [vmem:[%s7803_s1 + $0x30] sm:$0xff] }
  0x1a   : > { %v5670_v51 = vmul.f32 0.5, %v4002_v45  ;;  %v5672_v52 = vmul.f32 0.5, %v4001_v46  ;;  %v4005_v2 = vadd.f32 -1.0, %v237_v56  ;;  %v835_v4 = vand.u32 4294901760, %v760_v61  ;;  %v746_v45 = vld [vmem:[%s7803_s1 + $0x38] sm:$0xff]  ;;  %v764_v13 = vld [vmem:[%s7803_s1 + $0xc8] sm:$0xff] }
  0x1b   : > { %v784_v5 = vand.u32 4294901760, %v743_v62  ;;  %v5688_v6 = vmul.f32 0.5, %v4003_v57  ;;  %v4006_v7 = vadd.f32 -1.0, %v238_v58  ;;  %v4007_v8 = vadd.f32 -1.0, %v239_v59  ;;  %v211_v49 = vld [vmem:[%s5630_s11 + $0x50] sm:$0xff]  ;;  %v747_v54 = vld [vmem:[%s7803_s1 + $0x40] sm:$0xff] }
  0x1c   : > { %8007 = vst [vmem:[#allocation9_spill] sm:$0xff] %v5670_v51  ;;  %8008 = vst [vmem:[#allocation10_spill] sm:$0xff] %v5672_v52  ;;  %303 = vperm.xlu1 %5521, %v5670_v51   ;;  %298 = vperm.xlu0 %5519, %v5672_v52   ;;  %v240_v9 = vmul.f32 16.0, %v224_v60  ;;  %v5695_v17 = vmul.f32 0.5, %v4004_v0  ;;  %v5703_v30 = vmul.f32 0.5, %v4005_v2  ;;  %v5707_v36 = vsub.f32 %v760_v61, %v835_v4 }
  0x1d   : > { %8009 = vst [vmem:[#allocation11_spill] sm:$0xff] %v5688_v6  ;;  %v787_v37 = vand.u32 4294901760, %v744_v10  ;;  %v5709_v38 = vsub.f32 %v743_v62, %v784_v5  ;;  %v5716_v41 = vmul.f32 0.5, %v4006_v7  ;;  %v5718_v42 = vmul.f32 0.5, %v4007_v8  ;;  %v766_v7 = vld [vmem:[%s7803_s1 + $0xd8] sm:$0xff] }
  0x1e   : > { %8010 = vst [vmem:[#allocation12_spill] sm:$0xff] %v5695_v17  ;;  %8011 = vst [vmem:[#allocation13_spill] sm:$0xff] %v5703_v30  ;;  %v5720_v43 = vadd.f32 -1.0, %v240_v9  ;;  %v5726_v44 = vpack.c.bf16 %v781_v24, %v778_v21  ;;  %v838_v47 = vand.u32 4294901760, %v761_v28  ;;  %v841_v48 = vand.u32 4294901760, %v762_v29 }
  0x1f   : > { %8012 = vst [vmem:[#allocation14_spill] sm:$0xff] %v5716_v41  ;;  %8013 = vst [vmem:[#allocation15_spill] sm:$0xff] %v5718_v42  ;;  %v5736_v46 = vsub.f32 %v744_v10, %v787_v37  ;;  %v225_v21 = vadd.f32 1.0, %v209_v34  ;;  %v5744_v24 = vadd.f32 1.0, %v210_v35  ;;  %v5748_v50 = vpack.c.bf16 %v835_v4, %v832_v63  ;;  %v748_v63 = vld [vmem:[%s7803_s1 + $0x48] sm:$0xff]  ;;  %v750_v34 = vld [vmem:[%s7803_s1 + $0x58] sm:$0xff] }
  0x20   : > { %5522 = vset.pattern.permute.xlu1 %v5535_v1  ;;  %5520 = vset.pattern.permute.xlu0 %v5535_v1  ;;  %8014 = vst [vmem:[#allocation16_spill] sm:$0xff] %v5726_v44  ;;  %v790_v53 = vand.u32 4294901760, %v745_v40  ;;  %v5758_v56 = vsub.f32 %v761_v28, %v838_v47  ;;  %v5760_v57 = vsub.f32 %v762_v29, %v841_v48  ;;  %v793_v58 = vand.u32 4294901760, %v746_v45  ;;  %v749_v29 = vld [vmem:[%s7803_s1 + $0x50] sm:$0xff] }
  0x21   : > { %520 = vperm.xlu1 %5522, %v5670_v51   ;;  %516 = vperm.xlu0 %5520, %v5672_v52   ;;  %8016 = vst [vmem:[#allocation18_spill] sm:$0xff] %v5748_v50  ;;  %v5756_v55 = vpack.c.bf16 %v5736_v46, %v5709_v38  ;;  %v5766_v60 = vpack.c.bf16 %v787_v37, %v784_v5  ;;  %v844_v61 = vand.u32 4294901760, %v763_v12  ;;  %v847_v62 = vand.u32 4294901760, %v764_v13  ;;  %v765_v5 = vld [vmem:[%s7803_s1 + $0xd0] sm:$0xff] }
  0x22   : > { %5035 = vmatpush3.bf16.msra.mxu1 %v5726_v44  ;;  %v5764_v59 = vsub.f32 %v745_v40, %v790_v53  ;;  %v5772_v0 = vadd.f32 1.0, %v211_v49  ;;  %v5777_v1 = vpack.c.bf16 %v5760_v57, %v5758_v56  ;;  %v5779_v2 = vsub.f32 %v746_v45, %v793_v58 }
  0x23   : > { %8017 = vst [vmem:[#allocation19_spill] sm:$0xff] %v5756_v55  ;;  %5037 = vmatprep.subr.bf16.mxu1 %v5748_v50  ;;  %8018 = vst [vmem:[#allocation20_spill] sm:$0xff] %v5766_v60  ;;  %v796_v4 = vand.u32 4294901760, %v747_v54  ;;  %v5787_v8 = vmul.f32 16.0, %v225_v21  ;;  %v5790_v9 = vsub.f32 %v763_v12, %v844_v61  ;;  %v5792_v10 = vsub.f32 %v764_v13, %v847_v62 }
  0x24   : > { %8019 = vst [vmem:[#allocation21_spill] sm:$0xff] %v5777_v1  ;;  %v5794_v28 = vpack.c.bf16 %v841_v48, %v838_v47  ;;  %v5805_v35 = vpack.c.bf16 %v5779_v2, %v5764_v59  ;;  %v799_v37 = vand.u32 4294901760, %v748_v63  ;;  %v5809_v45 = vpack.c.bf16 %v793_v58, %v790_v53  ;;  %v767_v47 = vld [vmem:[%s7803_s1 + $0xe0] sm:$0xff]  ;;  %v768_v48 = vld [vmem:[%s7803_s1 + $0xe8] sm:$0xff] }
  0x25   : > { %5523 = vset.pattern.permute.xlu1 %v5534_v3  ;;  %524 = vperm.xlu0 %5520, %v5688_v6   ;;  %v5734_v3 = vpack.c.bf16 %v5707_v36, %v5693_v11  ;;  %v5807_v40 = vsub.f32 %v747_v54, %v796_v4  ;;  %v5820_v12 = vpack.c.bf16 %v5792_v10, %v5790_v9  ;;  %v850_v13 = vand.u32 4294901760, %v765_v5 }
  0x26   : > { %308 = vperm.xlu1 %5523, %v5688_v6   ;;  %5039 = vmatpush3.bf16.msra.mxu1 %v5766_v60  ;;  %8020 = vst [vmem:[#allocation22_spill] sm:$0xff] %v5794_v28  ;;  %8021 = vst [vmem:[#allocation23_spill] sm:$0xff] %v5805_v35  ;;  %v853_v21 = vand.u32 4294901760, %v766_v7  ;;  %v5823_v49 = vpack.c.bf16 %v847_v62, %v844_v61  ;;  %v5827_v53 = vsub.f32 %v748_v63, %v799_v37  ;;  %v751_v6 = vld [vmem:[%s7803_s1 + $0x60] sm:$0xff]  ;;  %v752_v63 = vld [vmem:[%s7803_s1 + $0x68] sm:$0xff] }
  0x27   : > { %8015 = vst [vmem:[#allocation17_spill] sm:$0xff] %v5734_v3  ;;  %5101 = vmatprep.subr.bf16.mxu0 %v5734_v3  ;;  %8022 = vst [vmem:[#allocation24_spill] sm:$0xff] %v5809_v45  ;;  %5041 = vmatprep.subr.bf16.mxu1 %v5794_v28  ;;  %v802_v54 = vand.u32 4294901760, %v749_v29  ;;  %v805_v58 = vand.u32 4294901760, %v750_v34  ;;  %v5836_v61 = vsub.f32 %v765_v5, %v850_v13  ;;  %v859_v51 = vand.u32 4294901760, %v768_v48 }
  0x28   : > { %5103 = vmatpush3.bf16.msra.mxu0 %v5756_v55  ;;  %8023 = vst [vmem:[#allocation25_spill] sm:$0xff] %v5820_v12  ;;  %8024 = vst [vmem:[#allocation26_spill] sm:$0xff] %v5823_v49  ;;  %v5838_v62 = vsub.f32 %v766_v7, %v853_v21  ;;  %v5855_v52 = vpack.c.bf16 %v853_v21, %v850_v13  ;;  %v754_v13 = vld [vmem:[%s7803_s1 + $0x78] sm:$0xff] }
  0x29   : > { %528 = vperm.xlu0 %5520, %v5695_v17   ;;  %5105 = vmatprep.subr.bf16.mxu0 %v5777_v1  ;;  %v5851_v5 = vsub.f32 %v749_v29, %v802_v54  ;;  %v5853_v7 = vsub.f32 %v750_v34, %v805_v58  ;;  %v5867_v50 = vsub.f32 %v768_v48, %v859_v51  ;;  %v808_v29 = vand.u32 4294901760, %v751_v6  ;;  %v753_v34 = vld [vmem:[%s7803_s1 + $0x70] sm:$0xff] }
  0x2a   : > { %313 = vperm.xlu1 %5523, %v5695_v17   ;;  %v5829_v17 = vpack.c.bf16 %v799_v37, %v796_v4  ;;  %5043 = vmatpush3.bf16.msra.mxu1 %v5809_v45  ;;  %v769_v4 = vld [vmem:[%s7803_s1 + $0xf0] sm:$0xff]  ;;  %v5848_v37 = vpack.c.bf16 %v5827_v53, %v5807_v40  ;;  %8027 = vst [vmem:[#allocation29_spill] sm:$0xff] %v5855_v52  ;;  %v770_v45 = vld [vmem:[%s7803_s1 + $0xf8] sm:$0xff] }
  0x2b   : > { %5045 = vmatprep.subr.bf16.mxu1 %v5823_v49  ;;  %v5863_v28 = vpack.c.bf16 %v5838_v62, %v5836_v61  ;;  %v5879_v21 = vpack.c.bf16 %v5853_v7, %v5851_v5  ;;  %v5881_v48 = vpack.c.bf16 %v805_v58, %v802_v54  ;;  %v862_v49 = vand.u32 4294901760, %v769_v4 }
  0x2c   : > { %5107 = vmatpush3.bf16.msra.mxu0 %v5805_v35  ;;  %8025 = vst [vmem:[#allocation27_spill] sm:$0xff] %v5829_v17  ;;  %8026 = vst [vmem:[#allocation28_spill] sm:$0xff] %v5848_v37  ;;  %v865_v33 = vand.u32 4294901760, %v770_v45  ;;  %v814_v58 = vand.u32 4294901760, %v753_v34 }
  0x2d   : > { %532 = vperm.xlu0 %5520, %v5703_v30   ;;  %5109 = vmatprep.subr.bf16.mxu0 %v5820_v12  ;;  %8028 = vst [vmem:[#allocation30_spill] sm:$0xff] %v5863_v28  ;;  %8029 = vst [vmem:[#allocation31_spill] sm:$0xff] %v5879_v21  ;;  %v5896_v54 = vsub.f32 %v769_v4, %v862_v49  ;;  %v212_v12 = vld [vmem:[%s5630_s11 + $0x58] sm:$0xff]  ;;  %v1230_v4 = vand.u32 4294901760, %v5604_v15 }
  0x2e   : > { %318 = vperm.xlu1 %5523, %v5703_v30   ;;  %v856_v30 = vand.u32 4294901760, %v767_v47  ;;  %8030 = vst [vmem:[#allocation32_spill] sm:$0xff] %v5881_v48  ;;  %5047 = vmatpush3.bf16.msra.mxu1 %v5829_v17  ;;  %v5900_v17 = vmul.f32 0.5, %v5720_v43 }
  0x2f   : > { %5049 = vmatprep.subr.bf16.mxu1 %v5855_v52  ;;  %v1321_v55 = vand.u32 4294901760, %v5896_v54 }
  0x30   : > { %v5865_v60 = vsub.f32 %v767_v47, %v856_v30  ;;  %5111 = vmatpush3.bf16.msra.mxu0 %v5848_v37  ;;  %v811_v47 = vand.u32 4294901760, %v752_v63  ;;  %v5891_v25 = vpack.c.bf16 %v859_v51, %v856_v30  ;;  %v817_v37 = vand.u32 4294901760, %v754_v13  ;;  %8033 = vst [vmem:[#allocation35_spill] sm:$0xff] %v5900_v17 }
  0x31   : > { %536 = vperm.xlu0 %5520, %v5716_v41   ;;  %5113 = vmatprep.subr.bf16.mxu0 %v5863_v28  ;;  %v4009_v28 = vadd.f32 -1.0, %v5787_v8  ;;  %v5905_v51 = vsub.f32 %v770_v45, %v865_v33  ;;  %v1223_v45 = vand.u32 4294901760, %v5602_v14 }
  0x32   : > { %323 = vperm.xlu1 %5523, %v5716_v41   ;;  %v5887_v44 = vpack.c.bf16 %v5867_v50, %v5865_v60  ;;  %v5889_v41 = vsub.f32 %v751_v6, %v808_v29  ;;  %8032 = vst [vmem:[#allocation34_spill] sm:$0xff] %v5891_v25  ;;  %v5894_v20 = vsub.f32 %v752_v63, %v811_v47  ;;  %v242_v6 = vmul.f32 16.0, %v5744_v24 }
  0x33   : > { %v5913_v63 = vsub.f32 %v753_v34, %v814_v58  ;;  %v5915_v43 = vsub.f32 %v754_v13, %v817_v37  ;;  %5051 = vmatpush3.bf16.msra.mxu1 %v5881_v48  ;;  %v5921_v24 = vpack.c.bf16 %v5905_v51, %v5896_v54  ;;  %v5923_v8 = vpack.c.bf16 %v811_v47, %v808_v29 }
  0x34   : > { %8031 = vst [vmem:[#allocation33_spill] sm:$0xff] %v5887_v44  ;;  %5115 = vmatpush3.bf16.msra.mxu0 %v5879_v21  ;;  %v5911_v30 = vpack.c.bf16 %v5894_v20, %v5889_v41  ;;  %v228_v34 = vadd.f32 1.0, %v212_v12  ;;  %5053 = vmatprep.subr.bf16.mxu1 %v5891_v25  ;;  %v5929_v13 = vpack.c.bf16 %v865_v33, %v862_v49  ;;  %v5932_v48 = vmul.f32 0.5, %v4009_v28 }
  0x35   : > { %540 = vperm.xlu0 %5520, %v5718_v42   ;;  %5117 = vmatprep.subr.bf16.mxu0 %v5887_v44  ;;  %8035 = vst [vmem:[#allocation37_spill] sm:$0xff] %v5921_v24  ;;  %8036 = vst [vmem:[#allocation38_spill] sm:$0xff] %v5923_v8  ;;  %v4010_v52 = vadd.f32 -1.0, %v242_v6  ;;  %v213_v44 = vld [vmem:[%s5630_s11 + $0x60] sm:$0xff]  ;;  %v1111_v29 = vand.u32 4294901760, %v5606_v16  ;;  %v1118_v47 = vand.u32 4294901760, %v5608_v18  ;;  %v5156_v33 = vpack.c.bf16 %v1230_v4, %v1223_v45 }
  0x36   : > { %328 = vperm.xlu1 %5523, %v5718_v42   ;;  %8034 = vst [vmem:[#allocation36_spill] sm:$0xff] %v5911_v30  ;;  %v243_v42 = vmul.f32 16.0, %v5772_v0  ;;  %8037 = vst [vmem:[#allocation39_spill] sm:$0xff] %v5929_v13  ;;  %v5941_v0 = vpack.c.bf16 %v5915_v43, %v5913_v63  ;;  %v229_v12 = vadd.f32 1.0, %v213_v44  ;;  %v5951_v25 = vpack.c.bf16 %v817_v37, %v814_v58 }
  0x37   : > { %8038 = vst [vmem:[#allocation40_spill] sm:$0xff] %v5932_v48  ;;  %5055 = vmatpush3.bf16.msra.mxu1 %v5923_v8  ;;  %v5945_v28 = vpack.c.bf16 %v1118_v47, %v1111_v29  ;;  %v5949_v49 = vmul.f32 0.5, %v4010_v52  ;;  %v1224_v37 = vsub.f32 %v5602_v14, %v1223_v45  ;;  %v1231_v58 = vsub.f32 %v5604_v15, %v1230_v4 }
  0x38   : > { %5119 = vmatpush3.bf16.msra.mxu0 %v5911_v30  ;;  %8039 = vst [vmem:[#allocation41_spill] sm:$0xff] %v5941_v0  ;;  %5057 = vmatprep.subr.bf16.mxu1 %v5929_v13  ;;  %v4011_v6 = vadd.f32 -1.0, %v243_v42  ;;  %8041 = vst [vmem:[#allocation43_spill] sm:$0xff] %v5951_v25  ;;  %v245_v52 = vmul.f32 16.0, %v229_v12  ;;  %v215_v42 = vld [vmem:[%s5630_s11 + $0x70] sm:$0xff]  ;;  %v216_v30 = vld [vmem:[%s5630_s11 + $0x78] sm:$0xff]  ;;  %v1112_v14 = vsub.f32 %v5606_v16, %v1111_v29 }
  0x39   : > { %544 = vperm.xlu0 %5520, %v5900_v17   ;;  %5121 = vmatprep.subr.bf16.mxu0 %v5921_v24  ;;  %8040 = vst [vmem:[#allocation42_spill] sm:$0xff] %v5949_v49  ;;  %v214_v24 = vld [vmem:[%s5630_s11 + $0x68] sm:$0xff]  ;;  %v232_v12 = vadd.f32 1.0, %v216_v30  ;;  %v1119_v15 = vsub.f32 %v5608_v18, %v1118_v47  ;;  %v1188_v21 = vand.u32 4294901760, %v5853_v7  ;;  %v1195_v35 = vand.u32 4294901760, %v5889_v41 }
  0x3a   : > { %333 = vperm.xlu1 %5523, %v5900_v17   ;;  %v244_v17 = vmul.f32 16.0, %v228_v34  ;;  %v5958_v44 = vmul.f32 0.5, %v4011_v6  ;;  %v230_v8 = vadd.f32 1.0, %v214_v24  ;;  %v231_v34 = vadd.f32 1.0, %v215_v42 }
  0x3b   : > { %5059 = vmatpush3.bf16.msra.mxu1 %v5951_v25  ;;  %v248_v29 = vmul.f32 16.0, %v232_v12  ;;  %v1202_v1 = vand.u32 4294901760, %v5894_v20  ;;  %v1328_v3 = vand.u32 4294901760, %v5905_v51 }
  0x3c   : > { %5123 = vmatpush3.bf16.msra.mxu0 %v5941_v0  ;;  %8042 = vst [vmem:[#allocation44_spill] sm:$0xff] %v5958_v44  ;;  %v4012_v13 = vadd.f32 -1.0, %v244_v17  ;;  %v4013_v0 = vadd.f32 -1.0, %v245_v52  ;;  %v246_v6 = vmul.f32 16.0, %v230_v8  ;;  %v247_v24 = vmul.f32 16.0, %v231_v34 }
  0x3d   : > { %548 = vperm.xlu0 %5520, %v5932_v48   ;;  %5157 = vmatprep.subr.bf16.mxu0 %v5156_v33  ;;  %v1232_v33 = vand.u32 4294901760, %v1231_v58  ;;  %v1146_v8 = vand.u32 4294901760, %v5736_v46  ;;  %v1113_v52 = vand.u32 4294901760, %v1112_v14  ;;  %v281_v14 = vld [vmem:[%s7804_s2] ss:$8 sm:$0x3] }
  0x3e   : > { %338 = vperm.xlu1 %5523, %v5932_v48   ;;  %v1225_v48 = vand.u32 4294901760, %v1224_v37  ;;  %v5965_v25 = vmul.f32 0.5, %v4012_v13  ;;  %v5972_v45 = vmul.f32 0.5, %v4013_v0  ;;  %v4014_v4 = vadd.f32 -1.0, %v246_v6 }
  0x3f   : > { %v1139_v13 = vand.u32 4294901760, %v5709_v38  ;;  %v4015_v18 = vadd.f32 -1.0, %v247_v24  ;;  %v4016_v0 = vadd.f32 -1.0, %v248_v29  ;;  %v1147_v34 = vsub.f32 %v5736_v46, %v1146_v8 }
  0x40   : > { %8043 = vst [vmem:[#allocation45_spill] sm:$0xff] %v5965_v25  ;;  %v5060_v17 = vpack.c.bf16 %v1232_v33, %v1225_v48  ;;  %8044 = vst [vmem:[#allocation46_spill] sm:$0xff] %v5972_v45  ;;  %v1120_v48 = vand.u32 4294901760, %v1119_v15  ;;  %v5982_v16 = vmul.f32 0.5, %v4014_v4  ;;  %v286_v24 = vlaneseq }
  0x41   : > { %552 = vperm.xlu0 %5520, %v5949_v49   ;;  %v5977_v42 = vpack.c.bf16 %v1146_v8, %v1139_v13  ;;  %v5986_v47 = vmul.f32 0.5, %v4015_v18  ;;  %v5990_v37 = vmul.f32 0.5, %v4016_v0  ;;  %v1140_v58 = vsub.f32 %v5709_v38, %v1139_v13 }
  0x42   : > { %343 = vperm.xlu1 %5523, %v5949_v49   ;;  %5061 = vmatprep.subr.bf16.mxu1 %v5060_v17  ;;  %v5979_v30 = vpack.c.bf16 %v1120_v48, %v1113_v52  ;;  %8046 = vst [vmem:[#allocation48_spill] sm:$0xff] %v5982_v16  ;;  %v1148_v6 = vand.u32 4294901760, %v1147_v34  ;;  %v287_v12 = vshrl.u32 %v286_v24, 7  ;;  %v4017_v52 = vld [vmem:[%s7804_s2 + $0x1] ss:$8 sm:$0x3] }
  0x43   : > { %8047 = vst [vmem:[#allocation49_spill] sm:$0xff] %v5986_v47  ;;  %8048 = vst [vmem:[#allocation50_spill] sm:$0xff] %v5990_v37  ;;  %v1141_v33 = vand.u32 4294901760, %v1140_v58  ;;  %v1237_v38 = vand.u32 4294901760, %v5610_v19  ;;  %v1244_v46 = vand.u32 4294901760, %v5620_v23  ;;  %v1125_v13 = vand.u32 4294901760, %v5640_v27 }
  0x44   : > { %8045 = vst [vmem:[#allocation47_spill] sm:$0xff] %v5979_v30  ;;  %v288_v15 = vsub.s32 0, %v287_v12  ;;  %v292_v4 = vsub.s32 1, %v287_v12  ;;  %v1132_v8 = vand.u32 4294901760, %v5653_v32  ;;  %v1251_v24 = vand.u32 4294901760, %v5693_v11 }
  0x45   : > { %556 = vperm.xlu0 %5520, %v5958_v44   ;;  %v5997_v17 = vpack.c.bf16 %v1148_v6, %v1141_v33  ;;  %v6017_v58 = vpack.c.bf16 %v1244_v46, %v1237_v38  ;;  %v1238_v33 = vsub.f32 %v5610_v19, %v1237_v38  ;;  %v1245_v6 = vsub.f32 %v5620_v23, %v1244_v46 }
  0x46   : > { %348 = vperm.xlu1 %5523, %v5958_v44   ;;  %v6009_v48 = vrot.slane %v281_v14, %v288_v15  ;;  %v6011_v18 = vrot.slane %v281_v14, %v292_v4  ;;  %v6013_v29 = vrot.slane %v4017_v52, %v288_v15  ;;  %v6015_v0 = vrot.slane %v4017_v52, %v292_v4 }
  0x47   : > { %8049 = vst [vmem:[#allocation51_spill] sm:$0xff] %v5997_v17  ;;  %v6019_v34 = vpack.c.bf16 %v1132_v8, %v1125_v13  ;;  %v1258_v12 = vand.u32 4294901760, %v5707_v36  ;;  %v1133_v14 = vsub.f32 %v5653_v32, %v1132_v8  ;;  %v1265_v15 = vand.u32 4294901760, %v5758_v56 }
  0x48   : > { %v1272_v4 = vand.u32 4294901760, %v5760_v57  ;;  %v1153_v52 = vand.u32 4294901760, %v5764_v59  ;;  %v1279_v19 = vand.u32 4294901760, %v5790_v9  ;;  %v1286_v23 = vand.u32 4294901760, %v5792_v10 }
  0x49   : > { %560 = vperm.xlu0 %5520, %v5965_v25   ;;  %v1252_v38 = vsub.f32 %v5693_v11, %v1251_v24  ;;  %v1259_v46 = vsub.f32 %v5707_v36, %v1258_v12  ;;  %v1167_v32 = vand.u32 4294901760, %v5807_v40  ;;  %v1300_v49 = vand.u32 4294901760, %v5838_v62 }
  0x4a   : > { %353 = vperm.xlu1 %5523, %v5965_v25   ;;  %v1134_v25 = vand.u32 4294901760, %v1133_v14  ;;  %v1181_v44 = vand.u32 4294901760, %v5851_v5  ;;  %v1307_v11 = vand.u32 4294901760, %v5865_v60  ;;  %v1314_v36 = vand.u32 4294901760, %v5867_v50 }
  0x4b   : > { %v6047_v14 = vpack.c.bf16 %v1272_v4, %v1265_v15  ;;  %v6053_v31 = vpack.c.bf16 %v1286_v23, %v1279_v19 }
  0x4c   : > { %v6068_v30 = vpack.c.bf16 %v1314_v36, %v1307_v11 }
  0x4d   : > { %564 = vperm.xlu0 %5520, %v5972_v45   ;;  %8050 = vst [vmem:[#allocation52_spill] sm:$0xff] %v6047_v14  ;;  %8052 = vst [vmem:[#allocation54_spill] sm:$0xff] %v6053_v31  ;;  %v6070_v14 = vpack.c.bf16 %v1202_v1, %v1195_v35  ;;  %v1273_v31 = vsub.f32 %v5760_v57, %v1272_v4  ;;  %v1301_v4 = vsub.f32 %v5838_v62, %v1300_v49 }
  0x4e   : > { %358 = vperm.xlu1 %5523, %v5972_v45   ;;  %v1293_v45 = vand.u32 4294901760, %v5836_v61  ;;  %8053 = vst [vmem:[#allocation55_spill] sm:$0xff] %v6068_v30  ;;  %v1182_v30 = vsub.f32 %v5851_v5, %v1181_v44 }
  0x4f   : > { %8054 = vst [vmem:[#allocation56_spill] sm:$0xff] %v6070_v14  ;;  %v1302_v5 = vand.u32 4294901760, %v1301_v4 }
  0x50   : > { %v1294_v57 = vsub.f32 %v5836_v61, %v1293_v45 }
  0x51   : > { %568 = vperm.xlu0 %5520, %v5982_v16  }
  0x52   : > { %363 = vperm.xlu1 %5523, %v5982_v16   ;;  %v1160_v16 = vand.u32 4294901760, %v5779_v2 }
  0x54   : > { %v6051_v39 = vpack.c.bf16 %v1160_v16, %v1153_v52 }
  0x55   : > { %572 = vperm.xlu0 %5520, %v5986_v47  }
  0x56   : > { %368 = vperm.xlu1 %5523, %v5986_v47   ;;  %v1239_v47 = vand.u32 4294901760, %v1238_v33  ;;  %v1253_v33 = vand.u32 4294901760, %v1252_v38  ;;  %8051 = vst [vmem:[#allocation53_spill] sm:$0xff] %v6051_v39  ;;  %v1266_v38 = vsub.f32 %v5758_v56, %v1265_v15  ;;  %v6073_v39 = vpack.c.bf16 %v1328_v3, %v1321_v55 }
  0x57   : > { %v1209_v56 = vand.u32 4294901760, %v5913_v63 }
  0x58   : > { %8055 = vst [vmem:[#allocation57_spill] sm:$0xff] %v6073_v39  ;;  %v1267_v15 = vand.u32 4294901760, %v1266_v38  ;;  %v1274_v39 = vand.u32 4294901760, %v1273_v31 }
  0x59   : > { %576 = vperm.xlu0 %5520, %v5990_v37  }
  0x5a   : > { %373 = vperm.xlu1 %5523, %v5990_v37   ;;  %v1126_v37 = vsub.f32 %v5640_v27, %v1125_v13  ;;  %v1246_v27 = vand.u32 4294901760, %v1245_v6  ;;  %v1174_v13 = vand.u32 4294901760, %v5827_v53  ;;  %v1260_v6 = vand.u32 4294901760, %v1259_v46 }
  0x5c   : > { %v1127_v8 = vand.u32 4294901760, %v1126_v37  ;;  %v6045_v37 = vpack.c.bf16 %v1258_v12, %v1251_v24  ;;  %v6055_v26 = vpack.c.bf16 %v1174_v13, %v1167_v32  ;;  %v6058_v46 = vpack.c.bf16 %v1246_v27, %v1239_v47 }
  0x5d   : > { %v6062_v24 = vpack.c.bf16 %v1300_v49, %v1293_v45  ;;  %v6064_v12 = vpack.c.bf16 %v1188_v21, %v1181_v44  ;;  %v6066_v17 = vpack.c.bf16 %v1260_v6, %v1253_v33  ;;  %v1216_v47 = vand.u32 4294901760, %v5915_v43 }
  0x5e   : > { %v6060_v22 = vpack.c.bf16 %v1134_v25, %v1127_v8  ;;  %v1154_v25 = vsub.f32 %v5764_v59, %v1153_v52  ;;  %v1161_v27 = vsub.f32 %v5779_v2, %v1160_v16  ;;  %v1280_v8 = vsub.f32 %v5790_v9, %v1279_v19 }
  0x5f   : > { %v1287_v33 = vsub.f32 %v5792_v10, %v1286_v23  ;;  %v1168_v6 = vsub.f32 %v5807_v40, %v1167_v32  ;;  %v1175_v14 = vsub.f32 %v5827_v53, %v1174_v13  ;;  %v1189_v59 = vsub.f32 %v5853_v7, %v1188_v21 }
  0x60   : > { %v1308_v52 = vsub.f32 %v5865_v60, %v1307_v11  ;;  %v6088_v2 = vpack.c.bf16 %v1216_v47, %v1209_v56  ;;  %v1315_v9 = vsub.f32 %v5867_v50, %v1314_v36  ;;  %v1196_v10 = vsub.f32 %v5889_v41, %v1195_v35 }
  0x61   : > { %v1203_v40 = vsub.f32 %v5894_v20, %v1202_v1  ;;  %v1155_v53 = vand.u32 4294901760, %v1154_v25  ;;  %v1162_v16 = vand.u32 4294901760, %v1161_v27  ;;  %v1281_v61 = vand.u32 4294901760, %v1280_v8 }
  0x62   : > { %v1288_v45 = vand.u32 4294901760, %v1287_v33  ;;  %v1169_v62 = vand.u32 4294901760, %v1168_v6  ;;  %v1176_v31 = vand.u32 4294901760, %v1175_v14  ;;  %v1295_v49 = vand.u32 4294901760, %v1294_v57 }
  0x63   : > { %v6093_v44 = vpack.c.bf16 %v1274_v39, %v1267_v15  ;;  %v1183_v7 = vand.u32 4294901760, %v1182_v30  ;;  %v1190_v60 = vand.u32 4294901760, %v1189_v59  ;;  %v1309_v21 = vand.u32 4294901760, %v1308_v52 }
  0x64   : > { %v1316_v50 = vand.u32 4294901760, %v1315_v9  ;;  %v1197_v32 = vand.u32 4294901760, %v1196_v10  ;;  %v1204_v41 = vand.u32 4294901760, %v1203_v40  ;;  %v6096_v20 = vsub.f32 %v5896_v54, %v1321_v55 }
  0x65   : > { %v6102_v11 = vpack.c.bf16 %v1162_v16, %v1155_v53  ;;  %v6104_v30 = vpack.c.bf16 %v1288_v45, %v1281_v61  ;;  %v6106_v36 = vpack.c.bf16 %v1176_v31, %v1169_v62  ;;  %v6108_v14 = vpack.c.bf16 %v1302_v5, %v1295_v49 }
  0x66   : > { %v1329_v55 = vsub.f32 %v5905_v51, %v1328_v3  ;;  %v1210_v54 = vsub.f32 %v5913_v63, %v1209_v56  ;;  %v1217_v25 = vsub.f32 %v5915_v43, %v1216_v47  ;;  %v6113_v33 = vpack.c.bf16 %v1190_v60, %v1183_v7 }
  0x67   : > { %v6115_v59 = vpack.c.bf16 %v1316_v50, %v1309_v21  ;;  %v6117_v52 = vpack.c.bf16 %v1204_v41, %v1197_v32  ;;  %v1323_v9 = vand.u32 4294901760, %v6096_v20 }
  0x68   : > { %v1330_v56 = vand.u32 4294901760, %v1329_v55  ;;  %v1211_v47 = vand.u32 4294901760, %v1210_v54  ;;  %v1218_v40 = vand.u32 4294901760, %v1217_v25 }
  0x9b   : > { %v299_v19 = vpop.permute.xlu0 %298  ;;  %v304_v23 = vpop.permute.xlu1 %303 }
  0x9c   : > { %v376_v1 = vsub.f32 %v6009_v48, %v299_v19  ;;  %v377_v35 = vsub.f32 %v6011_v18, %v299_v19  ;;  %v378_v13 = vsub.f32 %v6009_v48, %v304_v23  ;;  %v379_v39 = vsub.f32 %v6011_v18, %v304_v23 }
  0x9e   : > { %v408_v38 = vand.u32 2147483647, %v376_v1  ;;  %v409_v15 = vand.u32 2147483647, %v377_v35  ;;  %v410_v27 = vand.u32 2147483647, %v378_v13 }
  0x9f   : > { %v411_v8 = vand.u32 2147483647, %v379_v39 }
  0xa0   : > { %v440_v6 = vsub.f32 1.0, %v408_v38  ;;  %v521_v57 = vpop.permute.xlu1 %520  ;;  %v517_v4 = vpop.permute.xlu0 %516  ;;  %v441_v53 = vsub.f32 1.0, %v409_v15  ;;  %v442_v16 = vsub.f32 1.0, %v410_v27 }
  0xa1   : > { %v443_v10 = vsub.f32 1.0, %v411_v8  ;;  %v581_v3 = vsub.f32 %v6013_v29, %v521_v57  ;;  %v582_v51 = vsub.f32 %v6015_v0, %v521_v57  ;;  %v579_v63 = vsub.f32 %v6013_v29, %v517_v4 }
  0xa2   : > { %v580_v43 = vsub.f32 %v6015_v0, %v517_v4  ;;  %v472_v62 = vmax.f32 %v440_v6, 0.0  ;;  %v474_v8 = vmax.f32 %v442_v16, 0.0 }
  0xa3   : > { %v613_v61 = vand.u32 2147483647, %v581_v3  ;;  %v614_v45 = vand.u32 2147483647, %v582_v51  ;;  %v475_v31 = vmax.f32 %v443_v10, 0.0  ;;  %v473_v3 = vmax.f32 %v441_v53, 0.0 }
  0xa4   : > { %v611_v49 = vand.u32 2147483647, %v579_v63  ;;  %v612_v5 = vand.u32 2147483647, %v580_v43  ;;  %v525_v7 = vpop.permute.xlu0 %524  ;;  %v6130_v43 = vpack.c.bf16 %v1330_v56, %v1323_v9 }
  0xa5   : > { %v645_v60 = vsub.f32 1.0, %v613_v61  ;;  %v646_v21 = vsub.f32 1.0, %v614_v45  ;;  %v583_v19 = vsub.f32 %v6013_v29, %v525_v7  ;;  %v584_v23 = vsub.f32 %v6015_v0, %v525_v7  ;;  %v309_v50 = vpop.permute.xlu1 %308 }
  0xa6   : > { %v643_v32 = vsub.f32 1.0, %v611_v49  ;;  %v644_v41 = vsub.f32 1.0, %v612_v5  ;;  %v380_v20 = vsub.f32 %v6009_v48, %v309_v50  ;;  %v381_v1 = vsub.f32 %v6011_v18, %v309_v50 }
  0xa7   : > { %v677_v35 = vmax.f32 %v645_v60, 0.0  ;;  %v678_v13 = vmax.f32 %v646_v21, 0.0  ;;  %v615_v39 = vand.u32 2147483647, %v583_v19  ;;  %v616_v38 = vand.u32 2147483647, %v584_v23 }
  0xa8   : > { %v675_v55 = vmax.f32 %v643_v32, 0.0  ;;  %v676_v54 = vmax.f32 %v644_v41, 0.0  ;;  %v412_v25 = vand.u32 2147483647, %v380_v20  ;;  %v413_v15 = vand.u32 2147483647, %v381_v1  ;;  %v529_v27 = vpop.permute.xlu0 %528 }
  0xa9   : > { %v6128_v6 = vmul.f32 %v678_v13, %v475_v31  ;;  %v647_v57 = vsub.f32 1.0, %v615_v39  ;;  %v648_v4 = vsub.f32 1.0, %v616_v38  ;;  %v314_v10 = vpop.permute.xlu1 %313  ;;  %v6132_v61 = vmul.f32 %v677_v35, %v474_v8 }
  0xaa   : > { %v444_v51 = vsub.f32 1.0, %v412_v25  ;;  %v445_v63 = vsub.f32 1.0, %v413_v15  ;;  %v707_v45 = vmul.f32 %v675_v55, %v472_v62  ;;  %v6134_v5 = vpack.c.bf16 %v1218_v40, %v1211_v47 }
  0xab   : > { %v680_v49 = vmax.f32 %v648_v4, 0.0  ;;  %v6137_v7 = vand.u32 4294901760, %v6128_v6  ;;  %v708_v16 = vmul.f32 %v676_v54, %v473_v3  ;;  %v679_v31 = vmax.f32 %v647_v57, 0.0 }
  0xac   : > { %v477_v60 = vmax.f32 %v445_v63, 0.0  ;;  %v533_v21 = vpop.permute.xlu0 %532  ;;  %v585_v19 = vsub.f32 %v6013_v29, %v529_v27  ;;  %v586_v53 = vsub.f32 %v6015_v0, %v529_v27  ;;  %v382_v9 = vsub.f32 %v6009_v48, %v314_v10 }
  0xad   : > { %v383_v56 = vsub.f32 %v6011_v18, %v314_v10  ;;  %v319_v23 = vpop.permute.xlu1 %318  ;;  %v476_v62 = vmax.f32 %v444_v51, 0.0  ;;  %v587_v47 = vsub.f32 %v6013_v29, %v533_v21  ;;  %v588_v40 = vsub.f32 %v6015_v0, %v533_v21 }
  0xae   : > { %v6143_v50 = vmul.f32 %v680_v49, %v477_v60  ;;  %v617_v32 = vand.u32 2147483647, %v585_v19  ;;  %v618_v41 = vand.u32 2147483647, %v586_v53  ;;  %v414_v20 = vand.u32 2147483647, %v382_v9 }
  0xaf   : > { %v384_v1 = vsub.f32 %v6009_v48, %v319_v23  ;;  %v6148_v35 = vand.u32 4294901760, %v708_v16  ;;  %v6150_v13 = vand.u32 4294901760, %v707_v45  ;;  %v415_v39 = vand.u32 2147483647, %v383_v56 }
  0xb0   : > { %v619_v38 = vand.u32 2147483647, %v587_v47  ;;  %v649_v55 = vsub.f32 1.0, %v617_v32  ;;  %v650_v54 = vsub.f32 1.0, %v618_v41  ;;  %v446_v25 = vsub.f32 1.0, %v414_v20  ;;  %v537_v10 = vpop.permute.xlu0 %536 }
  0xb1   : > { %v620_v15 = vand.u32 2147483647, %v588_v40  ;;  %v447_v27 = vsub.f32 1.0, %v415_v39  ;;  %v385_v57 = vsub.f32 %v6011_v18, %v319_v23  ;;  %v416_v4 = vand.u32 2147483647, %v384_v1  ;;  %v324_v60 = vpop.permute.xlu1 %323 }
  0xb2   : > { %v651_v8 = vsub.f32 1.0, %v619_v38  ;;  %v6154_v3 = vand.u32 4294901760, %v6132_v61  ;;  %v6156_v51 = vmul.f32 %v679_v31, %v476_v62  ;;  %v6159_v63 = vand.u32 4294901760, %v6143_v50 }
  0xb3   : > { %v681_v49 = vmax.f32 %v649_v55, 0.0  ;;  %v478_v21 = vmax.f32 %v446_v25, 0.0  ;;  %v652_v19 = vsub.f32 1.0, %v620_v15  ;;  %v417_v53 = vand.u32 2147483647, %v385_v57 }
  0xb4   : > { %v448_v9 = vsub.f32 1.0, %v416_v4  ;;  %v682_v56 = vmax.f32 %v650_v54, 0.0  ;;  %v479_v47 = vmax.f32 %v447_v27, 0.0  ;;  %v6162_v23 = vsub.f32 %v708_v16, %v6148_v35  ;;  %v541_v25 = vpop.permute.xlu0 %540 }
  0xb5   : > { %v6165_v40 = vsub.f32 %v707_v45, %v6150_v13  ;;  %v683_v32 = vmax.f32 %v651_v8, 0.0  ;;  %v449_v31 = vsub.f32 1.0, %v417_v53  ;;  %v589_v41 = vsub.f32 %v6013_v29, %v537_v10  ;;  %v329_v4 = vpop.permute.xlu1 %328 }
  0xb6   : > { %8056 = vst [vmem:[#allocation58_spill] sm:$0xff] %v6162_v23  ;;  %v480_v62 = vmax.f32 %v448_v9, 0.0  ;;  %v6169_v20 = vand.u32 4294901760, %v6156_v51  ;;  %1575 = vmatprep.mubr.f32.mxu0 %v6162_v23  ;;  %v590_v1 = vsub.f32 %v6015_v0, %v537_v10  ;;  %v386_v39 = vsub.f32 %v6009_v48, %v324_v60 }
  0xb7   : > { %8057 = vst [vmem:[#allocation59_spill] sm:$0xff] %v6165_v40  ;;  %v387_v16 = vsub.f32 %v6011_v18, %v324_v60  ;;  %v6175_v38 = vmul.f32 %v681_v49, %v478_v21  ;;  %v684_v45 = vmax.f32 %v652_v19, 0.0  ;;  %v481_v55 = vmax.f32 %v449_v31, 0.0  ;;  %1578 = vmatmul.mubr.f32.vlgmr.msra.gmra.mrb[0].mxu0 %v6165_v40 }
  0xb8   : > { %v621_v54 = vand.u32 2147483647, %v589_v41  ;;  %v622_v15 = vand.u32 2147483647, %v590_v1  ;;  %v418_v27 = vand.u32 2147483647, %v386_v39  ;;  %v6180_v57 = vsub.f32 %v6128_v6, %v6137_v7  ;;  %5159 = vmatpush3.bf16.msra.mxu0 %v5945_v28 }
  0xb9   : > { %v419_v8 = vand.u32 2147483647, %v387_v16  ;;  %v6183_v10 = vmul.f32 %v682_v56, %v479_v47  ;;  %v6185_v49 = vmul.f32 %v683_v32, %v480_v62  ;;  %v6189_v21 = vsub.f32 %v6132_v61, %v6154_v3  ;;  %5161 = vmatprep.subr.bf16.mxu0 %v6017_v58 }
  0xba   : > { %8058 = vst [vmem:[#allocation60_spill] sm:$0xff] %v6180_v57  ;;  %v653_v60 = vsub.f32 1.0, %v621_v54  ;;  %v654_v19 = vsub.f32 1.0, %v622_v15  ;;  %v450_v53 = vsub.f32 1.0, %v418_v27  ;;  %1584 = vmatprep.mubr.f32.mxu0 %v6180_v57  ;;  %v591_v6 = vsub.f32 %v6013_v29, %v541_v25 }
  0xbb   : > { %8059 = vst [vmem:[#allocation61_spill] sm:$0xff] %v6189_v21  ;;  %v451_v9 = vsub.f32 1.0, %v419_v8  ;;  %v6194_v28 = vmul.f32 %v684_v45, %v481_v55  ;;  %1587 = vmatmul.mubr.f32.gmra.mrb[2].mxu0 %v6189_v21  ;;  %v592_v47 = vsub.f32 %v6015_v0, %v541_v25  ;;  %v388_v32 = vsub.f32 %v6009_v48, %v329_v4 }
  0xbc   : > { %v685_v56 = vmax.f32 %v653_v60, 0.0  ;;  %v686_v61 = vmax.f32 %v654_v19, 0.0  ;;  %v482_v31 = vmax.f32 %v450_v53, 0.0  ;;  %v623_v58 = vand.u32 2147483647, %v591_v6  ;;  %5163 = vmatpush3.bf16.msra.mxu0 %v6019_v34  ;;  %v334_v53 = vpop.permute.xlu1 %333 }
  0xbd   : > { %v483_v62 = vmax.f32 %v451_v9, 0.0  ;;  %v624_v41 = vand.u32 2147483647, %v592_v47  ;;  %v389_v1 = vsub.f32 %v6011_v18, %v329_v4  ;;  %v420_v39 = vand.u32 2147483647, %v388_v32  ;;  %5165 = vmatprep.subr.bf16.mxu0 %v6045_v37  ;;  %v545_v37 = vpop.permute.xlu0 %544 }
  0xbe   : > { %v7872_v16 = vand.u32 4294901760, %v6162_v23  ;;  %v6204_v45 = vand.u32 4294901760, %v6183_v10  ;;  %v6207_v55 = vand.u32 4294901760, %v6175_v38  ;;  %v6213_v25 = vsub.f32 %v6143_v50, %v6159_v63 }
  0xbf   : > { %v6209_v54 = vmul.f32 %v686_v61, %v483_v62  ;;  %v655_v34 = vsub.f32 1.0, %v623_v58  ;;  %v421_v15 = vand.u32 2147483647, %v389_v1  ;;  %v452_v27 = vsub.f32 1.0, %v420_v39  ;;  %v8061_v61 = vld [vmem:[#allocation52_spill] sm:$0xff] }
  0xc0   : > { %8060 = vst [vmem:[#allocation62_spill] sm:$0xff] %v6213_v25  ;;  %v870_v8 = vsub.f32 %v6162_v23, %v7872_v16  ;;  %v6219_v4 = vand.u32 4294901760, %v6194_v28  ;;  %v6222_v60 = vand.u32 4294901760, %v6185_v49  ;;  %v6224_v19 = vmul.f32 %v685_v56, %v482_v31  ;;  %1593 = vmatprep.mubr.f32.mxu0 %v6213_v25  ;;  %5167 = vmatpush3.bf16.msra.mxu0 %v5977_v42 }
  0xc1   : > { %v7871_v50 = vand.u32 4294901760, %v6165_v40  ;;  %v6230_v9 = vand.u32 4294901760, %v6209_v54  ;;  %v656_v6 = vsub.f32 1.0, %v624_v41  ;;  %v453_v47 = vsub.f32 1.0, %v421_v15  ;;  %5169 = vmatprep.subr.bf16.mxu0 %v8061_v61 }
  0xc2   : > { %v871_v32 = vand.u32 4294901760, %v870_v8  ;;  %v7875_v31 = vand.u32 4294901760, %v6180_v57  ;;  %v6239_v62 = vsub.f32 %v6156_v51, %v6169_v20  ;;  %v593_v42 = vsub.f32 %v6013_v29, %v545_v37 }
  0xc3   : > { %v876_v56 = vsub.f32 %v6165_v40, %v7871_v50  ;;  %v687_v58 = vmax.f32 %v655_v34, 0.0  ;;  %v484_v1 = vmax.f32 %v452_v27, 0.0  ;;  %v594_v41 = vsub.f32 %v6015_v0, %v545_v37  ;;  %v8063_v27 = vld [vmem:[#allocation53_spill] sm:$0xff] }
  0xc4   : > { %8062 = vst [vmem:[#allocation52_spill] sm:$0xff] %v6239_v62  ;;  %872 = vmatprep.mubr.f32.mxu1 %v871_v32  ;;  %v390_v39 = vsub.f32 %v6009_v48, %v334_v53  ;;  %v885_v8 = vsub.f32 %v6180_v57, %v7875_v31  ;;  %1596 = vmatmul.mubr.f32.gmra.mrb[4].mxu0 %v6239_v62  ;;  %v625_v61 = vand.u32 2147483647, %v593_v42  ;;  %v688_v50 = vmax.f32 %v656_v6, 0.0  ;;  %v549_v31 = vpop.permute.xlu0 %548  ;;  %v8065_v57 = vld [vmem:[#allocation54_spill] sm:$0xff] }
  0xc5   : > { %v877_v15 = vand.u32 4294901760, %v876_v56  ;;  %v391_v51 = vsub.f32 %v6011_v18, %v334_v53  ;;  %v485_v16 = vmax.f32 %v453_v47, 0.0  ;;  %v626_v40 = vand.u32 2147483647, %v594_v41  ;;  %5171 = vmatpush3.bf16.msra.mxu0 %v8063_v27  ;;  %v8066_v53 = vld [vmem:[#allocation47_spill] sm:$0xff] }
  0xc6   : > { %v422_v34 = vand.u32 2147483647, %v390_v39  ;;  %v886_v37 = vand.u32 4294901760, %v885_v8  ;;  %v657_v32 = vsub.f32 1.0, %v625_v61  ;;  %v6252_v56 = vsub.f32 %v6183_v10, %v6204_v45  ;;  %5173 = vmatprep.subr.bf16.mxu0 %v8065_v57  ;;  %v339_v39 = vpop.permute.xlu1 %338 }
  0xc7   : > { %878 = vmatmul.mubr.f32.vlgmr.msra.gmra.mrb[0].mxu1 %v877_v15  ;;  %v423_v23 = vand.u32 2147483647, %v391_v51  ;;  %v6256_v42 = vand.u32 4294901760, %v6224_v19  ;;  %v658_v6 = vsub.f32 1.0, %v626_v40  ;;  %v7885_v41 = vand.u32 4294901760, %v6189_v21 }
  0xc8   : > { %8064 = vst [vmem:[#allocation53_spill] sm:$0xff] %v6252_v56  ;;  %5063 = vmatpush3.bf16.msra.mxu1 %v8066_v53  ;;  %v454_v47 = vsub.f32 1.0, %v422_v34  ;;  %v6260_v15 = vmul.f32 %v687_v58, %v484_v1  ;;  %887 = vmatprep.mubr.f32.mxu1 %v886_v37  ;;  %v7877_v10 = vand.u32 4294901760, %v6213_v25  ;;  %v6266_v57 = vsub.f32 %v6175_v38, %v6207_v55 }
  0xc9   : > { %v455_v8 = vsub.f32 1.0, %v423_v23  ;;  %1602 = vmatprep.mubr.f32.mxu0 %v6252_v56  ;;  %v6268_v61 = vmul.f32 %v688_v50, %v485_v16  ;;  %v689_v51 = vmax.f32 %v657_v32, 0.0  ;;  %v891_v40 = vsub.f32 %v6189_v21, %v7885_v41  ;;  %5065 = vmatprep.subr.bf16.mxu1 %v6058_v46 }
  0xca   : > { %8067 = vst [vmem:[#allocation54_spill] sm:$0xff] %v6266_v57  ;;  %v595_v58 = vsub.f32 %v6013_v29, %v549_v31  ;;  %5175 = vmatpush3.bf16.msra.mxu0 %v6055_v26  ;;  %v486_v23 = vmax.f32 %v454_v47, 0.0  ;;  %v900_v1 = vsub.f32 %v6213_v25, %v7877_v10  ;;  %v596_v38 = vsub.f32 %v6015_v0, %v549_v31 }
  0xcb   : > { %1605 = vmatmul.mubr.f32.gmra.mrb[6].mxu0 %v6266_v57  ;;  %v392_v16 = vsub.f32 %v6009_v48, %v339_v39  ;;  %5177 = vmatprep.subr.bf16.mxu0 %v6062_v24  ;;  %v690_v50 = vmax.f32 %v658_v6, 0.0  ;;  %v892_v34 = vand.u32 4294901760, %v891_v40  ;;  %v393_v46 = vsub.f32 %v6011_v18, %v339_v39  ;;  %v553_v6 = vpop.permute.xlu0 %552  ;;  %v344_v40 = vpop.permute.xlu1 %343 }
  0xcc   : > { %v627_v27 = vand.u32 2147483647, %v595_v58  ;;  %5067 = vmatpush3.bf16.msra.mxu1 %v6060_v22  ;;  %v487_v26 = vmax.f32 %v455_v8, 0.0  ;;  %v901_v37 = vand.u32 4294901760, %v900_v1  ;;  %v628_v32 = vand.u32 2147483647, %v596_v38 }
  0xcd   : > { %v424_v53 = vand.u32 2147483647, %v392_v16  ;;  %5069 = vmatprep.subr.bf16.mxu1 %v6066_v17  ;;  %v6287_v47 = vand.u32 4294901760, %v6260_v15  ;;  %893 = vmatmul.mubr.f32.gmra.mrb[2].mxu1 %v892_v34  ;;  %v425_v10 = vand.u32 2147483647, %v393_v46  ;;  %v6291_v24 = vsub.f32 %v6194_v28, %v6219_v4  ;;  %v8069_v58 = vld [vmem:[#allocation55_spill] sm:$0xff] }
  0xce   : > { %v659_v31 = vsub.f32 1.0, %v627_v27  ;;  %5179 = vmatpush3.bf16.msra.mxu0 %v6064_v12  ;;  %v6294_v22 = vmul.f32 %v689_v51, %v486_v23  ;;  %902 = vmatprep.mubr.f32.mxu1 %v901_v37  ;;  %v660_v39 = vsub.f32 1.0, %v628_v32  ;;  %v7884_v17 = vand.u32 4294901760, %v6239_v62  ;;  %v8071_v12 = vld [vmem:[#allocation51_spill] sm:$0xff] }
  0xcf   : > { %8068 = vst [vmem:[#allocation47_spill] sm:$0xff] %v6291_v24  ;;  %v456_v8 = vsub.f32 1.0, %v424_v53  ;;  %5181 = vmatprep.subr.bf16.mxu0 %v8069_v58  ;;  %v457_v38 = vsub.f32 1.0, %v425_v10  ;;  %1611 = vmatprep.mubr.f32.mxu0 %v6291_v24  ;;  %v7878_v28 = vand.u32 4294901760, %v6252_v56  ;;  %v6302_v16 = vsub.f32 %v6185_v49, %v6222_v60 }
  0xd0   : > { %v691_v1 = vmax.f32 %v659_v31, 0.0  ;;  %5071 = vmatpush3.bf16.msra.mxu1 %v8071_v12  ;;  %v6305_v51 = vmul.f32 %v690_v50, %v487_v26  ;;  %v906_v34 = vsub.f32 %v6239_v62, %v7884_v17  ;;  %v597_v27 = vsub.f32 %v6013_v29, %v553_v6  ;;  %v8072_v31 = vld [vmem:[#allocation56_spill] sm:$0xff]  ;;  %v8073_v12 = vld [vmem:[#allocation57_spill] sm:$0xff] }
  0xd1   : > { %8070 = vst [vmem:[#allocation55_spill] sm:$0xff] %v6302_v16  ;;  %v488_v23 = vmax.f32 %v456_v8, 0.0  ;;  %5073 = vmatprep.subr.bf16.mxu1 %v6093_v44  ;;  %v692_v10 = vmax.f32 %v660_v39, 0.0  ;;  %v915_v46 = vsub.f32 %v6252_v56, %v7878_v28  ;;  %1614 = vmatmul.mubr.f32.gmra.mrb[8].mxu0 %v6302_v16  ;;  %v598_v49 = vsub.f32 %v6015_v0, %v553_v6 }
  0xd2   : > { %v394_v50 = vsub.f32 %v6009_v48, %v344_v40  ;;  %v489_v26 = vmax.f32 %v457_v38, 0.0  ;;  %v907_v37 = vand.u32 4294901760, %v906_v34  ;;  %v629_v32 = vand.u32 2147483647, %v597_v27  ;;  %5183 = vmatpush3.bf16.msra.mxu0 %v8072_v31  ;;  %v557_v27 = vpop.permute.xlu0 %556 }
  0xd3   : > { %v395_v53 = vsub.f32 %v6011_v18, %v344_v40  ;;  %v723_v8 = vmul.f32 %v691_v1, %v488_v23  ;;  %v916_v44 = vand.u32 4294901760, %v915_v46  ;;  %v630_v39 = vand.u32 2147483647, %v598_v49  ;;  %5185 = vmatprep.subr.bf16.mxu0 %v8073_v12 }
  0xd4   : > { %v426_v58 = vand.u32 2147483647, %v394_v50  ;;  %5075 = vmatpush3.bf16.msra.mxu1 %v6102_v11  ;;  %v6323_v28 = vand.u32 4294901760, %v6268_v61  ;;  %v661_v6 = vsub.f32 1.0, %v629_v32  ;;  %v6327_v34 = vsub.f32 %v6209_v54, %v6230_v9 }
  0xd5   : > { %908 = vmatmul.mubr.f32.gmra.mrb[4].mxu1 %v907_v37  ;;  %v427_v38 = vand.u32 2147483647, %v395_v53  ;;  %5077 = vmatprep.subr.bf16.mxu1 %v6104_v30  ;;  %v6331_v40 = vand.u32 4294901760, %v6294_v22  ;;  %v662_v1 = vsub.f32 1.0, %v630_v39  ;;  %v7880_v11 = vand.u32 4294901760, %v6266_v57  ;;  %v349_v37 = vpop.permute.xlu1 %348 }
  0xd6   : > { %8074 = vst [vmem:[#allocation51_spill] sm:$0xff] %v6327_v34  ;;  %917 = vmatprep.mubr.f32.mxu1 %v916_v44  ;;  %v458_v23 = vsub.f32 1.0, %v426_v58  ;;  %v6335_v46 = vand.u32 4294901760, %v6305_v51  ;;  %v693_v49 = vmax.f32 %v661_v6, 0.0  ;;  %1620 = vmatprep.mubr.f32.mxu0 %v6327_v34  ;;  %v7879_v54 = vand.u32 4294901760, %v6291_v24 }
  0xd7   : > { %v459_v50 = vsub.f32 1.0, %v427_v38  ;;  %5187 = vmatpush3.bf16.msra.mxu0 %v6088_v2  ;;  %v6340_v30 = vmul.f32 %v692_v10, %v489_v26  ;;  %v6342_v32 = vand.u32 4294901760, %v723_v8  ;;  %v921_v31 = vsub.f32 %v6266_v57, %v7880_v11 }
  0xd8   : > { %v490_v53 = vmax.f32 %v458_v23, 0.0  ;;  %5079 = vmatpush3.bf16.msra.mxu1 %v6106_v36  ;;  %v694_v44 = vmax.f32 %v662_v1, 0.0  ;;  %v930_v39 = vsub.f32 %v6291_v24, %v7879_v54  ;;  %v6353_v58 = vsub.f32 %v6224_v19, %v6256_v42 }
  0xd9   : > { %v599_v2 = vsub.f32 %v6013_v29, %v557_v27  ;;  %5081 = vmatprep.subr.bf16.mxu1 %v6108_v14  ;;  %v491_v10 = vmax.f32 %v459_v50, 0.0  ;;  %v922_v26 = vand.u32 4294901760, %v921_v31  ;;  %v600_v12 = vsub.f32 %v6015_v0, %v557_v27  ;;  %v561_v31 = vpop.permute.xlu0 %560 }
  0xda   : > { %8075 = vst [vmem:[#allocation56_spill] sm:$0xff] %v6353_v58  ;;  %v396_v6 = vsub.f32 %v6009_v48, %v349_v37  ;;  %v725_v36 = vmul.f32 %v693_v49, %v490_v53  ;;  %v931_v38 = vand.u32 4294901760, %v930_v39  ;;  %1623 = vmatmul.mubr.f32.gmra.mrb[10].mxu0 %v6353_v58  ;;  %v397_v23 = vsub.f32 %v6011_v18, %v349_v37 }
  0xdb   : > { %v631_v1 = vand.u32 2147483647, %v599_v2  ;;  %v6362_v19 = vand.u32 4294901760, %v6340_v30  ;;  %923 = vmatmul.mubr.f32.gmra.mrb[6].mxu1 %v922_v26  ;;  %v632_v54 = vand.u32 2147483647, %v600_v12  ;;  %v6366_v14 = vsub.f32 %v6268_v61, %v6323_v28 }
  0xdc   : > { %v428_v11 = vand.u32 2147483647, %v396_v6  ;;  %v6369_v27 = vsub.f32 %v723_v8, %v6342_v32  ;;  %932 = vmatprep.mubr.f32.mxu1 %v931_v38  ;;  %v429_v50 = vand.u32 2147483647, %v397_v23  ;;  %v7883_v53 = vand.u32 4294901760, %v6302_v16  ;;  %5083 = vmatpush3.bf16.msra.mxu1 %v6113_v33  ;;  %v354_v38 = vpop.permute.xlu1 %353 }
  0xdd   : > { %8076 = vst [vmem:[#allocation57_spill] sm:$0xff] %v6366_v14  ;;  %v663_v49 = vsub.f32 1.0, %v631_v1  ;;  %v6373_v37 = vmul.f32 %v694_v44, %v491_v10  ;;  %v664_v39 = vsub.f32 1.0, %v632_v54  ;;  %1629 = vmatprep.mubr.f32.mxu0 %v6366_v14  ;;  %v7881_v61 = vand.u32 4294901760, %v6327_v34  ;;  %5085 = vmatprep.subr.bf16.mxu1 %v6115_v59 }
  0xde   : > { %v460_v2 = vsub.f32 1.0, %v428_v11  ;;  %v6378_v8 = vand.u32 4294901760, %v725_v36  ;;  %v461_v12 = vsub.f32 1.0, %v429_v50  ;;  %v936_v6 = vsub.f32 %v6302_v16, %v7883_v53 }
  0xdf   : > { %v695_v26 = vmax.f32 %v663_v49, 0.0  ;;  %v696_v33 = vmax.f32 %v664_v39, 0.0  ;;  %v945_v11 = vsub.f32 %v6327_v34, %v7881_v61  ;;  %v6388_v54 = vsub.f32 %v6260_v15, %v6287_v47 }
  0xe0   : > { %v492_v44 = vmax.f32 %v460_v2, 0.0  ;;  %v493_v59 = vmax.f32 %v461_v12, 0.0  ;;  %v937_v10 = vand.u32 4294901760, %v936_v6  ;;  %v601_v1 = vsub.f32 %v6013_v29, %v561_v31  ;;  %5087 = vmatpush3.bf16.msra.mxu1 %v6117_v52  ;;  %v565_v52 = vpop.permute.xlu0 %564 }
  0xe1   : > { %8077 = vst [vmem:[#allocation63_spill] sm:$0xff] %v6388_v54  ;;  %v602_v23 = vsub.f32 %v6015_v0, %v561_v31  ;;  %v946_v50 = vand.u32 4294901760, %v945_v11  ;;  %1632 = vmatmul.mubr.f32.gmra.mrb[12].mxu0 %v6388_v54  ;;  %v398_v39 = vsub.f32 %v6009_v48, %v354_v38  ;;  %v399_v2 = vsub.f32 %v6011_v18, %v354_v38 }
  0xe2   : > { %v727_v49 = vmul.f32 %v695_v26, %v492_v44  ;;  %5089 = vmatprep.subr.bf16.mxu1 %v6130_v43  ;;  %v6397_v15 = vmul.f32 %v696_v33, %v493_v59  ;;  %938 = vmatmul.mubr.f32.gmra.mrb[8].mxu1 %v937_v10  ;;  %v633_v12 = vand.u32 2147483647, %v601_v1  ;;  %v6401_v31 = vsub.f32 %v6305_v51, %v6335_v46 }
  0xe3   : > { %v634_v6 = vand.u32 2147483647, %v602_v23  ;;  %v6405_v26 = vsub.f32 %v6340_v30, %v6362_v19  ;;  %947 = vmatprep.mubr.f32.mxu1 %v946_v50  ;;  %v430_v44 = vand.u32 2147483647, %v398_v39  ;;  %v431_v11 = vand.u32 2147483647, %v399_v2  ;;  %v359_v50 = vpop.permute.xlu1 %358 }
  0xe4   : > { %8078 = vst [vmem:[#allocation64_spill] sm:$0xff] %v6401_v31  ;;  %v7882_v38 = vand.u32 4294901760, %v6353_v58  ;;  %v6409_v43 = vand.u32 4294901760, %v6373_v37  ;;  %v665_v33 = vsub.f32 1.0, %v633_v12  ;;  %1638 = vmatprep.mubr.f32.mxu0 %v6401_v31  ;;  %v7887_v51 = vand.u32 4294901760, %v6366_v14  ;;  %5091 = vmatpush3.bf16.msra.mxu1 %v6134_v5  ;;  %v8079_v39 = vld [vmem:[#allocation3_spill] sm:$0xff]  ;;  %v569_v41 = vpop.permute.xlu0 %568 }
  0xe5   : > { %v666_v59 = vsub.f32 1.0, %v634_v6  ;;  %v6415_v10 = vsub.f32 %v725_v36, %v6378_v8  ;;  %v462_v30 = vsub.f32 1.0, %v430_v44  ;;  %v463_v1 = vsub.f32 1.0, %v431_v11  ;;  %5412 = vmatprep.subr.bf16.mxu1 %v8079_v39 }
  0xe6   : > { %v951_v23 = vsub.f32 %v6353_v58, %v7882_v38  ;;  %v6422_v2 = vand.u32 4294901760, %v6397_v15  ;;  %v6424_v12 = vand.u32 4294901760, %v727_v49  ;;  %v960_v5 = vsub.f32 %v6366_v14, %v7887_v51 }
  0xe7   : > { %v698_v6 = vmax.f32 %v666_v59, 0.0  ;;  %v697_v36 = vmax.f32 %v665_v33, 0.0  ;;  %v495_v44 = vmax.f32 %v463_v1, 0.0  ;;  %v6431_v61 = vsub.f32 %v6294_v22, %v6331_v40 }
  0xe8   : > { %v952_v11 = vand.u32 4294901760, %v951_v23  ;;  %v961_v38 = vand.u32 4294901760, %v960_v5  ;;  %v603_v39 = vsub.f32 %v6013_v29, %v565_v52  ;;  %v604_v53 = vsub.f32 %v6015_v0, %v565_v52 }
  0xe9   : > { %8080 = vst [vmem:[#allocation3_spill] sm:$0xff] %v6431_v61  ;;  %v400_v17 = vsub.f32 %v6009_v48, %v359_v50  ;;  %v494_v59 = vmax.f32 %v462_v30, 0.0  ;;  %v730_v58 = vmul.f32 %v698_v6, %v495_v44  ;;  %1641 = vmatmul.mubr.f32.gmra.mrb[14].mxu0 %v6431_v61  ;;  %v401_v33 = vsub.f32 %v6011_v18, %v359_v50 }
  0xea   : > { %953 = vmatmul.mubr.f32.gmra.mrb[10].mxu1 %v952_v11  ;;  %v7891_v1 = vand.u32 4294901760, %v6388_v54  ;;  %v6441_v22 = vsub.f32 %v6373_v37, %v6409_v43  ;;  %v635_v23 = vand.u32 2147483647, %v603_v39  ;;  %v636_v5 = vand.u32 2147483647, %v604_v53  ;;  %2152 = vmatprep.mubr.f32.mxu0 %v6148_v35  ;;  %v364_v39 = vpop.permute.xlu1 %363 }
  0xeb   : > { %962 = vmatprep.mubr.f32.mxu1 %v961_v38  ;;  %v432_v52 = vand.u32 2147483647, %v400_v17  ;;  %v6445_v30 = vsub.f32 %v727_v49, %v6424_v12  ;;  %v433_v6 = vand.u32 2147483647, %v401_v33  ;;  %v605_v44 = vsub.f32 %v6013_v29, %v569_v41 }
  0xec   : > { %v966_v50 = vsub.f32 %v6388_v54, %v7891_v1  ;;  %v667_v11 = vsub.f32 1.0, %v635_v23  ;;  %v668_v51 = vsub.f32 1.0, %v636_v5  ;;  %v7895_v38 = vand.u32 4294901760, %v6401_v31 }
  0xed   : > { %v464_v37 = vsub.f32 1.0, %v432_v52  ;;  %v729_v53 = vmul.f32 %v697_v36, %v494_v59  ;;  %v6452_v17 = vand.u32 4294901760, %v730_v58  ;;  %v465_v14 = vsub.f32 1.0, %v433_v6  ;;  %2154 = vmatmul.mubr.f32.vlgmr.msra.gmra.mrb[16].mxu0 %v6150_v13 }
  0xee   : > { %v967_v34 = vand.u32 4294901760, %v966_v50  ;;  %v699_v49 = vmax.f32 %v667_v11, 0.0  ;;  %v700_v33 = vmax.f32 %v668_v51, 0.0  ;;  %v975_v1 = vsub.f32 %v6401_v31, %v7895_v38  ;;  %2159 = vmatprep.mubr.f32.mxu0 %v6137_v7 }
  0xef   : > { %8081 = vst [vmem:[#allocation65_spill] sm:$0xff] %v6452_v17  ;;  %v496_v16 = vmax.f32 %v464_v37, 0.0  ;;  %v497_v23 = vmax.f32 %v465_v14, 0.0  ;;  %v606_v5 = vsub.f32 %v6015_v0, %v569_v41  ;;  %v637_v36 = vand.u32 2147483647, %v605_v44 }
  0xf0   : > { %968 = vmatmul.mubr.f32.gmra.mrb[12].mxu1 %v967_v34  ;;  %v402_v59 = vsub.f32 %v6009_v48, %v364_v39  ;;  %v976_v6 = vand.u32 4294901760, %v975_v1  ;;  %v403_v50 = vsub.f32 %v6011_v18, %v364_v39  ;;  %v7894_v51 = vand.u32 4294901760, %v6431_v61  ;;  %v573_v1 = vpop.permute.xlu0 %572 }
  0xf1   : > { %v731_v52 = vmul.f32 %v699_v49, %v496_v16  ;;  %v732_v11 = vmul.f32 %v700_v33, %v497_v23  ;;  %v638_v37 = vand.u32 2147483647, %v606_v5  ;;  %v669_v54 = vsub.f32 1.0, %v637_v36  ;;  %2161 = vmatmul.mubr.f32.gmra.mrb[18].mxu0 %v6154_v3 }
  0xf2   : > { %v434_v24 = vand.u32 2147483647, %v402_v59  ;;  %v6466_v34 = vsub.f32 %v6397_v15, %v6422_v2  ;;  %977 = vmatprep.mubr.f32.mxu1 %v976_v6  ;;  %v435_v41 = vand.u32 2147483647, %v403_v50  ;;  %v981_v16 = vsub.f32 %v6431_v61, %v7894_v51  ;;  %2166 = vmatprep.mubr.f32.mxu0 %v6159_v63  ;;  %v369_v15 = vpop.permute.xlu1 %368 }
  0xf3   : > { %v7897_v14 = vand.u32 4294901760, %v6405_v26  ;;  %v6474_v44 = vsub.f32 %v730_v58, %v6452_v17  ;;  %v6476_v39 = vand.u32 4294901760, %v729_v53  ;;  %v670_v49 = vsub.f32 1.0, %v638_v37 }
  0xf4   : > { %v466_v33 = vsub.f32 1.0, %v434_v24  ;;  %v6478_v23 = vand.u32 4294901760, %v731_v52  ;;  %v467_v5 = vsub.f32 1.0, %v435_v41  ;;  %v982_v36 = vand.u32 4294901760, %v981_v16 }
  0xf5   : > { %8082 = vst [vmem:[#allocation66_spill] sm:$0xff] %v6476_v39  ;;  %v990_v59 = vsub.f32 %v6405_v26, %v7897_v14  ;;  %v6483_v6 = vand.u32 4294901760, %v732_v11  ;;  %v701_v50 = vmax.f32 %v669_v54, 0.0  ;;  %v702_v51 = vmax.f32 %v670_v49, 0.0  ;;  %2168 = vmatmul.mubr.f32.gmra.mrb[20].mxu0 %v6169_v20 }
  0xf6   : > { %8083 = vst [vmem:[#allocation67_spill] sm:$0xff] %v6478_v23  ;;  %v607_v58 = vsub.f32 %v6013_v29, %v573_v1  ;;  %v499_v38 = vmax.f32 %v467_v5, 0.0  ;;  %983 = vmatmul.mubr.f32.gmra.mrb[14].mxu1 %v982_v36  ;;  %v608_v37 = vsub.f32 %v6015_v0, %v573_v1  ;;  %v404_v41 = vsub.f32 %v6009_v48, %v369_v15 }
  0xf7   : > { %8084 = vst [vmem:[#allocation68_spill] sm:$0xff] %v6483_v6  ;;  %v991_v24 = vand.u32 4294901760, %v990_v59  ;;  %2173 = vmatprep.mubr.f32.mxu0 %v6204_v45  ;;  %v498_v16 = vmax.f32 %v466_v33, 0.0  ;;  %v405_v14 = vsub.f32 %v6011_v18, %v369_v15  ;;  %v7901_v54 = vand.u32 4294901760, %v6369_v27 }
  0xf8   : > { %v639_v61 = vand.u32 2147483647, %v607_v58  ;;  %v6493_v49 = vsub.f32 %v729_v53, %v6476_v39  ;;  %v640_v31 = vand.u32 2147483647, %v608_v37  ;;  %v436_v5 = vand.u32 2147483647, %v404_v41  ;;  %v577_v37 = vpop.permute.xlu0 %576  ;;  %v374_v41 = vpop.permute.xlu1 %373 }
  0xf9   : > { %992 = vmatprep.mubr.f32.mxu1 %v991_v24  ;;  %v7904_v36 = vand.u32 4294901760, %v6441_v22  ;;  %v6497_v1 = vsub.f32 %v731_v52, %v6478_v23  ;;  %v437_v57 = vand.u32 2147483647, %v405_v14  ;;  %v996_v33 = vsub.f32 %v6369_v27, %v7901_v54  ;;  %2175 = vmatmul.mubr.f32.gmra.mrb[22].mxu0 %v6207_v55 }
  0xfa   : > { %v671_v59 = vsub.f32 1.0, %v639_v61  ;;  %v734_v15 = vmul.f32 %v702_v51, %v499_v38  ;;  %v672_v58 = vsub.f32 1.0, %v640_v31  ;;  %v468_v53 = vsub.f32 1.0, %v436_v5  ;;  %2180 = vmatprep.mubr.f32.mxu0 %v6219_v4 }
  0xfb   : > { %v1005_v24 = vsub.f32 %v6441_v22, %v7904_v36  ;;  %v6508_v61 = vsub.f32 %v732_v11, %v6483_v6  ;;  %v733_v52 = vmul.f32 %v701_v50, %v498_v16  ;;  %v469_v14 = vsub.f32 1.0, %v437_v57 }
  0xfc   : > { %v997_v56 = vand.u32 4294901760, %v996_v33  ;;  %v703_v54 = vmax.f32 %v671_v59, 0.0  ;;  %v704_v62 = vmax.f32 %v672_v58, 0.0  ;;  %v500_v25 = vmax.f32 %v468_v53, 0.0 }
  0xfd   : > { %v1006_v38 = vand.u32 4294901760, %v1005_v24  ;;  %v501_v31 = vmax.f32 %v469_v14, 0.0  ;;  %v609_v51 = vsub.f32 %v6013_v29, %v577_v37  ;;  %v610_v5 = vsub.f32 %v6015_v0, %v577_v37  ;;  %2182 = vmatmul.mubr.f32.gmra.mrb[24].mxu0 %v6222_v60 }
  0xfe   : > { %998 = vmatmul.mubr.f32.gmra.mrb[16].mxu1 %v997_v56  ;;  %v406_v36 = vsub.f32 %v6009_v48, %v374_v41  ;;  %v6514_v21 = vand.u32 4294901760, %v734_v15  ;;  %v407_v57 = vsub.f32 %v6011_v18, %v374_v41  ;;  %v7918_v11 = vand.u32 4294901760, %v6415_v10  ;;  %2187 = vmatprep.mubr.f32.mxu0 %v6230_v9 }
  0xff   : > { %1007 = vmatprep.mubr.f32.mxu1 %v1006_v38  ;;  %v7917_v50 = vand.u32 4294901760, %v6466_v34  ;;  %v736_v56 = vmul.f32 %v704_v62, %v501_v31  ;;  %v641_v16 = vand.u32 2147483647, %v609_v51  ;;  %v642_v29 = vand.u32 2147483647, %v610_v5 }
 0x100   : > { %8085 = vst [vmem:[#allocation69_spill] sm:$0xff] %v6514_v21  ;;  %v438_v59 = vand.u32 2147483647, %v406_v36  ;;  %v6520_v0 = vand.u32 4294901760, %v733_v52  ;;  %v439_v48 = vand.u32 2147483647, %v407_v57  ;;  %v1011_v33 = vsub.f32 %v6415_v10, %v7918_v11 }
 0x101   : > { %v1020_v18 = vsub.f32 %v6466_v34, %v7917_v50  ;;  %v735_v58 = vmul.f32 %v703_v54, %v500_v25  ;;  %v673_v53 = vsub.f32 1.0, %v641_v16  ;;  %v674_v24 = vsub.f32 1.0, %v642_v29  ;;  %2189 = vmatmul.mubr.f32.gmra.mrb[26].mxu0 %v6256_v42  ;;  %v8120_v50 = vld [vmem:[#allocation39_spill] sm:$0xff] }
 0x102   : > { %8086 = vst [vmem:[#allocation70_spill] sm:$0xff] %v6520_v0  ;;  %v470_v37 = vsub.f32 1.0, %v438_v59  ;;  %v6529_v62 = vand.u32 4294901760, %v736_v56  ;;  %v471_v36 = vsub.f32 1.0, %v439_v48  ;;  %v1012_v41 = vand.u32 4294901760, %v1011_v33  ;;  %2194 = vmatprep.mubr.f32.mxu0 %v6323_v28  ;;  %v8121_v11 = vld [vmem:[#allocation43_spill] sm:$0xff] }
 0x103   : > { %v1021_v14 = vand.u32 4294901760, %v1020_v18  ;;  %v6533_v38 = vsub.f32 %v734_v15, %v6514_v21  ;;  %v705_v31 = vmax.f32 %v673_v53, 0.0  ;;  %v706_v51 = vmax.f32 %v674_v24, 0.0 }
 0x104   : > { %8087 = vst [vmem:[#allocation71_spill] sm:$0xff] %v6529_v62  ;;  %v502_v5 = vmax.f32 %v470_v37, 0.0  ;;  %v503_v57 = vmax.f32 %v471_v36, 0.0  ;;  %1013 = vmatmul.mubr.f32.gmra.mrb[18].mxu1 %v1012_v41  ;;  %v7916_v25 = vand.u32 4294901760, %v6445_v30  ;;  %v7915_v54 = vand.u32 4294901760, %v6474_v44 }
 0x105   : > { %v7907_v16 = vand.u32 4294901760, %v6493_v49  ;;  %v6539_v29 = vsub.f32 %v733_v52, %v6520_v0  ;;  %v6541_v59 = vand.u32 4294901760, %v735_v58  ;;  %1022 = vmatprep.mubr.f32.mxu1 %v1021_v14  ;;  %v7906_v15 = vand.u32 4294901760, %v6508_v61  ;;  %2196 = vmatmul.mubr.f32.gmra.mrb[28].mxu0 %v6287_v47 }
 0x106   : > { %v6546_v48 = vsub.f32 %v736_v56, %v6529_v62  ;;  %v738_v33 = vmul.f32 %v706_v51, %v503_v57  ;;  %v1026_v18 = vsub.f32 %v6445_v30, %v7916_v25  ;;  %v1035_v52 = vsub.f32 %v6474_v44, %v7915_v54  ;;  %2201 = vmatprep.mubr.f32.mxu0 %v6335_v46  ;;  %v8118_v54 = vld [vmem:[#allocation34_spill] sm:$0xff] }
 0x107   : > { %8088 = vst [vmem:[#allocation72_spill] sm:$0xff] %v6541_v59  ;;  %v737_v53 = vmul.f32 %v705_v31, %v502_v5  ;;  %v1050_v24 = vsub.f32 %v6508_v61, %v7906_v15  ;;  %v7909_v37 = vand.u32 4294901760, %v6497_v1  ;;  %v7908_v56 = vand.u32 4294901760, %v6533_v38  ;;  %v8119_v25 = vld [vmem:[#allocation38_spill] sm:$0xff] }
 0x108   : > { %v6560_v36 = vand.u32 4294901760, %v738_v33  ;;  %v1027_v41 = vand.u32 4294901760, %v1026_v18  ;;  %v1036_v14 = vand.u32 4294901760, %v1035_v52  ;;  %v1041_v51 = vsub.f32 %v6493_v49, %v7907_v16 }
 0x109   : > { %2203 = vmatmul.mubr.f32.gmra.mrb[30].mxu0 %v6331_v40  ;;  %v6567_v31 = vsub.f32 %v735_v58, %v6541_v59  ;;  %v1051_v57 = vand.u32 4294901760, %v1050_v24  ;;  %v1065_v18 = vsub.f32 %v6533_v38, %v7908_v56  ;;  %v7910_v52 = vand.u32 4294901760, %v6546_v48 }
 0x10a   : > { %8089 = vst [vmem:[#allocation73_spill] sm:$0xff] %v6560_v36  ;;  %1028 = vmatmul.mubr.f32.gmra.mrb[20].mxu1 %v1027_v41  ;;  %2208 = vmatprep.mubr.f32.mxu0 %v6362_v19  ;;  %v6571_v5 = vsub.f32 %v738_v33, %v6560_v36  ;;  %v6577_v15 = vand.u32 4294901760, %v737_v53  ;;  %v1042_v16 = vand.u32 4294901760, %v1041_v51  ;;  %v1056_v58 = vsub.f32 %v6497_v1, %v7909_v37 }
 0x10b   : > { %1037 = vmatprep.mubr.f32.mxu1 %v1036_v14  ;;  %v7914_v41 = vand.u32 4294901760, %v6539_v29  ;;  %v1066_v33 = vand.u32 4294901760, %v1065_v18  ;;  %v1080_v24 = vsub.f32 %v6546_v48, %v7910_v52 }
 0x10c   : > { %8090 = vst [vmem:[#allocation74_spill] sm:$0xff] %v6577_v15  ;;  %v7912_v14 = vand.u32 4294901760, %v6571_v5  ;;  %v6590_v51 = vsub.f32 %v737_v53, %v6577_v15  ;;  %v1057_v56 = vand.u32 4294901760, %v1056_v58 }
 0x10d   : > { %2210 = vmatmul.mubr.f32.gmra.mrb[32].mxu0 %v6342_v32  ;;  %v1071_v37 = vsub.f32 %v6539_v29, %v7914_v41  ;;  %v8117_v41 = vld [vmem:[#allocation32_spill] sm:$0xff] }
 0x10e   : > { %1043 = vmatmul.mubr.f32.gmra.mrb[22].mxu1 %v1042_v16  ;;  %2215 = vmatprep.mubr.f32.mxu0 %v6409_v43  ;;  %v7913_v16 = vand.u32 4294901760, %v6567_v31  ;;  %v1095_v18 = vsub.f32 %v6571_v5, %v7912_v14  ;;  %v7911_v52 = vand.u32 4294901760, %v6590_v51  ;;  %v8115_v14 = vld [vmem:[#allocation27_spill] sm:$0xff] }
 0x10f   : > { %1052 = vmatprep.mubr.f32.mxu1 %v1051_v57  ;;  %v1081_v57 = vand.u32 4294901760, %v1080_v24  ;;  %v1072_v53 = vand.u32 4294901760, %v1071_v37 }
 0x110   : > { %v1086_v58 = vsub.f32 %v6567_v31, %v7913_v16  ;;  %v1101_v24 = vsub.f32 %v6590_v51, %v7911_v52  ;;  %v8114_v52 = vld [vmem:[#allocation26_spill] sm:$0xff]  ;;  %v8116_v16 = vld [vmem:[#allocation29_spill] sm:$0xff] }
 0x111   : > { %2217 = vmatmul.mubr.f32.gmra.mrb[34].mxu0 %v6378_v8 }
 0x112   : > { %1058 = vmatmul.mubr.f32.gmra.mrb[24].mxu1 %v1057_v56  ;;  %2222 = vmatprep.mubr.f32.mxu0 %v6422_v2  ;;  %v1096_v56 = vand.u32 4294901760, %v1095_v18  ;;  %v1102_v37 = vand.u32 4294901760, %v1101_v24  ;;  %v8092_v18 = vld [vmem:[#allocation6_spill] sm:$0xff]  ;;  %v8097_v24 = vld [vmem:[#allocation23_spill] sm:$0xff] }
 0x113   : > { %1067 = vmatprep.mubr.f32.mxu1 %v1066_v33  ;;  %v1087_v33 = vand.u32 4294901760, %v1086_v58  ;;  %v8094_v58 = vld [vmem:[#allocation17_spill] sm:$0xff] }
 0x115   : > { %2224 = vmatmul.mubr.f32.gmra.mrb[36].mxu0 %v6424_v12 }
 0x116   : > { %1073 = vmatmul.mubr.f32.gmra.mrb[26].mxu1 %v1072_v53  ;;  %2229 = vmatprep.mubr.f32.mxu0 %v6452_v17  ;;  %v8093_v53 = vld [vmem:[#allocation8_spill] sm:$0xff] }
 0x117   : > { %1082 = vmatprep.mubr.f32.mxu1 %v1081_v57  ;;  %v8091_v57 = vld [vmem:[#allocation5_spill] sm:$0xff] }
 0x119   : > { %2231 = vmatmul.mubr.f32.gmra.mrb[38].mxu0 %v6476_v39 }
 0x11a   : > { %1088 = vmatmul.mubr.f32.gmra.mrb[28].mxu1 %v1087_v33  ;;  %2236 = vmatprep.mubr.f32.mxu0 %v6483_v6  ;;  %v8096_v33 = vld [vmem:[#allocation21_spill] sm:$0xff] }
 0x11b   : > { %1097 = vmatprep.mubr.f32.mxu1 %v1096_v56  ;;  %v8095_v56 = vld [vmem:[#allocation19_spill] sm:$0xff] }
 0x11d   : > { %2238 = vmatmul.mubr.f32.gmra.mrb[40].mxu0 %v6478_v23 }
 0x11e   : > { %1103 = vmatmul.mubr.f32.gmra.mrb[30].mxu1 %v1102_v37  ;;  %2243 = vmatprep.mubr.f32.mxu0 %v6514_v21  ;;  %v8098_v37 = vld [vmem:[#allocation25_spill] sm:$0xff] }
 0x11f   : > { %1333 = vmatprep.mubr.f32.mxu1 %v6148_v35 }
 0x121   : > { %2245 = vmatmul.mubr.f32.gmra.mrb[42].mxu0 %v6520_v0 }
 0x122   : > { %1335 = vmatmul.mubr.f32.vlgmr.msra.gmra.mrb[32].mxu1 %v6150_v13  ;;  %2250 = vmatprep.mubr.f32.mxu0 %v6529_v62 }
 0x123   : > { %5420 = vmatpush3.bf16.msra.mxu1 %v8091_v57  ;;  %1340 = vmatprep.mubr.f32.mxu1 %v6137_v7  ;;  %v8099_v57 = vld [vmem:[#allocation28_spill] sm:$0xff] }
 0x124   : > { %5413 = vmatprep.subr.bf16.mxu1 %v8092_v18  ;;  %v8100_v18 = vld [vmem:[#allocation30_spill] sm:$0xff] }
 0x125   : > { %2252 = vmatmul.mubr.f32.gmra.mrb[44].mxu0 %v6541_v59 }
 0x126   : > { %1342 = vmatmul.mubr.f32.gmra.mrb[34].mxu1 %v6154_v3  ;;  %2257 = vmatprep.mubr.f32.mxu0 %v6560_v36 }
 0x127   : > { %1347 = vmatprep.mubr.f32.mxu1 %v6159_v63  ;;  %5421 = vmatpush3.bf16.msra.mxu1 %v8093_v53  ;;  %v8101_v53 = vld [vmem:[#allocation31_spill] sm:$0xff] }
 0x128   : > { %5414 = vmatprep.subr.bf16.mxu1 %v8094_v58  ;;  %v8102_v58 = vld [vmem:[#allocation33_spill] sm:$0xff] }
 0x129   : > { %2259 = vmatmul.mubr.f32.gmra.mrb[46].mxu0 %v6577_v15 }
 0x12a   : > { %1349 = vmatmul.mubr.f32.gmra.mrb[36].mxu1 %v6169_v20 }
 0x12b   : > { %1354 = vmatprep.mubr.f32.mxu1 %v6204_v45  ;;  %5422 = vmatpush3.bf16.msra.mxu1 %v8095_v56  ;;  %v8103_v56 = vld [vmem:[#allocation36_spill] sm:$0xff] }
 0x12c   : > { %5415 = vmatprep.subr.bf16.mxu1 %v8096_v33  ;;  %v8104_v33 = vld [vmem:[#allocation37_spill] sm:$0xff] }
 0x12e   : > { %1356 = vmatmul.mubr.f32.gmra.mrb[38].mxu1 %v6207_v55 }
 0x12f   : > { %1361 = vmatprep.mubr.f32.mxu1 %v6219_v4  ;;  %5423 = vmatpush3.bf16.msra.mxu1 %v8097_v24  ;;  %v8105_v24 = vld [vmem:[#allocation41_spill] sm:$0xff] }
 0x130   : > { %5416 = vmatprep.subr.bf16.mxu1 %v8098_v37  ;;  %v8106_v37 = vld [vmem:[#allocation2_spill] sm:$0xff] }
 0x132   : > { %1363 = vmatmul.mubr.f32.gmra.mrb[40].mxu1 %v6222_v60 }
 0x133   : > { %1368 = vmatprep.mubr.f32.mxu1 %v6230_v9  ;;  %5424 = vmatpush3.bf16.msra.mxu1 %v8099_v57  ;;  %v8107_v57 = vld [vmem:[#allocation4_spill] sm:$0xff] }
 0x134   : > { %5417 = vmatprep.subr.bf16.mxu1 %v8100_v18  ;;  %v8108_v18 = vld [vmem:[#allocation7_spill] sm:$0xff] }
 0x136   : > { %1370 = vmatmul.mubr.f32.gmra.mrb[42].mxu1 %v6256_v42 }
 0x137   : > { %1375 = vmatprep.mubr.f32.mxu1 %v6323_v28  ;;  %5425 = vmatpush3.bf16.msra.mxu1 %v8101_v53  ;;  %v8109_v53 = vld [vmem:[#allocation16_spill] sm:$0xff] }
 0x138   : > { %5418 = vmatprep.subr.bf16.mxu1 %v8102_v58  ;;  %v8110_v58 = vld [vmem:[#allocation18_spill] sm:$0xff] }
 0x13a   : > { %1377 = vmatmul.mubr.f32.gmra.mrb[44].mxu1 %v6287_v47 }
 0x13b   : > { %1382 = vmatprep.mubr.f32.mxu1 %v6335_v46  ;;  %5426 = vmatpush3.bf16.msra.mxu1 %v8103_v56  ;;  %v8111_v56 = vld [vmem:[#allocation20_spill] sm:$0xff] }
 0x13c   : > { %5419 = vmatprep.subr.bf16.mxu1 %v8104_v33  ;;  %v8112_v33 = vld [vmem:[#allocation22_spill] sm:$0xff] }
 0x13e   : > { %1384 = vmatmul.mubr.f32.gmra.mrb[46].mxu1 %v6331_v40 }
 0x13f   : > { %1389 = vmatprep.mubr.f32.mxu1 %v6362_v19  ;;  %5427 = vmatpush3.bf16.msra.mxu1 %v8105_v24  ;;  %v8113_v24 = vld [vmem:[#allocation24_spill] sm:$0xff] }
 0x140   : > { %5125 = vmatprep.subr.bf16.mxu1 %v8106_v37 }
 0x142   : > { %1391 = vmatmul.mubr.f32.gmra.mrb[48].mxu1 %v6342_v32 }
 0x143   : > { %1396 = vmatprep.mubr.f32.mxu1 %v6409_v43 }
 0x146   : > { %1398 = vmatmul.mubr.f32.gmra.mrb[50].mxu1 %v6378_v8 }
 0x147   : > { %1403 = vmatprep.mubr.f32.mxu1 %v6422_v2 }
 0x14a   : > { %1405 = vmatmul.mubr.f32.gmra.mrb[52].mxu1 %v6424_v12 }
 0x14b   : > { %1410 = vmatprep.mubr.f32.mxu1 %v6452_v17 }
 0x14e   : > { %1412 = vmatmul.mubr.f32.gmra.mrb[54].mxu1 %v6476_v39  ;;  %v8130_v39 = vld [vmem:[#allocation62_spill] sm:$0xff] }
 0x14f   : > { %1417 = vmatprep.mubr.f32.mxu1 %v6483_v6  ;;  %v8131_v17 = vand.u32 4294901760, %v8130_v39  ;;  %v8136_v39 = vld [vmem:[#allocation54_spill] sm:$0xff] }
 0x152   : > { %1419 = vmatmul.mubr.f32.gmra.mrb[56].mxu1 %v6478_v23  ;;  %v8128_v23 = vld [vmem:[#allocation61_spill] sm:$0xff] }
 0x153   : > { %1424 = vmatprep.mubr.f32.mxu1 %v6514_v21  ;;  %v8129_v6 = vand.u32 4294901760, %v8128_v23 }
 0x156   : > { %1426 = vmatmul.mubr.f32.gmra.mrb[58].mxu1 %v6520_v0  ;;  %v8126_v0 = vld [vmem:[#allocation60_spill] sm:$0xff] }
 0x157   : > { %1431 = vmatprep.mubr.f32.mxu1 %v6529_v62  ;;  %v8127_v21 = vand.u32 4294901760, %v8126_v0  ;;  %v5536_v0 = vmov 0  }
 0x158   : > { %5524 = vset.pattern.permute.xlu1 %v5536_v0  ;;  %5525 = vset.pattern.permute.xlu0 %v5536_v0 }
 0x15a   : > { %1433 = vmatmul.mubr.f32.gmra.mrb[60].mxu1 %v6541_v59  ;;  %v8124_v59 = vld [vmem:[#allocation59_spill] sm:$0xff] }
 0x15b   : > { %1438 = vmatprep.mubr.f32.mxu1 %v6560_v36  ;;  %v8125_v62 = vand.u32 4294901760, %v8124_v59 }
 0x15e   : > { %1440 = vmatmul.mubr.f32.gmra.mrb[62].mxu1 %v6577_v15  ;;  %v8122_v15 = vld [vmem:[#allocation58_spill] sm:$0xff] }
 0x15f   : > { %1647 = vmatprep.mubr.f32.mxu1 %v6405_v26  ;;  %v8123_v36 = vand.u32 4294901760, %v8122_v15  ;;  %v8132_v15 = vld [vmem:[#allocation52_spill] sm:$0xff] }
 0x160   : > { %v8133_v59 = vand.u32 4294901760, %v8132_v15 }
 0x162   : > { %1650 = vmatmul.mubr.f32.vlgmr.msra.gmra.mrb[64].mxu1 %v6369_v27 }
 0x163   : > { %5127 = vmatpush3.bf16.msra.mxu1 %v8107_v57  ;;  %1656 = vmatprep.mubr.f32.mxu1 %v6441_v22 }
 0x164   : > { %5129 = vmatprep.subr.bf16.mxu1 %v8108_v18 }
 0x166   : > { %1659 = vmatmul.mubr.f32.gmra.mrb[66].mxu1 %v6415_v10 }
 0x167   : > { %5131 = vmatpush3.bf16.msra.mxu1 %v8109_v53  ;;  %1665 = vmatprep.mubr.f32.mxu1 %v6466_v34 }
 0x168   : > { %5133 = vmatprep.subr.bf16.mxu1 %v8110_v58 }
 0x16a   : > { %1668 = vmatmul.mubr.f32.gmra.mrb[68].mxu1 %v6445_v30 }
 0x16b   : > { %5135 = vmatpush3.bf16.msra.mxu1 %v8111_v56  ;;  %1674 = vmatprep.mubr.f32.mxu1 %v6474_v44 }
 0x16c   : > { %5137 = vmatprep.subr.bf16.mxu1 %v8112_v33 }
 0x16e   : > { %1677 = vmatmul.mubr.f32.gmra.mrb[70].mxu1 %v6493_v49 }
 0x16f   : > { %5139 = vmatpush3.bf16.msra.mxu1 %v8113_v24  ;;  %1683 = vmatprep.mubr.f32.mxu1 %v6508_v61 }
 0x170   : > { %5141 = vmatprep.subr.bf16.mxu1 %v8114_v52 }
 0x172   : > { %1686 = vmatmul.mubr.f32.gmra.mrb[72].mxu1 %v6497_v1 }
 0x173   : > { %5143 = vmatpush3.bf16.msra.mxu1 %v8115_v14  ;;  %1692 = vmatprep.mubr.f32.mxu1 %v6533_v38 }
 0x174   : > { %5145 = vmatprep.subr.bf16.mxu1 %v8116_v16 }
 0x176   : > { %1695 = vmatmul.mubr.f32.gmra.mrb[74].mxu1 %v6539_v29 }
 0x177   : > { %5147 = vmatpush3.bf16.msra.mxu1 %v8117_v41  ;;  %1701 = vmatprep.mubr.f32.mxu1 %v6546_v48 }
 0x178   : > { %5149 = vmatprep.subr.bf16.mxu1 %v8118_v54 }
 0x17a   : > { %1704 = vmatmul.mubr.f32.gmra.mrb[76].mxu1 %v6567_v31 }
 0x17b   : > { %5151 = vmatpush3.bf16.msra.mxu1 %v8119_v25  ;;  %1710 = vmatprep.mubr.f32.mxu1 %v6571_v5 }
 0x17c   : > { %5153 = vmatprep.subr.bf16.mxu1 %v8120_v50 }
 0x17e   : > { %1713 = vmatmul.mubr.f32.gmra.mrb[78].mxu1 %v6590_v51 }
 0x17f   : > { %5155 = vmatpush3.bf16.msra.mxu1 %v8121_v11  ;;  %1817 = vmatprep.mubr.f32.mxu1 %v8123_v36  ;;  %v8134_v36 = vld [vmem:[#allocation53_spill] sm:$0xff] }
 0x180   : > { %5189 = vmatprep.subr.bf16.mxu1 %v8106_v37  ;;  %v8135_v37 = vand.u32 4294901760, %v8134_v36 }
 0x182   : > { %1821 = vmatmul.mubr.f32.vlgmr.msra.gmra.mrb[80].mxu1 %v8125_v62 }
 0x183   : > { %5191 = vmatpush3.bf16.msra.mxu1 %v8107_v57  ;;  %1828 = vmatprep.mubr.f32.mxu1 %v8127_v21  ;;  %v8138_v57 = vld [vmem:[#allocation47_spill] sm:$0xff] }
 0x184   : > { %5193 = vmatprep.subr.bf16.mxu1 %v8108_v18  ;;  %v8139_v18 = vand.u32 4294901760, %v8138_v57  ;;  %v8152_v57 = vld [vmem:[#allocation12_spill] sm:$0xff] }
 0x186   : > { %1832 = vmatmul.mubr.f32.gmra.mrb[82].mxu1 %v8129_v6 }
 0x187   : > { %1839 = vmatprep.mubr.f32.mxu1 %v8131_v17  ;;  %5195 = vmatpush3.bf16.msra.mxu1 %v8109_v53  ;;  %v8137_v17 = vand.u32 4294901760, %v8136_v39  ;;  %v8150_v39 = vld [vmem:[#allocation57_spill] sm:$0xff] }
 0x188   : > { %5197 = vmatprep.subr.bf16.mxu1 %v8110_v58 }
 0x18a   : > { %1843 = vmatmul.mubr.f32.gmra.mrb[84].mxu1 %v8133_v59  ;;  %v4212_v62 = vpop.f32.mrb[0].mxu0  ;;  %v8143_v59 = vld [vmem:[#allocation9_spill] sm:$0xff] }
 0x18b   : > { %1850 = vmatprep.mubr.f32.mxu1 %v8135_v37  ;;  %5199 = vmatpush3.bf16.msra.mxu1 %v8111_v56  ;;  %v4213_v21 = vpop.f32.mrb[1].mxu0  ;;  %v8140_v56 = vld [vmem:[#allocation10_spill] sm:$0xff] }
 0x18c   : > { %5201 = vmatprep.subr.bf16.mxu1 %v8112_v33  ;;  %v6719_v23 = vadd.f32 %v4213_v21, %v4212_v62  ;;  %2474 = vperm.xlu1 %5524, %v8140_v56   ;;  %v8141_v33 = vld [vmem:[#allocation55_spill] sm:$0xff]  ;;  %v8149_v21 = vld [vmem:[#allocation13_spill] sm:$0xff] }
 0x18d   : > { %v8142_v15 = vand.u32 4294901760, %v8141_v33  ;;  %2478 = vperm.xlu0 %5525, %v8143_v59   ;;  %v8144_v62 = vld [vmem:[#allocation51_spill] sm:$0xff] }
 0x18e   : > { %1854 = vmatmul.mubr.f32.gmra.mrb[86].mxu1 %v8137_v17  ;;  %v4215_v6 = vpop.f32.mrb[2].mxu0  ;;  %v8145_v36 = vand.u32 4294901760, %v8144_v62  ;;  %v8151_v17 = vand.u32 4294901760, %v8150_v39  ;;  %v8155_v33 = vld [vmem:[#allocation15_spill] sm:$0xff] }
 0x18f   : > { %1861 = vmatprep.mubr.f32.mxu1 %v8139_v18  ;;  %5203 = vmatpush3.bf16.msra.mxu1 %v8113_v24  ;;  %v4216_v53 = vpop.f32.mrb[3].mxu0  ;;  %v8146_v24 = vld [vmem:[#allocation11_spill] sm:$0xff] }
 0x190   : > { %5205 = vmatprep.subr.bf16.mxu1 %v8114_v52  ;;  %v6727_v58 = vadd.f32 %v4216_v53, %v4215_v6  ;;  %2482 = vperm.xlu1 %5524, %v8146_v24   ;;  %v8147_v52 = vld [vmem:[#allocation56_spill] sm:$0xff]  ;;  %v8153_v18 = vld [vmem:[#allocation63_spill] sm:$0xff] }
 0x191   : > { %v8148_v37 = vand.u32 4294901760, %v8147_v52  ;;  %2490 = vperm.xlu0 %5525, %v8149_v21   ;;  %v8154_v53 = vand.u32 4294901760, %v8153_v18  ;;  %v8162_v21 = vand.u32 4294901760, %v6405_v26  ;;  %v8167_v18 = vld [vmem:[#allocation42_spill] sm:$0xff] }
 0x192   : > { %1865 = vmatmul.mubr.f32.gmra.mrb[88].mxu1 %v8142_v15  ;;  %v8156_v15 = vld [vmem:[#allocation64_spill] sm:$0xff] }
 0x193   : > { %1872 = vmatprep.mubr.f32.mxu1 %v8145_v36  ;;  %5207 = vmatpush3.bf16.msra.mxu1 %v8115_v14  ;;  %v8157_v59 = vand.u32 4294901760, %v8156_v15  ;;  %v8159_v36 = vld [vmem:[#allocation3_spill] sm:$0xff] }
 0x194   : > { %5209 = vmatprep.subr.bf16.mxu1 %v8116_v16  ;;  %2486 = vperm.xlu1 %5524, %v8152_v57   ;;  %v8160_v24 = vand.u32 4294901760, %v8159_v36  ;;  %v8165_v57 = vld [vmem:[#allocation44_spill] sm:$0xff]  ;;  %v8173_v36 = vld [vmem:[#allocation49_spill] sm:$0xff] }
 0x195   : > { %2498 = vperm.xlu0 %5525, %v8155_v33   ;;  %v8169_v33 = vld [vmem:[#allocation46_spill] sm:$0xff] }
 0x196   : > { %1876 = vmatmul.mubr.f32.gmra.mrb[90].mxu1 %v8148_v37  ;;  %v8161_v37 = vld [vmem:[#allocation40_spill] sm:$0xff] }
 0x197   : > { %1883 = vmatprep.mubr.f32.mxu1 %v8151_v17  ;;  %5211 = vmatpush3.bf16.msra.mxu1 %v8117_v41  ;;  %v4218_v6 = vpop.f32.mrb[4].mxu0  ;;  %v8163_v17 = vld [vmem:[#allocation35_spill] sm:$0xff] }
 0x198   : > { %5213 = vmatprep.subr.bf16.mxu1 %v8118_v54  ;;  %v4219_v0 = vpop.f32.mrb[5].mxu0  ;;  %v8158_v54 = vld [vmem:[#allocation14_spill] sm:$0xff] }
 0x199   : > { %v6746_v16 = vadd.f32 %v4219_v0, %v4218_v6  ;;  %2494 = vperm.xlu1 %5524, %v8158_v54   ;;  %2506 = vperm.xlu0 %5525, %v8161_v37   ;;  %v8164_v6 = vand.u32 4294901760, %v6369_v27  ;;  %v8170_v27 = vand.u32 4294901760, %v6466_v34  ;;  %v8171_v54 = vld [vmem:[#allocation45_spill] sm:$0xff]  ;;  %v8176_v34 = vand.u32 4294901760, %v6493_v49 }
 0x19a   : > { %v4052_v14 = vpop.f32.mrb[0].mxu1  ;;  %1887 = vmatmul.mubr.f32.gmra.mrb[92].mxu1 %v8154_v53  ;;  %v8168_v53 = vand.u32 4294901760, %v6415_v10  ;;  %v8174_v10 = vand.u32 4294901760, %v6474_v44  ;;  %v8179_v44 = vand.u32 4294901760, %v6497_v1  ;;  %v8183_v1 = vand.u32 4294901760, %v6567_v31 }
 0x19b   : > { %v4053_v56 = vpop.f32.mrb[1].mxu1  ;;  %1894 = vmatprep.mubr.f32.mxu1 %v8157_v59  ;;  %5215 = vmatpush3.bf16.msra.mxu1 %v8119_v25 }
 0x19c   : > { %v6754_v41 = vadd.f32 %v4053_v56, %v4052_v14  ;;  %5217 = vmatprep.subr.bf16.mxu1 %v8120_v50  ;;  %v8166_v14 = vand.u32 4294901760, %v6441_v22 }
 0x19d   : > { %2502 = vperm.xlu1 %5524, %v8163_v17   ;;  %2514 = vperm.xlu0 %5525, %v8165_v57   ;;  %v8180_v57 = vand.u32 4294901760, %v6533_v38  ;;  %v8184_v38 = vand.u32 4294901760, %v6571_v5 }
 0x19e   : > { %v4221_v62 = vpop.f32.mrb[6].mxu0  ;;  %1898 = vmatmul.mubr.f32.gmra.mrb[94].mxu1 %v8160_v24  ;;  %v8175_v24 = vld [vmem:[#allocation48_spill] sm:$0xff] }
 0x19f   : > { %v4222_v52 = vpop.f32.mrb[7].mxu0  ;;  %1905 = vmatprep.mubr.f32.mxu1 %v8162_v21  ;;  %5219 = vmatpush3.bf16.msra.mxu1 %v8121_v11 }
 0x1a0   : > { %v6764_v39 = vadd.f32 %v4222_v52, %v4221_v62  ;;  %v4055_v25 = vpop.f32.mrb[2].mxu1  ;;  %v8172_v62 = vand.u32 4294901760, %v6445_v30 }
 0x1a1   : > { %v4056_v50 = vpop.f32.mrb[3].mxu1  ;;  %2510 = vperm.xlu1 %5524, %v8167_v18   ;;  %2522 = vperm.xlu0 %5525, %v8169_v33   ;;  %v8181_v18 = vand.u32 4294901760, %v6539_v29  ;;  %v8185_v29 = vand.u32 4294901760, %v6590_v51 }
 0x1a2   : > { %1909 = vmatmul.mubr.f32.gmra.mrb[96].mxu1 %v8164_v6  ;;  %v6769_v0 = vadd.f32 %v4056_v50, %v4055_v25  ;;  %v8177_v25 = vand.u32 4294901760, %v6508_v61  ;;  %v8178_v6 = vld [vmem:[#allocation50_spill] sm:$0xff] }
 0x1a3   : > { %1916 = vmatprep.mubr.f32.mxu1 %v8166_v14 }
 0x1a4   : > { %v4224_v26 = vpop.f32.mrb[8].mxu0 }
 0x1a5   : > { %v4225_v11 = vpop.f32.mrb[9].mxu0  ;;  %2518 = vperm.xlu1 %5524, %v8171_v54   ;;  %2530 = vperm.xlu0 %5525, %v8173_v36  }
 0x1a6   : > { %1920 = vmatmul.mubr.f32.gmra.mrb[98].mxu1 %v8168_v53  ;;  %v6777_v56 = vadd.f32 %v4225_v11, %v4224_v26  ;;  %v8182_v53 = vand.u32 4294901760, %v6546_v48 }
 0x1a7   : > { %1927 = vmatprep.mubr.f32.mxu1 %v8170_v27 }
 0x1a8   : > { %v4058_v15 = vpop.f32.mrb[4].mxu1 }
 0x1a9   : > { %v4059_v59 = vpop.f32.mrb[5].mxu1  ;;  %2526 = vperm.xlu1 %5524, %v8175_v24  }
 0x1aa   : > { %v6783_v22 = vadd.f32 %v4059_v59, %v4058_v15  ;;  %1931 = vmatmul.mubr.f32.gmra.mrb[100].mxu1 %v8172_v62 }
 0x1ab   : > { %1938 = vmatprep.mubr.f32.mxu1 %v8174_v10 }
 0x1ad   : > { %v4227_v52 = vpop.f32.mrb[10].mxu0  ;;  %2534 = vperm.xlu1 %5524, %v8178_v6  }
 0x1ae   : > { %1942 = vmatmul.mubr.f32.gmra.mrb[102].mxu1 %v8176_v34  ;;  %v4061_v37 = vpop.f32.mrb[6].mxu1  ;;  %v4228_v21 = vpop.f32.mrb[11].mxu0 }
 0x1af   : > { %1949 = vmatprep.mubr.f32.mxu1 %v8177_v25  ;;  %v4062_v17 = vpop.f32.mrb[7].mxu1  ;;  %v6795_v50 = vadd.f32 %v4228_v21, %v4227_v52 }
 0x1b0   : > { %v6797_v30 = vadd.f32 %v4062_v17, %v4061_v37 }
 0x1b2   : > { %1953 = vmatmul.mubr.f32.gmra.mrb[104].mxu1 %v8179_v44 }
 0x1b3   : > { %1960 = vmatprep.mubr.f32.mxu1 %v8180_v57 }
 0x1b4   : > { %v4230_v49 = vpop.f32.mrb[12].mxu0 }
 0x1b5   : > { %v4064_v14 = vpop.f32.mrb[8].mxu1  ;;  %v4231_v26 = vpop.f32.mrb[13].mxu0 }
 0x1b6   : > { %1964 = vmatmul.mubr.f32.gmra.mrb[106].mxu1 %v8181_v18  ;;  %v4065_v61 = vpop.f32.mrb[9].mxu1  ;;  %v6806_v11 = vadd.f32 %v4231_v26, %v4230_v49 }
 0x1b7   : > { %1971 = vmatprep.mubr.f32.mxu1 %v8182_v53  ;;  %v6810_v33 = vadd.f32 %v4065_v61, %v4064_v14 }
 0x1ba   : > { %1975 = vmatmul.mubr.f32.gmra.mrb[108].mxu1 %v8183_v1 }
 0x1bb   : > { %1982 = vmatprep.mubr.f32.mxu1 %v8184_v38 }
 0x1bc   : > { %v4233_v15 = vpop.f32.mrb[14].mxu0 }
 0x1bd   : > { %v4067_v27 = vpop.f32.mrb[10].mxu1  ;;  %v4234_v54 = vpop.f32.mrb[15].mxu0 }
 0x1be   : > { %v4068_v59 = vpop.f32.mrb[11].mxu1  ;;  %1986 = vmatmul.mubr.f32.gmra.mrb[110].mxu1 %v8185_v29  ;;  %v6820_v36 = vadd.f32 %v4234_v54, %v4233_v15 }
 0x1bf   : > { %v6818_v62 = vadd.f32 %v4068_v59, %v4067_v27  ;;  %2361 = vmatprep.mubr.f32.mxu1 %v6148_v35 }
 0x1c0   : > { %v4372_v48 = vpop.f32.mrb[16].mxu0 }
 0x1c1   : > { %v4373_v10 = vpop.f32.mrb[17].mxu0 }
 0x1c2   : > { %2363 = vmatmul.mubr.f32.vlgmr.msra.gmra.mrb[112].mxu1 %v6150_v13  ;;  %v6824_v5 = vadd.f32 %v4373_v10, %v4372_v48 }
 0x1c3   : > { %v4070_v31 = vpop.f32.mrb[12].mxu1  ;;  %2368 = vmatprep.mubr.f32.mxu1 %v6137_v7 }
 0x1c4   : > { %v4071_v24 = vpop.f32.mrb[13].mxu1  ;;  %v4375_v51 = vpop.f32.mrb[18].mxu0 }
 0x1c5   : > { %v6827_v52 = vadd.f32 %v4071_v24, %v4070_v31  ;;  %v4376_v34 = vpop.f32.mrb[19].mxu0 }
 0x1c6   : > { %2370 = vmatmul.mubr.f32.gmra.mrb[114].mxu1 %v6154_v3  ;;  %v6830_v37 = vadd.f32 %v4376_v34, %v4375_v51 }
 0x1c7   : > { %2375 = vmatprep.mubr.f32.mxu1 %v6159_v63 }
 0x1c8   : > { %v4378_v35 = vpop.f32.mrb[20].mxu0 }
 0x1c9   : > { %v4073_v21 = vpop.f32.mrb[14].mxu1  ;;  %v4379_v25 = vpop.f32.mrb[21].mxu0 }
 0x1ca   : > { %2377 = vmatmul.mubr.f32.gmra.mrb[116].mxu1 %v6169_v20  ;;  %v4074_v13 = vpop.f32.mrb[15].mxu1  ;;  %v6834_v17 = vadd.f32 %v4379_v25, %v4378_v35 }
 0x1cb   : > { %2382 = vmatprep.mubr.f32.mxu1 %v6204_v45  ;;  %v6837_v7 = vadd.f32 %v4074_v13, %v4073_v21 }
 0x1cc   : > { %v4381_v6 = vpop.f32.mrb[22].mxu0 }
 0x1cd   : > { %v4382_v44 = vpop.f32.mrb[23].mxu0 }
 0x1ce   : > { %2384 = vmatmul.mubr.f32.gmra.mrb[118].mxu1 %v6207_v55  ;;  %v6840_v3 = vadd.f32 %v4382_v44, %v4381_v6  ;;  %v8186_v6 = vld [vmem:[#allocation65_spill] sm:$0xff] }
 0x1cf   : > { %2389 = vmatprep.mubr.f32.mxu1 %v6219_v4 }
 0x1d0   : > { %v4384_v57 = vpop.f32.mrb[24].mxu0 }
 0x1d1   : > { %v4076_v63 = vpop.f32.mrb[16].mxu1  ;;  %v4385_v14 = vpop.f32.mrb[25].mxu0 }
 0x1d2   : > { %v4077_v49 = vpop.f32.mrb[17].mxu1  ;;  %2391 = vmatmul.mubr.f32.gmra.mrb[120].mxu1 %v6222_v60  ;;  %v6846_v26 = vadd.f32 %v4385_v14, %v4384_v57 }
 0x1d3   : > { %v6844_v20 = vadd.f32 %v4077_v49, %v4076_v63  ;;  %2396 = vmatprep.mubr.f32.mxu1 %v6230_v9  ;;  %v8187_v49 = vld [vmem:[#allocation66_spill] sm:$0xff] }
 0x1d4   : > { %v4387_v45 = vpop.f32.mrb[26].mxu0 }
 0x1d5   : > { %v4388_v18 = vpop.f32.mrb[27].mxu0 }
 0x1d6   : > { %2398 = vmatmul.mubr.f32.gmra.mrb[122].mxu1 %v6256_v42  ;;  %v6850_v55 = vadd.f32 %v4388_v18, %v4387_v45  ;;  %v8188_v45 = vld [vmem:[#allocation68_spill] sm:$0xff] }
 0x1d7   : > { %2403 = vmatprep.mubr.f32.mxu1 %v6323_v28  ;;  %v4079_v4 = vpop.f32.mrb[18].mxu1 }
 0x1d8   : > { %v4080_v61 = vpop.f32.mrb[19].mxu1  ;;  %v4390_v53 = vpop.f32.mrb[28].mxu0 }
 0x1d9   : > { %v6853_v1 = vadd.f32 %v4080_v61, %v4079_v4  ;;  %v4391_v60 = vpop.f32.mrb[29].mxu0 }
 0x1da   : > { %2405 = vmatmul.mubr.f32.gmra.mrb[124].mxu1 %v6287_v47  ;;  %v6856_v38 = vadd.f32 %v4391_v60, %v4390_v53  ;;  %v8189_v53 = vld [vmem:[#allocation67_spill] sm:$0xff] }
 0x1db   : > { %2410 = vmatprep.mubr.f32.mxu1 %v6335_v46 }
 0x1dc   : > { %v4393_v9 = vpop.f32.mrb[30].mxu0 }
 0x1dd   : > { %v4082_v27 = vpop.f32.mrb[20].mxu1  ;;  %v4394_v15 = vpop.f32.mrb[31].mxu0 }
 0x1de   : > { %v4083_v42 = vpop.f32.mrb[21].mxu1  ;;  %2412 = vmatmul.mubr.f32.gmra.mrb[126].mxu1 %v6331_v40  ;;  %v6860_v59 = vadd.f32 %v4394_v15, %v4393_v9 }
 0x1df   : > { %v6862_v28 = vadd.f32 %v4083_v42, %v4082_v27  ;;  %2417 = vmatprep.mubr.f32.mxu1 %v6362_v19  ;;  %v8190_v27 = vld [vmem:[#allocation69_spill] sm:$0xff] }
 0x1e0   : > { %v4396_v54 = vpop.f32.mrb[32].mxu0 }
 0x1e1   : > { %v4085_v29 = vpop.f32.mrb[22].mxu1  ;;  %v4397_v48 = vpop.f32.mrb[33].mxu0 }
 0x1e2   : > { %v4086_v47 = vpop.f32.mrb[23].mxu1  ;;  %2419 = vmatmul.mubr.f32.gmra.mrb[128].mxu1 %v6342_v32  ;;  %v6866_v10 = vadd.f32 %v4397_v48, %v4396_v54  ;;  %v8191_v48 = vld [vmem:[#allocation70_spill] sm:$0xff] }
 0x1e3   : > { %v6868_v46 = vadd.f32 %v4086_v47, %v4085_v29  ;;  %2424 = vmatprep.mubr.f32.mxu1 %v6409_v43 }
 0x1e4   : > { %v4399_v31 = vpop.f32.mrb[34].mxu0 }
 0x1e5   : > { %v4088_v40 = vpop.f32.mrb[24].mxu1  ;;  %v4400_v24 = vpop.f32.mrb[35].mxu0 }
 0x1e6   : > { %v4089_v51 = vpop.f32.mrb[25].mxu1  ;;  %2426 = vmatmul.mubr.f32.gmra.mrb[130].mxu1 %v6378_v8  ;;  %v6872_v34 = vadd.f32 %v4400_v24, %v4399_v31 }
 0x1e7   : > { %v6874_v19 = vadd.f32 %v4089_v51, %v4088_v40  ;;  %2431 = vmatprep.mubr.f32.mxu1 %v6422_v2  ;;  %v8192_v40 = vld [vmem:[#allocation71_spill] sm:$0xff] }
 0x1e8   : > { %v4402_v35 = vpop.f32.mrb[36].mxu0 }
 0x1e9   : > { %v4091_v32 = vpop.f32.mrb[26].mxu1  ;;  %v4403_v21 = vpop.f32.mrb[37].mxu0 }
 0x1ea   : > { %v4092_v25 = vpop.f32.mrb[27].mxu1  ;;  %2433 = vmatmul.mubr.f32.gmra.mrb[132].mxu1 %v6424_v12  ;;  %v6878_v13 = vadd.f32 %v4403_v21, %v4402_v35 }
 0x1eb   : > { %v6880_v43 = vadd.f32 %v4092_v25, %v4091_v32  ;;  %2438 = vmatprep.mubr.f32.mxu1 %v8186_v6  ;;  %v8193_v25 = vld [vmem:[#allocation72_spill] sm:$0xff] }
 0x1ec   : > { %v4405_v44 = vpop.f32.mrb[38].mxu0 }
 0x1ed   : > { %v4094_v8 = vpop.f32.mrb[28].mxu1  ;;  %v4406_v63 = vpop.f32.mrb[39].mxu0 }
 0x1ee   : > { %v4095_v57 = vpop.f32.mrb[29].mxu1  ;;  %2440 = vmatmul.mubr.f32.gmra.mrb[134].mxu1 %v8187_v49  ;;  %v6884_v14 = vadd.f32 %v4406_v63, %v4405_v44 }
 0x1ef   : > { %v6886_v2 = vadd.f32 %v4095_v57, %v4094_v8  ;;  %2445 = vmatprep.mubr.f32.mxu1 %v8188_v45  ;;  %v8194_v8 = vld [vmem:[#allocation73_spill] sm:$0xff] }
 0x1f0   : > { %v4408_v18 = vpop.f32.mrb[40].mxu0 }
 0x1f1   : > { %v4097_v12 = vpop.f32.mrb[30].mxu1  ;;  %v4409_v4 = vpop.f32.mrb[41].mxu0 }
 0x1f2   : > { %v4098_v61 = vpop.f32.mrb[31].mxu1  ;;  %2447 = vmatmul.mubr.f32.gmra.mrb[136].mxu1 %v8189_v53  ;;  %v6890_v60 = vadd.f32 %v4409_v4, %v4408_v18 }
 0x1f3   : > { %v6892_v9 = vadd.f32 %v4098_v61, %v4097_v12  ;;  %2452 = vmatprep.mubr.f32.mxu1 %v8190_v27 }
 0x1f4   : > { %v4411_v15 = vpop.f32.mrb[42].mxu0 }
 0x1f5   : > { %v4132_v42 = vpop.f32.mrb[32].mxu1  ;;  %v4412_v54 = vpop.f32.mrb[43].mxu0 }
 0x1f6   : > { %v4133_v29 = vpop.f32.mrb[33].mxu1  ;;  %2454 = vmatmul.mubr.f32.gmra.mrb[138].mxu1 %v8191_v48  ;;  %v6896_v47 = vadd.f32 %v4412_v54, %v4411_v15 }
 0x1f7   : > { %v4134_v31 = vadd.f32 %v4133_v29, %v4132_v42  ;;  %2459 = vmatprep.mubr.f32.mxu1 %v8192_v40 }
 0x1f8   : > { %v4414_v24 = vpop.f32.mrb[44].mxu0 }
 0x1f9   : > { %v1337_v51 = vadd.f32 %v4134_v31, %v6754_v41  ;;  %v4135_v35 = vpop.f32.mrb[34].mxu1  ;;  %v4415_v32 = vpop.f32.mrb[45].mxu0  ;;  %v8195_v41 = vld [vmem:[#allocation74_spill] sm:$0xff] }
 0x1fa   : > { %v4136_v21 = vpop.f32.mrb[35].mxu1  ;;  %2461 = vmatmul.mubr.f32.gmra.mrb[140].mxu1 %v8193_v25  ;;  %v6901_v6 = vadd.f32 %v4415_v32, %v4414_v24 }
 0x1fb   : > { %v4137_v44 = vadd.f32 %v4136_v21, %v4135_v35  ;;  %2466 = vmatprep.mubr.f32.mxu1 %v8194_v8  ;;  %v6905_v63 = vadd.f32 %v6719_v23, %v1337_v51  ;;  %v6949_v8 = vld [vmem:[%s7805_s3 + $0x10] sm:$0xff] }
 0x1fc   : > { %v4417_v57 = vpop.f32.mrb[46].mxu0 }
 0x1fd   : > { %v1344_v49 = vadd.f32 %v4137_v44, %v6769_v0  ;;  %v4138_v45 = vpop.f32.mrb[36].mxu1  ;;  %v4418_v18 = vpop.f32.mrb[47].mxu0 }
 0x1fe   : > { %v4139_v12 = vpop.f32.mrb[37].mxu1  ;;  %2468 = vmatmul.mubr.f32.gmra.mrb[142].mxu1 %v8195_v41  ;;  %v6909_v4 = vadd.f32 %v4418_v18, %v4417_v57 }
 0x1ff   : > { %v4140_v61 = vadd.f32 %v4139_v12, %v4138_v45  ;;  %v6912_v53 = vadd.f32 %v6727_v58, %v1344_v49 }
 0x200   : > { %8196 = vst [vmem:[#allocation5_spill] sm:$0xff] %v6909_v4 }
 0x201   : > { %v1351_v27 = vadd.f32 %v4140_v61, %v6783_v22  ;;  %v4141_v15 = vpop.f32.mrb[38].mxu1  ;;  %v6926_v22 = vld [vmem:[%s7805_s3] sm:$0xff] }
 0x202   : > { %v4142_v42 = vpop.f32.mrb[39].mxu1  ;;  %v7942_v51 = vand.u32 4294901760, %v6926_v22 }
 0x203   : > { %v4143_v23 = vadd.f32 %v4142_v42, %v4141_v15  ;;  %v6916_v54 = vadd.f32 %v6746_v16, %v1351_v27  ;;  %v6931_v16 = vld [vmem:[%s7805_s3 + $0x8] sm:$0xff] }
 0x204   : > { %v7941_v35 = vand.u32 4294901760, %v6931_v16  ;;  %v6977_v27 = vld [vmem:[%s7805_s3 + $0x28] sm:$0xff] }
 0x205   : > { %v1358_v0 = vadd.f32 %v4143_v23, %v6797_v30  ;;  %v4144_v29 = vpop.f32.mrb[40].mxu1  ;;  %v7933_v23 = vand.u32 4294901760, %v6977_v27 }
 0x206   : > { %v4145_v48 = vpop.f32.mrb[41].mxu1 }
 0x207   : > { %v4146_v31 = vadd.f32 %v4145_v48, %v4144_v29  ;;  %v6920_v40 = vadd.f32 %v6764_v39, %v1358_v0 }
 0x209   : > { %v1365_v24 = vadd.f32 %v4146_v31, %v6810_v33  ;;  %v4147_v58 = vpop.f32.mrb[42].mxu1  ;;  %v6942_v33 = vpack.c.bf16 %v7941_v35, %v7942_v51 }
 0x20a   : > { %v4148_v30 = vpop.f32.mrb[43].mxu1 }
 0x20b   : > { %v4149_v39 = vadd.f32 %v4148_v30, %v4147_v58  ;;  %v6936_v32 = vadd.f32 %v6777_v56, %v1365_v24  ;;  %8197 = vst [vmem:[#allocation6_spill] sm:$0xff] %v6942_v33  ;;  %5221 = vmatprep.subr.bf16.mxu0 %v6942_v33  ;;  %v6954_v56 = vld [vmem:[%s7805_s3 + $0x18] sm:$0xff] }
 0x20c   : > { %5223 = vmatpush3.bf16.msra.mxu0 %v6942_v33  ;;  %v7937_v45 = vand.u32 4294901760, %v6954_v56  ;;  %v7001_v24 = vld [vmem:[%s7805_s3 + $0x38] sm:$0xff] }
 0x20d   : > { %v1372_v21 = vadd.f32 %v4149_v39, %v6818_v62  ;;  %v4150_v25 = vpop.f32.mrb[44].mxu1  ;;  %v7938_v62 = vand.u32 4294901760, %v6949_v8  ;;  %v7931_v39 = vand.u32 4294901760, %v7001_v24 }
 0x20e   : > { %v4151_v44 = vpop.f32.mrb[45].mxu1 }
 0x20f   : > { %v4152_v57 = vadd.f32 %v4151_v44, %v4150_v25  ;;  %v6957_v49 = vadd.f32 %v6795_v50, %v1372_v21  ;;  %v6967_v41 = vpack.c.bf16 %v7937_v45, %v7938_v62  ;;  %v6972_v50 = vld [vmem:[%s7805_s3 + $0x20] sm:$0xff] }
 0x210   : > { %v7936_v42 = vand.u32 4294901760, %v6972_v50 }
 0x211   : > { %v1379_v18 = vadd.f32 %v4152_v57, %v6827_v52  ;;  %v4153_v12 = vpop.f32.mrb[46].mxu1  ;;  %8198 = vst [vmem:[#allocation8_spill] sm:$0xff] %v6967_v41  ;;  %5225 = vmatprep.subr.bf16.mxu0 %v6967_v41  ;;  %v7022_v57 = vld [vmem:[%s7805_s3 + $0x40] sm:$0xff] }
 0x212   : > { %v4154_v61 = vpop.f32.mrb[47].mxu1  ;;  %5227 = vmatpush3.bf16.msra.mxu0 %v6967_v41  ;;  %v6991_v48 = vpack.c.bf16 %v7933_v23, %v7936_v42 }
 0x213   : > { %v4155_v15 = vadd.f32 %v4154_v61, %v4153_v12  ;;  %v6980_v52 = vadd.f32 %v6806_v11, %v1379_v18  ;;  %v6996_v11 = vld [vmem:[%s7805_s3 + $0x30] sm:$0xff]  ;;  %v7027_v18 = vld [vmem:[%s7805_s3 + $0x48] sm:$0xff]  ;;  %v7930_v12 = vand.u32 4294901760, %v7022_v57 }
 0x214   : > { %8199 = vst [vmem:[#allocation17_spill] sm:$0xff] %v6991_v48  ;;  %5229 = vmatprep.subr.bf16.mxu0 %v6991_v48  ;;  %v7932_v30 = vand.u32 4294901760, %v6996_v11  ;;  %v7929_v61 = vand.u32 4294901760, %v7027_v18 }
 0x215   : > { %v1386_v0 = vadd.f32 %v4155_v15, %v6837_v7  ;;  %v4156_v29 = vpop.f32.mrb[48].mxu1 }
 0x216   : > { %v4157_v31 = vpop.f32.mrb[49].mxu1  ;;  %5231 = vmatpush3.bf16.msra.mxu0 %v6991_v48  ;;  %v7017_v44 = vpack.c.bf16 %v7931_v39, %v7932_v30 }
 0x217   : > { %v4158_v58 = vadd.f32 %v4157_v31, %v4156_v29  ;;  %v7004_v7 = vadd.f32 %v6820_v36, %v1386_v0  ;;  %v7038_v29 = vpack.c.bf16 %v7929_v61, %v7930_v12 }
 0x218   : > { %8200 = vst [vmem:[#allocation19_spill] sm:$0xff] %v7017_v44  ;;  %5233 = vmatprep.subr.bf16.mxu0 %v7017_v44 }
 0x219   : > { %v7011_v21 = vadd.f32 %v4158_v58, %v6844_v20  ;;  %v4159_v25 = vpop.f32.mrb[50].mxu1  ;;  %8201 = vst [vmem:[#allocation21_spill] sm:$0xff] %v7038_v29  ;;  %v7043_v58 = vld [vmem:[%s7805_s3 + $0x50] sm:$0xff] }
 0x21a   : > { %v4160_v36 = vpop.f32.mrb[51].mxu1  ;;  %5235 = vmatpush3.bf16.msra.mxu0 %v7017_v44 }
 0x21b   : > { %v4161_v20 = vadd.f32 %v4160_v36, %v4159_v25  ;;  %v7048_v25 = vld [vmem:[%s7805_s3 + $0x58] sm:$0xff]  ;;  %5237 = vmatprep.subr.bf16.mxu0 %v7038_v29 }
 0x21d   : > { %v1400_v15 = vadd.f32 %v4161_v20, %v6853_v1  ;;  %v4162_v0 = vpop.f32.mrb[52].mxu1  ;;  %v7935_v1 = vand.u32 4294901760, %v7043_v58  ;;  %v7934_v20 = vand.u32 4294901760, %v7048_v25 }
 0x21e   : > { %v4163_v31 = vpop.f32.mrb[53].mxu1  ;;  %5239 = vmatpush3.bf16.msra.mxu0 %v7038_v29 }
 0x21f   : > { %v4164_v36 = vadd.f32 %v4163_v31, %v4162_v0  ;;  %v7059_v30 = vpack.c.bf16 %v7934_v20, %v7935_v1  ;;  %v7064_v0 = vld [vmem:[%s7805_s3 + $0x60] sm:$0xff]  ;;  %v7069_v31 = vld [vmem:[%s7805_s3 + $0x68] sm:$0xff] }
 0x221   : > { %v1407_v61 = vadd.f32 %v4164_v36, %v6862_v28  ;;  %v4165_v12 = vpop.f32.mrb[54].mxu1  ;;  %8202 = vst [vmem:[#allocation23_spill] sm:$0xff] %v7059_v30  ;;  %v7940_v28 = vand.u32 4294901760, %v7064_v0  ;;  %v7939_v36 = vand.u32 4294901760, %v7069_v31  ;;  %5241 = vmatprep.subr.bf16.mxu0 %v7059_v30 }
 0x222   : > { %v4166_v39 = vpop.f32.mrb[55].mxu1  ;;  %5243 = vmatpush3.bf16.msra.mxu0 %v7059_v30 }
 0x223   : > { %v4167_v23 = vadd.f32 %v4166_v39, %v4165_v12  ;;  %v7080_v42 = vpack.c.bf16 %v7939_v36, %v7940_v28  ;;  %v7085_v39 = vld [vmem:[%s7805_s3 + $0x70] sm:$0xff]  ;;  %v7090_v12 = vld [vmem:[%s7805_s3 + $0x78] sm:$0xff] }
 0x224   : > { %v7955_v62 = vand.u32 4294901760, %v7090_v12 }
 0x225   : > { %v1414_v20 = vadd.f32 %v4167_v23, %v6868_v46  ;;  %v4168_v1 = vpop.f32.mrb[56].mxu1  ;;  %8203 = vst [vmem:[#allocation25_spill] sm:$0xff] %v7080_v42  ;;  %5245 = vmatprep.subr.bf16.mxu0 %v7080_v42  ;;  %v7956_v23 = vand.u32 4294901760, %v7085_v39 }
 0x226   : > { %v4169_v45 = vpop.f32.mrb[57].mxu1  ;;  %5247 = vmatpush3.bf16.msra.mxu0 %v7080_v42 }
 0x227   : > { %v4170_v46 = vadd.f32 %v4169_v45, %v4168_v1  ;;  %v7101_v51 = vpack.c.bf16 %v7955_v62, %v7956_v23 }
 0x229   : > { %v1421_v36 = vadd.f32 %v4170_v46, %v6874_v19  ;;  %v4171_v28 = vpop.f32.mrb[58].mxu1  ;;  %8204 = vst [vmem:[#allocation28_spill] sm:$0xff] %v7101_v51  ;;  %5249 = vmatprep.subr.bf16.mxu0 %v7101_v51 }
 0x22a   : > { %v4172_v35 = vpop.f32.mrb[59].mxu1  ;;  %5251 = vmatpush3.bf16.msra.mxu0 %v7101_v51 }
 0x22b   : > { %v4173_v30 = vadd.f32 %v4172_v35, %v4171_v28 }
 0x22d   : > { %v1428_v45 = vadd.f32 %v4173_v30, %v6880_v43  ;;  %v4174_v1 = vpop.f32.mrb[60].mxu1 }
 0x22e   : > { %v4175_v29 = vpop.f32.mrb[61].mxu1 }
 0x22f   : > { %v4176_v19 = vadd.f32 %v4175_v29, %v4174_v1 }
 0x231   : > { %v7107_v46 = vadd.f32 %v4176_v19, %v6886_v2  ;;  %v4177_v42 = vpop.f32.mrb[62].mxu1 }
 0x232   : > { %v4178_v44 = vpop.f32.mrb[63].mxu1 }
 0x233   : > { %v4179_v48 = vadd.f32 %v4178_v44, %v4177_v42 }
 0x235   : > { %v7110_v41 = vadd.f32 %v4179_v48, %v6892_v9  ;;  %v4236_v62 = vpop.f32.mrb[64].mxu1  ;;  %v8205_v9 = vand.u32 4294901760, %v6926_v22 }
 0x236   : > { %v4237_v35 = vpop.f32.mrb[65].mxu1 }
 0x237   : > { %v4238_v28 = vadd.f32 %v4237_v35, %v4236_v62  ;;  %v7122_v48 = vsub.f32 %v6926_v22, %v8205_v9  ;;  %v8206_v62 = vand.u32 4294901760, %v6931_v16 }
 0x239   : > { %v7113_v23 = vadd.f32 %v4238_v28, %v7011_v21  ;;  %v4239_v43 = vpop.f32.mrb[66].mxu1  ;;  %v7127_v21 = vsub.f32 %v6931_v16, %v8206_v62  ;;  %v8207_v16 = vand.u32 4294901760, %v6949_v8 }
 0x23a   : > { %v4240_v30 = vpop.f32.mrb[67].mxu1 }
 0x23b   : > { %v4241_v51 = vadd.f32 %v4240_v30, %v4239_v43  ;;  %v7142_v30 = vsub.f32 %v6949_v8, %v8207_v16  ;;  %v8210_v16 = vand.u32 4294901760, %v6972_v50 }
 0x23d   : > { %v7115_v33 = vadd.f32 %v4241_v51, %v1400_v15  ;;  %v4242_v29 = vpop.f32.mrb[68].mxu1  ;;  %v7962_v51 = vand.u32 4294901760, %v7122_v48  ;;  %v7961_v15 = vand.u32 4294901760, %v7127_v21  ;;  %v7964_v62 = vand.u32 4294901760, %v7142_v30 }
 0x23e   : > { %v4243_v2 = vpop.f32.mrb[69].mxu1 }
 0x23f   : > { %v4244_v1 = vadd.f32 %v4243_v2, %v4242_v29  ;;  %v2878_v43 = vsub.f32 %v7122_v48, %v7962_v51  ;;  %v2885_v22 = vsub.f32 %v7127_v21, %v7961_v15  ;;  %v8208_v2 = vand.u32 4294901760, %v6954_v56 }
 0x240   : > { %v2892_v8 = vsub.f32 %v7142_v30, %v7964_v62  ;;  %v8212_v62 = vand.u32 4294901760, %v6996_v11 }
 0x241   : > { %v7117_v19 = vadd.f32 %v4244_v1, %v1407_v61  ;;  %v4245_v42 = vpop.f32.mrb[70].mxu1  ;;  %v2886_v9 = vand.u32 4294901760, %v2885_v22 }
 0x242   : > { %v4246_v44 = vpop.f32.mrb[71].mxu1 }
 0x243   : > { %v4247_v35 = vadd.f32 %v4246_v44, %v4245_v42  ;;  %v2879_v42 = vand.u32 4294901760, %v2878_v43 }
 0x245   : > { %v7131_v28 = vadd.f32 %v4247_v35, %v1414_v20  ;;  %v4248_v61 = vpop.f32.mrb[72].mxu1  ;;  %v7147_v20 = vsub.f32 %v6954_v56, %v8208_v2  ;;  %v7153_v51 = vpack.c.bf16 %v2886_v9, %v2879_v42  ;;  %v7161_v56 = vsub.f32 %v6972_v50, %v8210_v16 }
 0x246   : > { %v4249_v29 = vpop.f32.mrb[73].mxu1  ;;  %v2893_v2 = vand.u32 4294901760, %v2892_v8 }
 0x247   : > { %v4250_v1 = vadd.f32 %v4249_v29, %v4248_v61  ;;  %v7963_v44 = vand.u32 4294901760, %v7147_v20  ;;  %8209 = vst [vmem:[#allocation30_spill] sm:$0xff] %v7153_v51  ;;  %5253 = vmatprep.subr.bf16.mxu0 %v7153_v51 }
 0x249   : > { %v7151_v35 = vadd.f32 %v4250_v1, %v1421_v36  ;;  %v4251_v15 = vpop.f32.mrb[74].mxu1  ;;  %v2899_v43 = vsub.f32 %v7147_v20, %v7963_v44  ;;  %v8211_v36 = vand.u32 4294901760, %v6977_v27  ;;  %v7965_v1 = vand.u32 4294901760, %v7161_v56 }
 0x24a   : > { %v4252_v61 = vpop.f32.mrb[75].mxu1 }
 0x24b   : > { %v7169_v22 = vsub.f32 %v6977_v27, %v8211_v36  ;;  %v4253_v29 = vadd.f32 %v4252_v61, %v4251_v15  ;;  %v2900_v42 = vand.u32 4294901760, %v2899_v43  ;;  %v2906_v44 = vsub.f32 %v7161_v56, %v7965_v1 }
 0x24c   : > { %v7182_v27 = vsub.f32 %v6996_v11, %v8212_v62  ;;  %v8213_v15 = vand.u32 4294901760, %v7001_v24 }
 0x24d   : > { %v7968_v50 = vand.u32 4294901760, %v7169_v22  ;;  %v7174_v9 = vadd.f32 %v4253_v29, %v1428_v45  ;;  %v4254_v16 = vpop.f32.mrb[76].mxu1  ;;  %v7189_v43 = vpack.c.bf16 %v2900_v42, %v2893_v2  ;;  %v2907_v29 = vand.u32 4294901760, %v2906_v44 }
 0x24e   : > { %v7187_v8 = vsub.f32 %v7001_v24, %v8213_v15  ;;  %v4255_v61 = vpop.f32.mrb[77].mxu1  ;;  %v7967_v1 = vand.u32 4294901760, %v7182_v27  ;;  %v8216_v42 = vand.u32 4294901760, %v7022_v57 }
 0x24f   : > { %8215 = vst [vmem:[#allocation33_spill] sm:$0xff] %v7189_v43  ;;  %v2913_v45 = vsub.f32 %v7169_v22, %v7968_v50  ;;  %v4256_v36 = vadd.f32 %v4255_v61, %v4254_v16 }
 0x250   : > { %8214 = vst [vmem:[#allocation31_spill] sm:$0xff] %v7187_v8  ;;  %v7969_v51 = vand.u32 4294901760, %v7187_v8  ;;  %v2920_v24 = vsub.f32 %v7182_v27, %v7967_v1  ;;  %v7208_v44 = vsub.f32 %v7022_v57, %v8216_v42 }
 0x251   : > { %v2914_v11 = vand.u32 4294901760, %v2913_v45  ;;  %v7197_v62 = vadd.f32 %v4256_v36, %v7107_v46  ;;  %v4257_v4 = vpop.f32.mrb[78].mxu1  ;;  %v8218_v46 = vand.u32 4294901760, %v7027_v18 }
 0x252   : > { %v2927_v2 = vsub.f32 %v7187_v8, %v7969_v51  ;;  %8217 = vst [vmem:[#allocation36_spill] sm:$0xff] %v7208_v44  ;;  %v4258_v16 = vpop.f32.mrb[79].mxu1  ;;  %v2921_v36 = vand.u32 4294901760, %v2920_v24  ;;  %v7971_v50 = vand.u32 4294901760, %v7208_v44 }
 0x253   : > { %v7210_v15 = vpack.c.bf16 %v2914_v11, %v2907_v29  ;;  %v7215_v61 = vsub.f32 %v7027_v18, %v8218_v46  ;;  %v4259_v45 = vadd.f32 %v4258_v16, %v4257_v4  ;;  %v8221_v18 = vand.u32 4294901760, %v7043_v58 }
 0x254   : > { %v2928_v1 = vand.u32 4294901760, %v2927_v2  ;;  %v2934_v29 = vsub.f32 %v7208_v44, %v7971_v50 }
 0x255   : > { %8219 = vst [vmem:[#allocation37_spill] sm:$0xff] %v7215_v61  ;;  %v7972_v51 = vand.u32 4294901760, %v7215_v61  ;;  %v7220_v43 = vadd.f32 %v4259_v45, %v7110_v41  ;;  %v4292_v57 = vpop.f32.mrb[80].mxu1  ;;  %v7230_v4 = vsub.f32 %v7043_v58, %v8221_v18  ;;  %v8223_v41 = vand.u32 4294901760, %v7048_v25 }
 0x256   : > { %v7222_v42 = vpack.c.bf16 %v2928_v1, %v2921_v36  ;;  %v4293_v11 = vpop.f32.mrb[81].mxu1  ;;  %v2935_v16 = vand.u32 4294901760, %v2934_v29 }
 0x257   : > { %8222 = vst [vmem:[#allocation2_spill] sm:$0xff] %v7230_v4  ;;  %v2941_v24 = vsub.f32 %v7215_v61, %v7972_v51  ;;  %v7238_v2 = vsub.f32 %v7048_v25, %v8223_v41  ;;  %v4294_v1 = vadd.f32 %v4293_v11, %v4292_v57  ;;  %v7974_v46 = vand.u32 4294901760, %v7230_v4 }
 0x258   : > { %8220 = vst [vmem:[#allocation41_spill] sm:$0xff] %v7222_v42  ;;  %v8225_v51 = vand.u32 4294901760, %v7064_v0  ;;  %v8227_v25 = vand.u32 4294901760, %v7069_v31 }
 0x259   : > { %8224 = vst [vmem:[#allocation4_spill] sm:$0xff] %v7238_v2  ;;  %v2942_v45 = vand.u32 4294901760, %v2941_v24  ;;  %v7976_v36 = vand.u32 4294901760, %v7238_v2  ;;  %v1823_v58 = vadd.f32 %v4294_v1, %v6905_v63  ;;  %v4295_v18 = vpop.f32.mrb[82].mxu1  ;;  %v2948_v50 = vsub.f32 %v7230_v4, %v7974_v46 }
 0x25a   : > { %v7249_v42 = vsub.f32 %v7064_v0, %v8225_v51  ;;  %v7254_v57 = vsub.f32 %v7069_v31, %v8227_v25  ;;  %v4296_v29 = vpop.f32.mrb[83].mxu1 }
 0x25b   : > { %v7256_v11 = vpack.c.bf16 %v2942_v45, %v2935_v16  ;;  %v2955_v63 = vsub.f32 %v7238_v2, %v7976_v36  ;;  %v4297_v24 = vadd.f32 %v4296_v29, %v4295_v18  ;;  %v7262_v41 = vadd.f32 %v6824_v5, %v1823_v58 }
 0x25c   : > { %8226 = vst [vmem:[#allocation7_spill] sm:$0xff] %v7249_v42  ;;  %8228 = vst [vmem:[#allocation16_spill] sm:$0xff] %v7254_v57  ;;  %v2949_v1 = vand.u32 4294901760, %v2948_v50  ;;  %v7975_v0 = vand.u32 4294901760, %v7249_v42  ;;  %v7979_v46 = vand.u32 4294901760, %v7254_v57  ;;  %v8229_v45 = vand.u32 4294901760, %v7085_v39 }
 0x25d   : > { %v2956_v51 = vand.u32 4294901760, %v2955_v63  ;;  %v1834_v31 = vadd.f32 %v4297_v24, %v6912_v53  ;;  %v4298_v25 = vpop.f32.mrb[84].mxu1  ;;  %v8231_v5 = vand.u32 4294901760, %v7090_v12 }
 0x25e   : > { %v2962_v16 = vsub.f32 %v7249_v42, %v7975_v0  ;;  %v7273_v18 = vsub.f32 %v7085_v39, %v8229_v45  ;;  %v4299_v58 = vpop.f32.mrb[85].mxu1  ;;  %v2969_v53 = vsub.f32 %v7254_v57, %v7979_v46 }
 0x25f   : > { %v7278_v50 = vsub.f32 %v7090_v12, %v8231_v5  ;;  %v7280_v29 = vpack.c.bf16 %v2956_v51, %v2949_v1  ;;  %v4300_v63 = vadd.f32 %v4299_v58, %v4298_v25  ;;  %v7286_v24 = vadd.f32 %v6830_v37, %v1834_v31 }
 0x260   : > { %8230 = vst [vmem:[#allocation18_spill] sm:$0xff] %v7273_v18  ;;  %v2963_v0 = vand.u32 4294901760, %v2962_v16  ;;  %v7978_v39 = vand.u32 4294901760, %v7273_v18  ;;  %v2970_v45 = vand.u32 4294901760, %v2969_v53 }
 0x261   : > { %8232 = vst [vmem:[#allocation20_spill] sm:$0xff] %v7278_v50  ;;  %8233 = vst [vmem:[#allocation22_spill] sm:$0xff] %v7280_v29  ;;  %v7980_v36 = vand.u32 4294901760, %v7278_v50  ;;  %v1845_v12 = vadd.f32 %v4300_v63, %v6916_v54  ;;  %v4301_v5 = vpop.f32.mrb[86].mxu1  ;;  %v7304_v54 = vpack.c.bf16 %v7127_v21, %v7122_v48 }
 0x262   : > { %v2976_v1 = vsub.f32 %v7273_v18, %v7978_v39  ;;  %v4302_v51 = vpop.f32.mrb[87].mxu1  ;;  %v7294_v29 = vpack.c.bf16 %v2970_v45, %v2963_v0 }
 0x263   : > { %v2983_v37 = vsub.f32 %v7278_v50, %v7980_v36  ;;  %v4303_v31 = vadd.f32 %v4302_v51, %v4301_v5  ;;  %v7300_v25 = vadd.f32 %v6834_v17, %v1845_v12  ;;  %v7314_v17 = vpack.c.bf16 %v7147_v20, %v7142_v30 }
 0x264   : > { %v2977_v16 = vand.u32 4294901760, %v2976_v1 }
 0x265   : > { %v2984_v58 = vand.u32 4294901760, %v2983_v37  ;;  %v1856_v53 = vadd.f32 %v4303_v31, %v6920_v40  ;;  %v4304_v63 = vpop.f32.mrb[88].mxu1  ;;  %v7322_v40 = vpack.c.bf16 %v7169_v22, %v7161_v56 }
 0x266   : > { %v4305_v39 = vpop.f32.mrb[89].mxu1 }
 0x267   : > { %v7307_v0 = vpack.c.bf16 %v2984_v58, %v2977_v16  ;;  %v4306_v45 = vadd.f32 %v4305_v39, %v4304_v63  ;;  %v7310_v46 = vadd.f32 %v6840_v3, %v1856_v53 }
 0x269   : > { %v1867_v12 = vadd.f32 %v4306_v45, %v6936_v32  ;;  %v4307_v5 = vpop.f32.mrb[90].mxu1  ;;  %v7330_v32 = vpack.c.bf16 %v7187_v8, %v7182_v27 }
 0x26a   : > { %v4308_v1 = vpop.f32.mrb[91].mxu1 }
 0x26b   : > { %v4309_v51 = vadd.f32 %v4308_v1, %v4307_v5  ;;  %v7318_v37 = vadd.f32 %v6846_v26, %v1867_v12 }
 0x26d   : > { %v1878_v39 = vadd.f32 %v4309_v51, %v6957_v49  ;;  %v4310_v3 = vpop.f32.mrb[92].mxu1  ;;  %v7338_v49 = vpack.c.bf16 %v7215_v61, %v7208_v44 }
 0x26e   : > { %v4311_v31 = vpop.f32.mrb[93].mxu1 }
 0x26f   : > { %v4312_v16 = vadd.f32 %v4311_v31, %v4310_v3  ;;  %v7326_v58 = vadd.f32 %v6850_v55, %v1878_v39 }
 0x271   : > { %v1889_v53 = vadd.f32 %v4312_v16, %v6980_v52  ;;  %v4313_v26 = vpop.f32.mrb[94].mxu1  ;;  %v7346_v52 = vpack.c.bf16 %v7238_v2, %v7230_v4 }
 0x272   : > { %v4314_v63 = vpop.f32.mrb[95].mxu1 }
 0x273   : > { %v4315_v45 = vadd.f32 %v4314_v63, %v4313_v26  ;;  %v7334_v12 = vadd.f32 %v6856_v38, %v1889_v53 }
 0x275   : > { %v1900_v5 = vadd.f32 %v4315_v45, %v7004_v7  ;;  %v4316_v55 = vpop.f32.mrb[96].mxu1  ;;  %v7354_v7 = vpack.c.bf16 %v7254_v57, %v7249_v42 }
 0x276   : > { %v4317_v1 = vpop.f32.mrb[97].mxu1 }
 0x277   : > { %v4318_v51 = vadd.f32 %v4317_v1, %v4316_v55  ;;  %v7342_v39 = vadd.f32 %v6860_v59, %v1900_v5 }
 0x279   : > { %v1911_v3 = vadd.f32 %v4318_v51, %v7113_v23  ;;  %v4319_v38 = vpop.f32.mrb[98].mxu1  ;;  %v7362_v23 = vpack.c.bf16 %v7278_v50, %v7273_v18 }
 0x27a   : > { %v4320_v31 = vpop.f32.mrb[99].mxu1 }
 0x27b   : > { %v4321_v16 = vadd.f32 %v4320_v31, %v4319_v38  ;;  %v7350_v53 = vadd.f32 %v6866_v10, %v1911_v3 }
 0x27d   : > { %v1922_v26 = vadd.f32 %v4321_v16, %v7115_v33  ;;  %v4322_v59 = vpop.f32.mrb[100].mxu1 }
 0x27e   : > { %v4323_v63 = vpop.f32.mrb[101].mxu1 }
 0x27f   : > { %v4324_v45 = vadd.f32 %v4323_v63, %v4322_v59  ;;  %v7358_v5 = vadd.f32 %v6872_v34, %v1922_v26  ;;  %v7372_v34 = vld [vmem:[%s7804_s2 + $0x2] ss:$0 sm:$0xff]  ;;  %v2475_v63 = vpop.permute.xlu1 %2474 }
 0x281   : > { %v1933_v55 = vadd.f32 %v4324_v45, %v7117_v19  ;;  %v4325_v10 = vpop.f32.mrb[102].mxu1 }
 0x282   : > { %v4326_v1 = vpop.f32.mrb[103].mxu1 }
 0x283   : > { %v4327_v51 = vadd.f32 %v4326_v1, %v4325_v10  ;;  %v7366_v3 = vadd.f32 %v6878_v13, %v1933_v55  ;;  %v2537_v13 = vsub.f32 %v7372_v34, %v2475_v63  ;;  %v2479_v10 = vpop.permute.xlu0 %2478 }
 0x285   : > { %v1944_v33 = vadd.f32 %v4327_v51, %v7131_v28  ;;  %v4328_v38 = vpop.f32.mrb[104].mxu1 }
 0x286   : > { %v4329_v31 = vpop.f32.mrb[105].mxu1 }
 0x287   : > { %v4330_v16 = vadd.f32 %v4329_v31, %v4328_v38  ;;  %v7375_v26 = vadd.f32 %v6884_v14, %v1944_v33  ;;  %v2553_v38 = vand.u32 2147483647, %v2537_v13  ;;  %v2483_v14 = vpop.permute.xlu1 %2482  ;;  %v2538_v33 = vsub.f32 %v7372_v34, %v2479_v10 }
 0x289   : > { %v1955_v19 = vadd.f32 %v4330_v16, %v7151_v35  ;;  %v4331_v59 = vpop.f32.mrb[106].mxu1  ;;  %v2554_v50 = vand.u32 2147483647, %v2538_v33 }
 0x28a   : > { %v4332_v45 = vpop.f32.mrb[107].mxu1 }
 0x28b   : > { %v4333_v55 = vadd.f32 %v4332_v45, %v4331_v59  ;;  %v7380_v28 = vadd.f32 %v6890_v60, %v1955_v19  ;;  %v2569_v59 = vsub.f32 1.0, %v2553_v38  ;;  %v2539_v60 = vsub.f32 %v7372_v34, %v2483_v14  ;;  %v8234_v38 = vld [vmem:[#allocation5_spill] sm:$0xff] }
 0x28d   : > { %v1966_v1 = vadd.f32 %v4333_v55, %v7174_v9  ;;  %v4334_v51 = vpop.f32.mrb[108].mxu1  ;;  %v2585_v10 = vmax.f32 %v2569_v59, 0.0 }
 0x28e   : > { %v4335_v31 = vpop.f32.mrb[109].mxu1 }
 0x28f   : > { %v4336_v36 = vadd.f32 %v4335_v31, %v4334_v51  ;;  %v7385_v35 = vadd.f32 %v6896_v47, %v1966_v1  ;;  %v2487_v51 = vpop.permute.xlu1 %2486  ;;  %v2555_v31 = vand.u32 2147483647, %v2539_v60 }
 0x290   : > { %v2540_v47 = vsub.f32 %v7372_v34, %v2487_v51 }
 0x291   : > { %v1977_v16 = vadd.f32 %v4336_v36, %v7197_v62  ;;  %v4337_v63 = vpop.f32.mrb[110].mxu1  ;;  %v2570_v36 = vsub.f32 1.0, %v2554_v50 }
 0x292   : > { %v4338_v45 = vpop.f32.mrb[111].mxu1 }
 0x293   : > { %v4339_v19 = vadd.f32 %v4338_v45, %v4337_v63  ;;  %v7390_v9 = vadd.f32 %v6901_v6, %v1977_v16  ;;  %v2491_v63 = vpop.permute.xlu0 %2490  ;;  %v2556_v6 = vand.u32 2147483647, %v2540_v47  ;;  %v2571_v45 = vsub.f32 1.0, %v2555_v31  ;;  %v2495_v60 = vpop.permute.xlu1 %2494 }
 0x294   : > { %v2586_v59 = vmax.f32 %v2570_v36, 0.0 }
 0x295   : > { %v1988_v13 = vadd.f32 %v4339_v19, %v7220_v43  ;;  %v4452_v55 = vpop.f32.mrb[112].mxu1  ;;  %v2541_v43 = vsub.f32 %v7372_v34, %v2491_v63 }
 0x296   : > { %v4453_v1 = vpop.f32.mrb[113].mxu1 }
 0x297   : > { %v4454_v62 = vadd.f32 %v4453_v1, %v4452_v55  ;;  %v7395_v18 = vadd.f32 %v8234_v38, %v1988_v13  ;;  %v2572_v13 = vsub.f32 1.0, %v2556_v6  ;;  %v2542_v1 = vsub.f32 %v7372_v34, %v2495_v60 }
 0x298   : > { %v2587_v38 = vmax.f32 %v2571_v45, 0.0 }
 0x299   : > { %v2365_v14 = vadd.f32 %v4454_v62, %v7262_v41  ;;  %v4455_v33 = vpop.f32.mrb[114].mxu1  ;;  %v2557_v62 = vand.u32 2147483647, %v2541_v43  ;;  %v2558_v6 = vand.u32 2147483647, %v2542_v1 }
 0x29a   : > { %v4456_v16 = vpop.f32.mrb[115].mxu1 }
 0x29b   : > { %v2601_v19 = vmul.f32 %v2585_v10, %v2365_v14  ;;  %v4457_v57 = vadd.f32 %v4456_v16, %v4455_v33  ;;  %v2499_v33 = vpop.permute.xlu0 %2498  ;;  %v2573_v16 = vsub.f32 1.0, %v2557_v62 }
 0x29c   : > { %v2543_v43 = vsub.f32 %v7372_v34, %v2499_v33 }
 0x29d   : > { %v7399_v51 = vand.u32 4294901760, %v2601_v19  ;;  %v2372_v50 = vadd.f32 %v4457_v57, %v7286_v24  ;;  %v4458_v55 = vpop.f32.mrb[116].mxu1  ;;  %v2588_v24 = vmax.f32 %v2572_v13, 0.0 }
 0x29e   : > { %v4459_v41 = vpop.f32.mrb[117].mxu1  ;;  %v2559_v42 = vand.u32 2147483647, %v2543_v43 }
 0x29f   : > { %v7404_v47 = vsub.f32 %v2601_v19, %v7399_v51  ;;  %v2602_v63 = vmul.f32 %v2586_v59, %v2372_v50  ;;  %v4460_v31 = vadd.f32 %v4459_v41, %v4458_v55  ;;  %v2503_v55 = vpop.permute.xlu1 %2502 }
 0x2a0   : > { %v2544_v33 = vsub.f32 %v7372_v34, %v2503_v55  ;;  %v2575_v4 = vsub.f32 1.0, %v2559_v42 }
 0x2a1   : > { %v7406_v10 = vand.u32 4294901760, %v2602_v63  ;;  %v2379_v36 = vadd.f32 %v4460_v31, %v7300_v25  ;;  %v4461_v14 = vpop.f32.mrb[118].mxu1  ;;  %v7985_v57 = vand.u32 4294901760, %v7404_v47  ;;  %v2574_v31 = vsub.f32 1.0, %v2558_v6 }
 0x2a2   : > { %v4462_v60 = vpop.f32.mrb[119].mxu1  ;;  %v2560_v55 = vand.u32 2147483647, %v2544_v33 }
 0x2a3   : > { %v7412_v45 = vsub.f32 %v2602_v63, %v7406_v10  ;;  %v2603_v19 = vmul.f32 %v2587_v38, %v2379_v36  ;;  %v4463_v59 = vadd.f32 %v4462_v60, %v4461_v14  ;;  %v2717_v50 = vsub.f32 %v7404_v47, %v7985_v57 }
 0x2a4   : > { %v2589_v63 = vmax.f32 %v2573_v16, 0.0  ;;  %v2590_v43 = vmax.f32 %v2574_v31, 0.0 }
 0x2a5   : > { %v7988_v25 = vand.u32 4294901760, %v7412_v45  ;;  %v7418_v41 = vand.u32 4294901760, %v2603_v19  ;;  %v2386_v13 = vadd.f32 %v4463_v59, %v7310_v46  ;;  %v4464_v1 = vpop.f32.mrb[120].mxu1  ;;  %v2718_v62 = vand.u32 4294901760, %v2717_v50  ;;  %v2507_v59 = vpop.permute.xlu0 %2506 }
 0x2a6   : > { %v4465_v38 = vpop.f32.mrb[121].mxu1 }
 0x2a7   : > { %v2727_v36 = vsub.f32 %v7412_v45, %v7988_v25  ;;  %v7426_v14 = vsub.f32 %v2603_v19, %v7418_v41  ;;  %v2604_v60 = vmul.f32 %v2588_v24, %v2386_v13  ;;  %v4466_v57 = vadd.f32 %v4465_v38, %v4464_v1  ;;  %4724 = vmatprep.mubr.f32.mxu0 %v2718_v62  ;;  %v8236_v38 = vld [vmem:[#allocation33_spill] sm:$0xff] }
 0x2a8   : > { %v2545_v25 = vsub.f32 %v7372_v34, %v2507_v59 }
 0x2a9   : > { %v2728_v2 = vand.u32 4294901760, %v2727_v36  ;;  %v7428_v46 = vand.u32 4294901760, %v2604_v60  ;;  %v2393_v6 = vadd.f32 %v4466_v57, %v7318_v37  ;;  %v4467_v50 = vpop.f32.mrb[122].mxu1  ;;  %v7992_v16 = vand.u32 4294901760, %v7426_v14  ;;  %v8235_v57 = vld [vmem:[#allocation30_spill] sm:$0xff] }
 0x2aa   : > { %v4468_v61 = vpop.f32.mrb[123].mxu1  ;;  %v2576_v36 = vsub.f32 1.0, %v2560_v55 }
 0x2ab   : > { %v7434_v19 = vsub.f32 %v2604_v60, %v7428_v46  ;;  %v2605_v24 = vmul.f32 %v2589_v63, %v2393_v6  ;;  %v4469_v13 = vadd.f32 %v4468_v61, %v4467_v50  ;;  %4725 = vmatmul.mubr.f32.vlgmr.msra.gmra.mrb[48].mxu0 %v2728_v2  ;;  %v2737_v37 = vsub.f32 %v7426_v14, %v7992_v16  ;;  %v2511_v60 = vpop.permute.xlu1 %2510 }
 0x2ac   : > { %5255 = vmatpush3.bf16.msra.mxu0 %v8235_v57  ;;  %v2591_v63 = vmax.f32 %v2575_v4, 0.0  ;;  %v2561_v61 = vand.u32 2147483647, %v2545_v25 }
 0x2ad   : > { %v7440_v1 = vand.u32 4294901760, %v2605_v24  ;;  %v2400_v62 = vadd.f32 %v4469_v13, %v7326_v58  ;;  %v4470_v42 = vpop.f32.mrb[124].mxu1  ;;  %v2738_v31 = vand.u32 4294901760, %v2737_v37  ;;  %v7990_v33 = vand.u32 4294901760, %v7434_v19  ;;  %5257 = vmatprep.subr.bf16.mxu0 %v8236_v38 }
 0x2ae   : > { %v4471_v2 = vpop.f32.mrb[125].mxu1  ;;  %v2546_v13 = vsub.f32 %v7372_v34, %v2511_v60  ;;  %v2577_v57 = vsub.f32 1.0, %v2561_v61 }
 0x2af   : > { %v7446_v6 = vsub.f32 %v2605_v24, %v7440_v1  ;;  %v2606_v59 = vmul.f32 %v2590_v43, %v2400_v62  ;;  %v4472_v50 = vadd.f32 %v4471_v2, %v4470_v42  ;;  %4727 = vmatprep.mubr.f32.mxu0 %v2738_v31  ;;  %v2747_v58 = vsub.f32 %v7434_v19, %v7990_v33  ;;  %v2515_v31 = vpop.permute.xlu0 %2514 }
 0x2b0   : > { %5259 = vmatpush3.bf16.msra.mxu0 %v8236_v38  ;;  %v2592_v43 = vmax.f32 %v2576_v36, 0.0  ;;  %v2562_v38 = vand.u32 2147483647, %v2546_v13 }
 0x2b1   : > { %v7453_v37 = vand.u32 4294901760, %v2606_v59  ;;  %v2407_v4 = vadd.f32 %v4472_v50, %v7334_v12  ;;  %v4473_v25 = vpop.f32.mrb[126].mxu1  ;;  %v2748_v55 = vand.u32 4294901760, %v2747_v58  ;;  %v7991_v24 = vand.u32 4294901760, %v7446_v6  ;;  %5261 = vmatprep.subr.bf16.mxu0 %v7210_v15 }
 0x2b2   : > { %v4474_v62 = vpop.f32.mrb[127].mxu1  ;;  %v2547_v50 = vsub.f32 %v7372_v34, %v2515_v31 }
 0x2b3   : > { %v7459_v42 = vsub.f32 %v2606_v59, %v7453_v37  ;;  %v2607_v2 = vmul.f32 %v2591_v63, %v2407_v4  ;;  %v4475_v60 = vadd.f32 %v4474_v62, %v4473_v25  ;;  %4728 = vmatmul.mubr.f32.gmra.mrb[50].mxu0 %v2748_v55  ;;  %v2757_v12 = vsub.f32 %v7446_v6, %v7991_v24  ;;  %v8237_v63 = vld [vmem:[#allocation41_spill] sm:$0xff]  ;;  %v2519_v55 = vpop.permute.xlu1 %2518 }
 0x2b4   : > { %5263 = vmatpush3.bf16.msra.mxu0 %v7210_v15  ;;  %v2593_v4 = vmax.f32 %v2577_v57, 0.0 }
 0x2b5   : > { %v7466_v58 = vand.u32 4294901760, %v2607_v2  ;;  %v2414_v36 = vadd.f32 %v4475_v60, %v7342_v39  ;;  %v4476_v61 = vpop.f32.mrb[128].mxu1  ;;  %v2758_v59 = vand.u32 4294901760, %v2757_v12  ;;  %v7993_v33 = vand.u32 4294901760, %v7459_v42  ;;  %5265 = vmatprep.subr.bf16.mxu0 %v8237_v63 }
 0x2b6   : > { %v4477_v25 = vpop.f32.mrb[129].mxu1  ;;  %v2578_v39 = vsub.f32 1.0, %v2562_v38  ;;  %v2548_v60 = vsub.f32 %v7372_v34, %v2519_v55  ;;  %v2563_v12 = vand.u32 2147483647, %v2547_v50 }
 0x2b7   : > { %v7472_v62 = vsub.f32 %v2607_v2, %v7466_v58  ;;  %v2608_v13 = vmul.f32 %v2592_v43, %v2414_v36  ;;  %v4478_v31 = vadd.f32 %v4477_v25, %v4476_v61  ;;  %4730 = vmatprep.mubr.f32.mxu0 %v2758_v59  ;;  %v2767_v15 = vsub.f32 %v7459_v42, %v7993_v33  ;;  %v2523_v61 = vpop.permute.xlu0 %2522 }
 0x2b8   : > { %5267 = vmatpush3.bf16.msra.mxu0 %v8237_v63  ;;  %v2594_v63 = vmax.f32 %v2578_v39, 0.0  ;;  %v2579_v55 = vsub.f32 1.0, %v2563_v12 }
 0x2b9   : > { %v7479_v24 = vand.u32 4294901760, %v2608_v13  ;;  %v2421_v57 = vadd.f32 %v4478_v31, %v7350_v53  ;;  %v4479_v16 = vpop.f32.mrb[130].mxu1  ;;  %v2768_v2 = vand.u32 4294901760, %v2767_v15  ;;  %v7995_v43 = vand.u32 4294901760, %v7472_v62  ;;  %5269 = vmatprep.subr.bf16.mxu0 %v7256_v11 }
 0x2ba   : > { %v4480_v36 = vpop.f32.mrb[131].mxu1  ;;  %v2564_v53 = vand.u32 2147483647, %v2548_v60  ;;  %v2549_v31 = vsub.f32 %v7372_v34, %v2523_v61  ;;  %v2595_v61 = vmax.f32 %v2579_v55, 0.0 }
 0x2bb   : > { %v7485_v59 = vsub.f32 %v2608_v13, %v7479_v24  ;;  %v2609_v38 = vmul.f32 %v2593_v4, %v2421_v57  ;;  %v4481_v25 = vadd.f32 %v4480_v36, %v4479_v16  ;;  %4731 = vmatmul.mubr.f32.gmra.mrb[52].mxu0 %v2768_v2  ;;  %v2777_v50 = vsub.f32 %v7472_v62, %v7995_v43  ;;  %v8238_v4 = vld [vmem:[#allocation22_spill] sm:$0xff]  ;;  %v2527_v2 = vpop.permute.xlu1 %2526 }
 0x2bc   : > { %5271 = vmatpush3.bf16.msra.mxu0 %v7256_v11  ;;  %v2580_v36 = vsub.f32 1.0, %v2564_v53 }
 0x2bd   : > { %v7492_v15 = vand.u32 4294901760, %v2609_v38  ;;  %v2428_v33 = vadd.f32 %v4481_v25, %v7358_v5  ;;  %v4482_v13 = vpop.f32.mrb[132].mxu1  ;;  %v2778_v44 = vand.u32 4294901760, %v2777_v50  ;;  %v7997_v16 = vand.u32 4294901760, %v7485_v59  ;;  %5273 = vmatprep.subr.bf16.mxu0 %v8238_v4  ;;  %v2531_v50 = vpop.permute.xlu0 %2530 }
 0x2be   : > { %v4483_v57 = vpop.f32.mrb[133].mxu1  ;;  %v2550_v5 = vsub.f32 %v7372_v34, %v2527_v2  ;;  %v2565_v25 = vand.u32 2147483647, %v2549_v31  ;;  %v2551_v2 = vsub.f32 %v7372_v34, %v2531_v50 }
 0x2bf   : > { %v7498_v39 = vsub.f32 %v2609_v38, %v7492_v15  ;;  %v2610_v60 = vmul.f32 %v2594_v63, %v2428_v33  ;;  %v4484_v12 = vadd.f32 %v4483_v57, %v4482_v13  ;;  %4733 = vmatprep.mubr.f32.mxu0 %v2778_v44  ;;  %v2787_v11 = vsub.f32 %v7485_v59, %v7997_v16 }
 0x2c0   : > { %5275 = vmatpush3.bf16.msra.mxu0 %v8238_v4  ;;  %v2596_v4 = vmax.f32 %v2580_v36, 0.0  ;;  %v2566_v57 = vand.u32 2147483647, %v2550_v5 }
 0x2c1   : > { %v7505_v43 = vand.u32 4294901760, %v2610_v60  ;;  %v2435_v38 = vadd.f32 %v4484_v12, %v7366_v3  ;;  %v4485_v8 = vpop.f32.mrb[134].mxu1  ;;  %v2788_v33 = vand.u32 4294901760, %v2787_v11  ;;  %v7998_v44 = vand.u32 4294901760, %v7498_v39  ;;  %5277 = vmatprep.subr.bf16.mxu0 %v7294_v29  ;;  %v2535_v12 = vpop.permute.xlu1 %2534 }
 0x2c2   : > { %v4486_v63 = vpop.f32.mrb[135].mxu1  ;;  %v2581_v3 = vsub.f32 1.0, %v2565_v25  ;;  %v2582_v50 = vsub.f32 1.0, %v2566_v57 }
 0x2c3   : > { %v7511_v53 = vsub.f32 %v2610_v60, %v7505_v43  ;;  %v2611_v13 = vmul.f32 %v2595_v61, %v2435_v38  ;;  %v4487_v55 = vadd.f32 %v4486_v63, %v4485_v8  ;;  %4734 = vmatmul.mubr.f32.gmra.mrb[54].mxu0 %v2788_v33  ;;  %v2797_v31 = vsub.f32 %v7498_v39, %v7998_v44 }
 0x2c4   : > { %5279 = vmatpush3.bf16.msra.mxu0 %v7294_v29  ;;  %v2597_v33 = vmax.f32 %v2581_v3, 0.0  ;;  %v2567_v63 = vand.u32 2147483647, %v2551_v2  ;;  %v2598_v3 = vmax.f32 %v2582_v50, 0.0 }
 0x2c5   : > { %v7518_v11 = vand.u32 4294901760, %v2611_v13  ;;  %v2442_v60 = vadd.f32 %v4487_v55, %v7375_v26  ;;  %v4488_v16 = vpop.f32.mrb[136].mxu1  ;;  %v2798_v61 = vand.u32 4294901760, %v2797_v31  ;;  %v2806_v8 = vand.u32 4294901760, %v7511_v53  ;;  %5281 = vmatprep.subr.bf16.mxu0 %v7307_v0 }
 0x2c6   : > { %v4489_v38 = vpop.f32.mrb[137].mxu1  ;;  %v2552_v26 = vsub.f32 %v7372_v34, %v2535_v12 }
 0x2c7   : > { %v7524_v36 = vsub.f32 %v2611_v13, %v7518_v11  ;;  %v2612_v5 = vmul.f32 %v2596_v4, %v2442_v60  ;;  %v4490_v25 = vadd.f32 %v4489_v38, %v4488_v16  ;;  %4736 = vmatprep.mubr.f32.mxu0 %v2798_v61  ;;  %v2807_v29 = vsub.f32 %v7511_v53, %v2806_v8 }
 0x2c8   : > { %5283 = vmatpush3.bf16.msra.mxu0 %v7307_v0  ;;  %v2568_v2 = vand.u32 2147483647, %v2552_v26 }
 0x2c9   : > { %v7531_v55 = vand.u32 4294901760, %v2612_v5  ;;  %v2449_v31 = vadd.f32 %v4490_v25, %v7380_v28  ;;  %v4491_v13 = vpop.f32.mrb[138].mxu1  ;;  %v2808_v44 = vand.u32 4294901760, %v2807_v29  ;;  %v7999_v16 = vand.u32 4294901760, %v7524_v36  ;;  %5285 = vmatprep.subr.bf16.mxu0 %v7304_v54 }
 0x2ca   : > { %v4492_v4 = vpop.f32.mrb[139].mxu1  ;;  %v2583_v28 = vsub.f32 1.0, %v2567_v63  ;;  %v2584_v26 = vsub.f32 1.0, %v2568_v2 }
 0x2cb   : > { %v7537_v60 = vsub.f32 %v2612_v5, %v7531_v55  ;;  %v2613_v57 = vmul.f32 %v2597_v33, %v2449_v31  ;;  %v4493_v34 = vadd.f32 %v4492_v4, %v4491_v13  ;;  %4737 = vmatmul.mubr.f32.gmra.mrb[56].mxu0 %v2808_v44  ;;  %v2817_v0 = vsub.f32 %v7524_v36, %v7999_v16 }
 0x2cc   : > { %v2599_v63 = vmax.f32 %v2583_v28, 0.0  ;;  %v2600_v28 = vmax.f32 %v2584_v26, 0.0 }
 0x2cd   : > { %v7542_v12 = vand.u32 4294901760, %v2613_v57  ;;  %v2456_v61 = vadd.f32 %v4493_v34, %v7385_v35  ;;  %v4494_v38 = vpop.f32.mrb[140].mxu1  ;;  %v2818_v25 = vand.u32 4294901760, %v2817_v0  ;;  %v2826_v29 = vand.u32 4294901760, %v7537_v60 }
 0x2ce   : > { %v4495_v5 = vpop.f32.mrb[141].mxu1 }
 0x2cf   : > { %v7547_v33 = vsub.f32 %v2613_v57, %v7542_v12  ;;  %v2614_v44 = vmul.f32 %v2598_v3, %v2456_v61  ;;  %v4496_v31 = vadd.f32 %v4495_v5, %v4494_v38  ;;  %4739 = vmatprep.mubr.f32.mxu0 %v2818_v25  ;;  %v2827_v50 = vsub.f32 %v7537_v60, %v2826_v29 }
 0x2d1   : > { %v7552_v13 = vand.u32 4294901760, %v2614_v44  ;;  %v2463_v35 = vadd.f32 %v4496_v31, %v7390_v9  ;;  %v4497_v4 = vpop.f32.mrb[142].mxu1  ;;  %v2828_v34 = vand.u32 4294901760, %v2827_v50  ;;  %v2836_v0 = vand.u32 4294901760, %v7547_v33 }
 0x2d2   : > { %v4498_v16 = vpop.f32.mrb[143].mxu1 }
 0x2d3   : > { %v7557_v57 = vsub.f32 %v2614_v44, %v7552_v13  ;;  %v2615_v3 = vmul.f32 %v2599_v63, %v2463_v35  ;;  %v4499_v61 = vadd.f32 %v4498_v16, %v4497_v4  ;;  %4740 = vmatmul.mubr.f32.gmra.mrb[58].mxu0 %v2828_v34  ;;  %v2837_v2 = vsub.f32 %v7547_v33, %v2836_v0 }
 0x2d5   : > { %v7562_v38 = vand.u32 4294901760, %v2615_v3  ;;  %v2470_v9 = vadd.f32 %v4499_v61, %v7395_v18  ;;  %v2838_v25 = vand.u32 4294901760, %v2837_v2  ;;  %v2846_v5 = vand.u32 4294901760, %v7557_v57 }
 0x2d6   : > { %v8247_v2 = vand.u32 4294901760, %v7122_v48  ;;  %v8253_v48 = vand.u32 4294901760, %v7426_v14 }
 0x2d7   : > { %v7567_v31 = vsub.f32 %v2615_v3, %v7562_v38  ;;  %v2616_v44 = vmul.f32 %v2600_v28, %v2470_v9  ;;  %4742 = vmatprep.mubr.f32.mxu0 %v2838_v25  ;;  %v2847_v16 = vsub.f32 %v7557_v57, %v2846_v5  ;;  %v8248_v28 = vand.u32 4294901760, %v7127_v21 }
 0x2d8   : > { %v8249_v25 = vand.u32 4294901760, %v7404_v47  ;;  %v8254_v21 = vand.u32 4294901760, %v7161_v56  ;;  %v8262_v56 = vand.u32 4294901760, %v7472_v62 }
 0x2d9   : > { %v7572_v50 = vand.u32 4294901760, %v2616_v44  ;;  %v2848_v63 = vand.u32 4294901760, %v2847_v16  ;;  %v2856_v26 = vand.u32 4294901760, %v7567_v31  ;;  %v5348_v9 = vpack.c.bf16 %v8248_v28, %v8247_v2  ;;  %v8265_v28 = vld [vmem:[#allocation37_spill] sm:$0xff] }
 0x2da   : > { %v8251_v16 = vand.u32 4294901760, %v7147_v20  ;;  %v8258_v20 = vand.u32 4294901760, %v7182_v27  ;;  %v8261_v2 = vand.u32 4294901760, %v7459_v42  ;;  %v8268_v27 = vand.u32 4294901760, %v7498_v39 }
 0x2db   : > { %v7576_v35 = vsub.f32 %v2616_v44, %v7572_v50  ;;  %4743 = vmatmul.mubr.f32.gmra.mrb[60].mxu0 %v2848_v63  ;;  %v2857_v18 = vsub.f32 %v7567_v31, %v2856_v26  ;;  %v8250_v44 = vand.u32 4294901760, %v7142_v30  ;;  %v8257_v30 = vand.u32 4294901760, %v7446_v6 }
 0x2dd   : > { %v2858_v4 = vand.u32 4294901760, %v2857_v18  ;;  %v2866_v34 = vand.u32 4294901760, %v7576_v35  ;;  %v5352_v63 = vpack.c.bf16 %v8251_v16, %v8250_v44  ;;  %v8252_v18 = vand.u32 4294901760, %v7412_v45  ;;  %v8271_v16 = vld [vmem:[#allocation4_spill] sm:$0xff] }
 0x2df   : > { %4745 = vmatprep.mubr.f32.mxu0 %v2858_v4  ;;  %v2867_v3 = vsub.f32 %v7576_v35, %v2866_v34  ;;  %v8255_v4 = vand.u32 4294901760, %v7169_v22  ;;  %v8263_v22 = vld [vmem:[#allocation36_spill] sm:$0xff] }
 0x2e1   : > { %v2868_v61 = vand.u32 4294901760, %v2867_v3  ;;  %v8256_v3 = vand.u32 4294901760, %v7434_v19 }
 0x2e3   : > { %4746 = vmatmul.mubr.f32.gmra.mrb[62].mxu0 %v2868_v61 }
 0x2e4   : > { %4780 = vmatprep.mubr.f32.mxu0 %v7399_v51 }
 0x2e7   : > { %4781 = vmatmul.mubr.f32.vlgmr.msra.gmra.mrb[48].mxu0 %v7406_v10 }
 0x2e8   : > { %5287 = vmatpush3.bf16.msra.mxu0 %v7304_v54  ;;  %4783 = vmatprep.mubr.f32.mxu0 %v7418_v41  ;;  %v8239_v54 = vld [vmem:[#allocation6_spill] sm:$0xff] }
 0x2e9   : > { %5289 = vmatprep.subr.bf16.mxu0 %v7314_v17 }
 0x2eb   : > { %4784 = vmatmul.mubr.f32.gmra.mrb[50].mxu0 %v7428_v46 }
 0x2ec   : > { %5291 = vmatpush3.bf16.msra.mxu0 %v7314_v17  ;;  %4786 = vmatprep.mubr.f32.mxu0 %v7440_v1  ;;  %v8240_v17 = vld [vmem:[#allocation8_spill] sm:$0xff] }
 0x2ed   : > { %5293 = vmatprep.subr.bf16.mxu0 %v7322_v40 }
 0x2ef   : > { %4787 = vmatmul.mubr.f32.gmra.mrb[52].mxu0 %v7453_v37 }
 0x2f0   : > { %5295 = vmatpush3.bf16.msra.mxu0 %v7322_v40  ;;  %4789 = vmatprep.mubr.f32.mxu0 %v7466_v58  ;;  %v8241_v40 = vld [vmem:[#allocation17_spill] sm:$0xff] }
 0x2f1   : > { %5297 = vmatprep.subr.bf16.mxu0 %v7330_v32 }
 0x2f3   : > { %4790 = vmatmul.mubr.f32.gmra.mrb[54].mxu0 %v7479_v24 }
 0x2f4   : > { %5299 = vmatpush3.bf16.msra.mxu0 %v7330_v32  ;;  %4792 = vmatprep.mubr.f32.mxu0 %v7492_v15  ;;  %v8242_v32 = vld [vmem:[#allocation19_spill] sm:$0xff] }
 0x2f5   : > { %5301 = vmatprep.subr.bf16.mxu0 %v7338_v49 }
 0x2f7   : > { %4793 = vmatmul.mubr.f32.gmra.mrb[56].mxu0 %v7505_v43 }
 0x2f8   : > { %5303 = vmatpush3.bf16.msra.mxu0 %v7338_v49  ;;  %4795 = vmatprep.mubr.f32.mxu0 %v7518_v11  ;;  %v8243_v49 = vld [vmem:[#allocation21_spill] sm:$0xff] }
 0x2f9   : > { %5305 = vmatprep.subr.bf16.mxu0 %v7346_v52 }
 0x2fb   : > { %4796 = vmatmul.mubr.f32.gmra.mrb[58].mxu0 %v7531_v55 }
 0x2fc   : > { %5307 = vmatpush3.bf16.msra.mxu0 %v7346_v52  ;;  %4798 = vmatprep.mubr.f32.mxu0 %v7542_v12  ;;  %v8244_v52 = vld [vmem:[#allocation23_spill] sm:$0xff] }
 0x2fd   : > { %5309 = vmatprep.subr.bf16.mxu0 %v7354_v7 }
 0x2ff   : > { %4799 = vmatmul.mubr.f32.gmra.mrb[60].mxu0 %v7552_v13 }
 0x300   : > { %5311 = vmatpush3.bf16.msra.mxu0 %v7354_v7  ;;  %4801 = vmatprep.mubr.f32.mxu0 %v7562_v38  ;;  %v8245_v7 = vld [vmem:[#allocation25_spill] sm:$0xff] }
 0x301   : > { %5313 = vmatprep.subr.bf16.mxu0 %v7362_v23 }
 0x303   : > { %4802 = vmatmul.mubr.f32.gmra.mrb[62].mxu0 %v7572_v50 }
 0x304   : > { %5315 = vmatpush3.bf16.msra.mxu0 %v7362_v23  ;;  %4836 = vmatprep.mubr.f32.mxu0 %v7404_v47  ;;  %v8246_v23 = vld [vmem:[#allocation28_spill] sm:$0xff]  ;;  %v5356_v47 = vpack.c.bf16 %v8255_v4, %v8254_v21 }
 0x305   : > { %5317 = vmatprep.subr.bf16.mxu0 %v8239_v54  ;;  %v8276_v21 = vld [vmem:[#allocation16_spill] sm:$0xff] }
 0x306   : > { %v8277_v4 = vand.u32 4294901760, %v8276_v21 }
 0x307   : > { %4837 = vmatmul.mubr.f32.vlgmr.msra.gmra.mrb[48].mxu0 %v7412_v45  ;;  %v8259_v45 = vld [vmem:[#allocation31_spill] sm:$0xff] }
 0x308   : > { %5319 = vmatpush3.bf16.msra.mxu0 %v8239_v54  ;;  %4839 = vmatprep.mubr.f32.mxu0 %v7426_v14  ;;  %v8260_v61 = vand.u32 4294901760, %v8259_v45 }
 0x309   : > { %5321 = vmatprep.subr.bf16.mxu0 %v8240_v17 }
 0x30a   : > { %v5360_v14 = vpack.c.bf16 %v8260_v61, %v8258_v20 }
 0x30b   : > { %4840 = vmatmul.mubr.f32.gmra.mrb[50].mxu0 %v7434_v19  ;;  %v8264_v19 = vand.u32 4294901760, %v8263_v22 }
 0x30c   : > { %5323 = vmatpush3.bf16.msra.mxu0 %v8240_v17  ;;  %4842 = vmatprep.mubr.f32.mxu0 %v7446_v6 }
 0x30d   : > { %5325 = vmatprep.subr.bf16.mxu0 %v8241_v40 }
 0x30f   : > { %4843 = vmatmul.mubr.f32.gmra.mrb[52].mxu0 %v7459_v42  ;;  %v8269_v42 = vld [vmem:[#allocation2_spill] sm:$0xff] }
 0x310   : > { %5327 = vmatpush3.bf16.msra.mxu0 %v8241_v40  ;;  %4845 = vmatprep.mubr.f32.mxu0 %v7472_v62  ;;  %v8270_v44 = vand.u32 4294901760, %v8269_v42 }
 0x311   : > { %5329 = vmatprep.subr.bf16.mxu0 %v8242_v32 }
 0x313   : > { %4846 = vmatmul.mubr.f32.gmra.mrb[54].mxu0 %v7485_v59 }
 0x314   : > { %5331 = vmatpush3.bf16.msra.mxu0 %v8242_v32  ;;  %4848 = vmatprep.mubr.f32.mxu0 %v7498_v39 }
 0x315   : > { %5333 = vmatprep.subr.bf16.mxu0 %v8243_v49 }
 0x317   : > { %4849 = vmatmul.mubr.f32.gmra.mrb[56].mxu0 %v7511_v53  ;;  %v8278_v53 = vld [vmem:[#allocation18_spill] sm:$0xff] }
 0x318   : > { %5335 = vmatpush3.bf16.msra.mxu0 %v8243_v49  ;;  %4851 = vmatprep.mubr.f32.mxu0 %v7524_v36 }
 0x319   : > { %5337 = vmatprep.subr.bf16.mxu0 %v8244_v52 }
 0x31b   : > { %4852 = vmatmul.mubr.f32.gmra.mrb[58].mxu0 %v7537_v60 }
 0x31c   : > { %5339 = vmatpush3.bf16.msra.mxu0 %v8244_v52  ;;  %4854 = vmatprep.mubr.f32.mxu0 %v7547_v33 }
 0x31d   : > { %5341 = vmatprep.subr.bf16.mxu0 %v8245_v7 }
 0x31f   : > { %4855 = vmatmul.mubr.f32.gmra.mrb[60].mxu0 %v7557_v57 }
 0x320   : > { %5343 = vmatpush3.bf16.msra.mxu0 %v8245_v7  ;;  %4857 = vmatprep.mubr.f32.mxu0 %v7567_v31 }
 0x321   : > { %5345 = vmatprep.subr.bf16.mxu0 %v8246_v23 }
 0x323   : > { %4858 = vmatmul.mubr.f32.gmra.mrb[62].mxu0 %v7576_v35 }
 0x324   : > { %5347 = vmatpush3.bf16.msra.mxu0 %v8246_v23  ;;  %4892 = vmatprep.mubr.f32.mxu0 %v8249_v25  ;;  %v8267_v25 = vand.u32 4294901760, %v7485_v59  ;;  %v8274_v59 = vld [vmem:[#allocation7_spill] sm:$0xff] }
 0x325   : > { %5349 = vmatprep.subr.bf16.mxu0 %v5348_v9 }
 0x327   : > { %4893 = vmatmul.mubr.f32.vlgmr.msra.gmra.mrb[48].mxu0 %v8252_v18  ;;  %v8273_v18 = vand.u32 4294901760, %v7524_v36 }
 0x328   : > { %5351 = vmatpush3.bf16.msra.mxu0 %v5348_v9  ;;  %4895 = vmatprep.mubr.f32.mxu0 %v8253_v48  ;;  %v8266_v9 = vand.u32 4294901760, %v8265_v28  ;;  %v8275_v48 = vand.u32 4294901760, %v8274_v59 }
 0x329   : > { %5353 = vmatprep.subr.bf16.mxu0 %v5352_v63 }
 0x32a   : > { %v5364_v6 = vpack.c.bf16 %v8266_v9, %v8264_v19  ;;  %v5372_v39 = vpack.c.bf16 %v8277_v4, %v8275_v48 }
 0x32b   : > { %4896 = vmatmul.mubr.f32.gmra.mrb[50].mxu0 %v8256_v3 }
 0x32c   : > { %5355 = vmatpush3.bf16.msra.mxu0 %v5352_v63  ;;  %4898 = vmatprep.mubr.f32.mxu0 %v8257_v30  ;;  %v8272_v63 = vand.u32 4294901760, %v8271_v16 }
 0x32d   : > { %5357 = vmatprep.subr.bf16.mxu0 %v5356_v47 }
 0x32e   : > { %v5368_v62 = vpack.c.bf16 %v8272_v63, %v8270_v44 }
 0x32f   : > { %4899 = vmatmul.mubr.f32.gmra.mrb[52].mxu0 %v8261_v2 }
 0x330   : > { %5359 = vmatpush3.bf16.msra.mxu0 %v5356_v47  ;;  %4901 = vmatprep.mubr.f32.mxu0 %v8262_v56  ;;  %v8280_v47 = vld [vmem:[#allocation20_spill] sm:$0xff] }
 0x331   : > { %5361 = vmatprep.subr.bf16.mxu0 %v5360_v14  ;;  %v8281_v3 = vand.u32 4294901760, %v8280_v47 }
 0x333   : > { %4902 = vmatmul.mubr.f32.gmra.mrb[54].mxu0 %v8267_v25 }
 0x334   : > { %5363 = vmatpush3.bf16.msra.mxu0 %v5360_v14  ;;  %4904 = vmatprep.mubr.f32.mxu0 %v8268_v27 }
 0x335   : > { %5365 = vmatprep.subr.bf16.mxu0 %v5364_v6 }
 0x337   : > { %4905 = vmatmul.mubr.f32.gmra.mrb[56].mxu0 %v2806_v8  ;;  %v8279_v8 = vand.u32 4294901760, %v8278_v53 }
 0x338   : > { %5367 = vmatpush3.bf16.msra.mxu0 %v5364_v6  ;;  %4907 = vmatprep.mubr.f32.mxu0 %v8273_v18 }
 0x339   : > { %5369 = vmatprep.subr.bf16.mxu0 %v5368_v62  ;;  %v5376_v36 = vpack.c.bf16 %v8281_v3, %v8279_v8 }
 0x33b   : > { %4908 = vmatmul.mubr.f32.gmra.mrb[58].mxu0 %v2826_v29 }
 0x33c   : > { %5371 = vmatpush3.bf16.msra.mxu0 %v5368_v62  ;;  %4910 = vmatprep.mubr.f32.mxu0 %v2836_v0 }
 0x33d   : > { %5373 = vmatprep.subr.bf16.mxu0 %v5372_v39 }
 0x33f   : > { %4911 = vmatmul.mubr.f32.gmra.mrb[60].mxu0 %v2846_v5 }
 0x340   : > { %5375 = vmatpush3.bf16.msra.mxu0 %v5372_v39  ;;  %4913 = vmatprep.mubr.f32.mxu0 %v2856_v26 }
 0x341   : > { %5377 = vmatprep.subr.bf16.mxu0 %v5376_v36 }
 0x343   : > { %4914 = vmatmul.mubr.f32.gmra.mrb[62].mxu0 %v2866_v34 }
 0x344   : > { %5379 = vmatpush3.bf16.msra.mxu0 %v5376_v36  ;;  %4948 = vmatprep.mubr.f32.mxu0 %v7399_v51 }
 0x345   : > { %5381 = vmatprep.subr.bf16.mxu0 %v8239_v54 }
 0x347   : > { %4949 = vmatmul.mubr.f32.vlgmr.msra.gmra.mrb[48].mxu0 %v7406_v10 }
 0x348   : > { %5383 = vmatpush3.bf16.msra.mxu0 %v8239_v54  ;;  %4951 = vmatprep.mubr.f32.mxu0 %v7418_v41 }
 0x349   : > { %5385 = vmatprep.subr.bf16.mxu0 %v8240_v17 }
 0x34b   : > { %4952 = vmatmul.mubr.f32.gmra.mrb[50].mxu0 %v7428_v46 }
 0x34c   : > { %5387 = vmatpush3.bf16.msra.mxu0 %v8240_v17  ;;  %4954 = vmatprep.mubr.f32.mxu0 %v7440_v1 }
 0x34d   : > { %5389 = vmatprep.subr.bf16.mxu0 %v8241_v40 }
 0x34f   : > { %4955 = vmatmul.mubr.f32.gmra.mrb[52].mxu0 %v7453_v37 }
 0x350   : > { %5391 = vmatpush3.bf16.msra.mxu0 %v8241_v40  ;;  %4957 = vmatprep.mubr.f32.mxu0 %v7466_v58 }
 0x351   : > { %5393 = vmatprep.subr.bf16.mxu0 %v8242_v32 }
 0x353   : > { %4958 = vmatmul.mubr.f32.gmra.mrb[54].mxu0 %v7479_v24 }
 0x354   : > { %5395 = vmatpush3.bf16.msra.mxu0 %v8242_v32  ;;  %4960 = vmatprep.mubr.f32.mxu0 %v7492_v15 }
 0x355   : > { %5397 = vmatprep.subr.bf16.mxu0 %v8243_v49 }
 0x357   : > { %4961 = vmatmul.mubr.f32.gmra.mrb[56].mxu0 %v7505_v43 }
 0x358   : > { %5399 = vmatpush3.bf16.msra.mxu0 %v8243_v49  ;;  %4963 = vmatprep.mubr.f32.mxu0 %v7518_v11 }
 0x359   : > { %5401 = vmatprep.subr.bf16.mxu0 %v8244_v52 }
 0x35b   : > { %4964 = vmatmul.mubr.f32.gmra.mrb[58].mxu0 %v7531_v55 }
 0x35c   : > { %5403 = vmatpush3.bf16.msra.mxu0 %v8244_v52  ;;  %4966 = vmatprep.mubr.f32.mxu0 %v7542_v12 }
 0x35d   : > { %5405 = vmatprep.subr.bf16.mxu0 %v8245_v7 }
 0x35f   : > { %4967 = vmatmul.mubr.f32.gmra.mrb[60].mxu0 %v7552_v13 }
 0x360   : > { %5407 = vmatpush3.bf16.msra.mxu0 %v8245_v7  ;;  %4969 = vmatprep.mubr.f32.mxu0 %v7562_v38 }
 0x361   : > { %5409 = vmatprep.subr.bf16.mxu0 %v8246_v23 }
 0x363   : > { %4970 = vmatmul.mubr.f32.gmra.mrb[62].mxu0 %v7572_v50 }
 0x364   : > { %5411 = vmatpush3.bf16.msra.mxu0 %v8246_v23  ;;  %5004 = vmatprep.mubr.f32.mxu0 %v7399_v51 }
 0x367   : > { %5005 = vmatmul.mubr.f32.vlgmr.msra.gmra.mrb[48].mxu0 %v7406_v10 }
 0x368   : > { %5007 = vmatprep.mubr.f32.mxu0 %v7418_v41 }
 0x36b   : > { %5008 = vmatmul.mubr.f32.gmra.mrb[50].mxu0 %v7428_v46 }
 0x36c   : > { %5010 = vmatprep.mubr.f32.mxu0 %v7440_v1 }
 0x36f   : > { %5011 = vmatmul.mubr.f32.gmra.mrb[52].mxu0 %v7453_v37 }
 0x370   : > { %5013 = vmatprep.mubr.f32.mxu0 %v7466_v58 }
 0x373   : > { %5014 = vmatmul.mubr.f32.gmra.mrb[54].mxu0 %v7479_v24 }
 0x374   : > { %5016 = vmatprep.mubr.f32.mxu0 %v7492_v15 }
 0x377   : > { %5017 = vmatmul.mubr.f32.gmra.mrb[56].mxu0 %v7505_v43 }
 0x378   : > { %5019 = vmatprep.mubr.f32.mxu0 %v7518_v11 }
 0x37b   : > { %5020 = vmatmul.mubr.f32.gmra.mrb[58].mxu0 %v7531_v55 }
 0x37c   : > { %5022 = vmatprep.mubr.f32.mxu0 %v7542_v12 }
 0x37f   : > { %5023 = vmatmul.mubr.f32.gmra.mrb[60].mxu0 %v7552_v13 }
 0x380   : > { %5025 = vmatprep.mubr.f32.mxu0 %v7562_v38 }
 0x383   : > { %5026 = vmatmul.mubr.f32.gmra.mrb[62].mxu0 %v7572_v50 }
 0x43a   : > { %v5006_v51 = vpop.f32.mrb[48].mxu0 }
 0x43b   : > { %3921 = vst.msk [vmem:[%s7765_s9 + $0x8] sm:$0xff] %vm3919_vm0, %v5006_v51  ;;  %v3825_v10 = vpop.f32.mrb[49].mxu0 }
 0x43c   : > { %3920 = vst.msk [vmem:[%s7765_s9] sm:$0xff] %vm3919_vm0, %v3825_v10 }
 0x43e   : > { %v5009_v41 = vpop.f32.mrb[50].mxu0 }
 0x43f   : > { %3923 = vst.msk [vmem:[%s7765_s9 + $0x18] sm:$0xff] %vm3919_vm0, %v5009_v41  ;;  %v3837_v46 = vpop.f32.mrb[51].mxu0 }
 0x440   : > { %3922 = vst.msk [vmem:[%s7765_s9 + $0x10] sm:$0xff] %vm3919_vm0, %v3837_v46 }
 0x442   : > { %v5012_v1 = vpop.f32.mrb[52].mxu0 }
 0x443   : > { %3925 = vst.msk [vmem:[%s7765_s9 + $0x28] sm:$0xff] %vm3919_vm0, %v5012_v1  ;;  %v3849_v37 = vpop.f32.mrb[53].mxu0 }
 0x444   : > { %3924 = vst.msk [vmem:[%s7765_s9 + $0x20] sm:$0xff] %vm3919_vm0, %v3849_v37 }
 0x446   : > { %v5015_v24 = vpop.f32.mrb[54].mxu0 }
 0x447   : > { %3927 = vst.msk [vmem:[%s7765_s9 + $0x38] sm:$0xff] %vm3919_vm0, %v5015_v24  ;;  %v3861_v58 = vpop.f32.mrb[55].mxu0 }
 0x448   : > { %3926 = vst.msk [vmem:[%s7765_s9 + $0x30] sm:$0xff] %vm3919_vm0, %v3861_v58 }
 0x44a   : > { %v5018_v43 = vpop.f32.mrb[56].mxu0 }
 0x44b   : > { %3929 = vst.msk [vmem:[%s7765_s9 + $0x48] sm:$0xff] %vm3919_vm0, %v5018_v43  ;;  %v3873_v15 = vpop.f32.mrb[57].mxu0 }
 0x44c   : > { %3928 = vst.msk [vmem:[%s7765_s9 + $0x40] sm:$0xff] %vm3919_vm0, %v3873_v15 }
 0x44e   : > { %v5021_v11 = vpop.f32.mrb[58].mxu0 }
 0x44f   : > { %3931 = vst.msk [vmem:[%s7765_s9 + $0x58] sm:$0xff] %vm3919_vm0, %v5021_v11  ;;  %v3885_v55 = vpop.f32.mrb[59].mxu0 }
 0x450   : > { %3930 = vst.msk [vmem:[%s7765_s9 + $0x50] sm:$0xff] %vm3919_vm0, %v3885_v55 }
 0x452   : > { %v5024_v60 = vpop.f32.mrb[60].mxu0 }
 0x453   : > { %3933 = vst.msk [vmem:[%s7765_s9 + $0x68] sm:$0xff] %vm3919_vm0, %v5024_v60  ;;  %v3897_v12 = vpop.f32.mrb[61].mxu0 }
 0x454   : > { %3932 = vst.msk [vmem:[%s7765_s9 + $0x60] sm:$0xff] %vm3919_vm0, %v3897_v12 }
 0x456   : > { %v5027_v29 = vpop.f32.mrb[62].mxu0 }
 0x457   : > { %3935 = vst.msk [vmem:[%s7765_s9 + $0x78] sm:$0xff] %vm3919_vm0, %v5027_v29  ;;  %v3909_v33 = vpop.f32.mrb[63].mxu0 }
 0x458   : > { %3934 = vst.msk [vmem:[%s7765_s9 + $0x70] sm:$0xff] %vm3919_vm0, %v3909_v33 }
 0x459 PF: > { %s14_s15 = sadd.s32 1, %s5532_s15  }
 0x45a   : > { %p11_p4 = scmp.ge.s32.totalorder %s14_s15, 4  }
 0x45c   :  { %13 = sbr.rel (!%p11_p4) target bundleno = 1 (0x1), region = 67 }

</bundles_post_ra>
